<compile_context>
chip_gen: v6e
topology: v6e:2x2x1
jax: 0.10.0
libtpu: 0.0.40
codegen_flags: <defaults>
</compile_context>

<pallas_src>
import functools
import numpy as np
import jax
import jax.numpy as jnp
from jax.experimental import pallas as pl
from jax.experimental.pallas import tpu as pltpu

GN_EPS = 1e-5


def _aspp_kernel(x_ref, w_ref, b_ref, p_ref, mask_ref, gamma_ref, beta_ref,
                 alpha_ref, o_ref, slab_ref, *, K, dilation, Hp, Wp, Sw, Cin_p):
    # x_ref:    (1, Cin_p, Sp_pad) bf16  -- zero-padded, flattened input volume
    # w_ref:    (Cout, KC) bf16          -- conv weight, rows ordered (kd,kh,kw,c)
    # b_ref:    (Cout, 1) f32
    # p_ref:    (Cout, Cout) f32         -- group-averaging matrix (incl. 1/(S*gs))
    # mask_ref: (1, Sw) f32              -- 1.0 on valid output columns
    # gamma_ref/beta_ref: (Cout, 1) f32
    # alpha_ref: (1, 1) f32 in SMEM      -- PReLU slope
    # o_ref:    (1, Cout, Sw) f32        -- lane-dense output slab
    # slab_ref: (KC, Sw) bf16 VMEM scratch -- im2col slab built in-kernel

    # ---- build the (KC, Sw) patch slab from K^3 contiguous lane slices ----
    xv = x_ref[0]                                              # (Cin_p, Sp_pad)
    t = 0
    for kd in range(K):
        for kh in range(K):
            for kw in range(K):
                off = dilation * (kd * Hp * Wp + kh * Wp + kw)
                slab_ref[t * Cin_p:(t + 1) * Cin_p, :] = xv[:, off:off + Sw]
                t += 1

    # ---- atrous Conv3d as one lane-dense MXU matmul (bf16 in, f32 acc) ----
    y = jnp.dot(w_ref[...], slab_ref[...],
                preferred_element_type=jnp.float32) + b_ref[...]   # (Cout, Sw)

    # ---- GroupNorm(16): two-pass masked statistics ----
    m = mask_ref[...]                                           # (1, Sw)
    ch_sum = jnp.sum(y * m, axis=1, keepdims=True)              # (Cout, 1)
    mean_c = jnp.dot(p_ref[...], ch_sum,
                     preferred_element_type=jnp.float32)        # (Cout, 1)
    cen = (y - mean_c) * m
    var_c = jnp.dot(p_ref[...], jnp.sum(cen * cen, axis=1, keepdims=True),
                    preferred_element_type=jnp.float32)         # (Cout, 1)
    inv = jax.lax.rsqrt(var_c + GN_EPS)
    yn = (y - mean_c) * inv * gamma_ref[...] + beta_ref[...]

    # ---- PReLU (single shared slope, scalar read from SMEM) ----
    a = alpha_ref[0, 0]
    o_ref[0] = jnp.where(yn >= 0, yn, a * yn).astype(o_ref.dtype)


def aspp_forward(x, params, *, kernel_size, padding, dilation, num_groups=16):
    """x: (N, Cin, D, H, W) float32. Returns (N, Cout, Do, Ho, Wo) float32."""
    w, b, gamma, beta, alpha = (params["w"], params["b"], params["gamma"],
                                params["beta"], params["alpha"])
    N, Cin, D, H, W = x.shape
    Cout = w.shape[0]
    K = kernel_size
    assert Cout % num_groups == 0
    gs = Cout // num_groups

    Do = D + 2 * padding - dilation * (K - 1)
    Ho = H + 2 * padding - dilation * (K - 1)
    Wo = W + 2 * padding - dilation * (K - 1)
    Dp, Hp, Wp = D + 2 * padding, H + 2 * padding, W + 2 * padding
    S = Do * Ho * Wo                  # valid output positions per sample
    Sw = Do * Hp * Wp                 # padded-grid span the kernel computes
    off_max = dilation * (K - 1) * (Hp * Wp + Wp + 1)
    Sp_pad = ((Sw + off_max + 127) // 128) * 128   # flattened-input lane length

    # channels padded to a bf16-friendly sublane multiple
    Cin_p = ((Cin + 15) // 16) * 16
    KC = K * K * K * Cin_p

    # ---- inputs: pad channels + spatial, flatten padded volume, cast bf16 ----
    xp = jnp.pad(x, ((0, 0), (0, Cin_p - Cin),
                     (padding, padding), (padding, padding), (padding, padding)))
    x_flat = xp.reshape(N, Cin_p, Dp * Hp * Wp)
    x_flat = jnp.pad(x_flat, ((0, 0), (0, 0), (0, Sp_pad - Dp * Hp * Wp)))
    x_flat = x_flat.astype(jnp.bfloat16)

    # PyTorch weight (Cout,Cin,kD,kH,kW) -> (Cout,kD,kH,kW,Cin_p) -> (Cout, KC)
    w_p = jnp.pad(w, ((0, 0), (0, Cin_p - Cin), (0, 0), (0, 0), (0, 0)))
    wf = jnp.transpose(w_p, (0, 2, 3, 4, 1)).reshape(Cout, KC).astype(jnp.bfloat16)

    b2 = b.reshape(Cout, 1).astype(jnp.float32)
    gamma2 = gamma.reshape(Cout, 1).astype(jnp.float32)
    beta2 = beta.reshape(Cout, 1).astype(jnp.float32)
    alpha2 = jnp.asarray(alpha, jnp.float32).reshape(1, 1)

    # group-averaging matrix: folds the old 4-matmul stat chain + 1/(S*gs)
    gidx = np.arange(Cout) // gs
    p_np = (gidx[:, None] == gidx[None, :]).astype(np.float32) / float(S * gs)
    p_mat = jnp.asarray(p_np)

    # lane mask: 1.0 where a padded-grid column is a real output position
    plane = ((np.arange(Hp)[:, None] < Ho) &
             (np.arange(Wp)[None, :] < Wo)).astype(np.float32)
    mask = jnp.asarray(np.broadcast_to(plane[None], (Do, Hp, Wp)).reshape(1, Sw))

    kern = functools.partial(_aspp_kernel, K=K, dilation=dilation,
                             Hp=Hp, Wp=Wp, Sw=Sw, Cin_p=Cin_p)

    # TODO(synk): for production ASPP sizes add an S-tile grid axis with a
    # two-pass (stats, then normalize) GroupNorm so blocks fit v7x's 64 MiB VMEM.
    out_flat = pl.pallas_call(
        kern,
        out_shape=jax.ShapeDtypeStruct((N, Cout, Sw), jnp.float32),
        grid=(N,),
        in_specs=[
            pl.BlockSpec((1, Cin_p, Sp_pad), lambda n: (n, 0, 0)),
            pl.BlockSpec((Cout, KC), lambda n: (0, 0)),
            pl.BlockSpec((Cout, 1), lambda n: (0, 0)),
            pl.BlockSpec((Cout, Cout), lambda n: (0, 0)),
            pl.BlockSpec((1, Sw), lambda n: (0, 0)),
            pl.BlockSpec((Cout, 1), lambda n: (0, 0)),
            pl.BlockSpec((Cout, 1), lambda n: (0, 0)),
            pl.BlockSpec(memory_space=pltpu.MemorySpace.SMEM),
        ],
        out_specs=pl.BlockSpec((1, Cout, Sw), lambda n: (n, 0, 0)),
        scratch_shapes=[pltpu.VMEM((KC, Sw), jnp.bfloat16)],
        compiler_params=pltpu.CompilerParams(
            dimension_semantics=("parallel",)),
    )(x_flat, wf, b2, p_mat, mask, gamma2, beta2, alpha2)

    # (N, Cout, Sw) -> (N, Cout, Do, Hp, Wp) -> drop the h/w overhang: NCDHW out
    out = out_flat.reshape(N, Cout, Do, Hp, Wp)[:, :, :, :Ho, :Wo]
    return out


def _reference(x, params, *, kernel_size, padding, dilation, num_groups=16):
    """Pure-JAX f32 reference of the same math (correctness check)."""
    w, b, gamma, beta, alpha = (params["w"], params["b"], params["gamma"],
                                params["beta"], params["alpha"])
    dn = jax.lax.conv_dimension_numbers(x.shape, w.shape,
                                        ("NCDHW", "OIDHW", "NCDHW"))
    y = jax.lax.conv_general_dilated(
        x, w, window_strides=(1, 1, 1),
        padding=[(padding, padding)] * 3,
        rhs_dilation=(dilation, dilation, dilation),
        dimension_numbers=dn) + b.reshape(1, -1, 1, 1, 1)
    N, C, D, H, W = y.shape
    gs = C // num_groups
    yg = y.reshape(N, num_groups, gs, D, H, W)
    mean = yg.mean(axis=(2, 3, 4, 5), keepdims=True)
    var = ((yg - mean) ** 2).mean(axis=(2, 3, 4, 5), keepdims=True)
    yn = ((yg - mean) / jnp.sqrt(var + GN_EPS)).reshape(N, C, D, H, W)
    yn = yn * gamma.reshape(1, -1, 1, 1, 1) + beta.reshape(1, -1, 1, 1, 1)
    return jnp.where(yn >= 0, yn, alpha * yn)


if __name__ == "__main__":
    # _ASPPModule(inplanes=4, planes=32, kernel_size=3, padding=2, dilation=2)
    N, Cin, D, H, W = 2, 4, 8, 8, 8
    Cout, K, PAD, DIL = 32, 3, 2, 2

    key = jax.random.PRNGKey(0)
    kx, kw, kb = jax.random.split(key, 3)

    fan_in = Cin * K * K * K
    params = {
        # kaiming_normal_ (fan_in, relu gain): std = sqrt(2 / fan_in)
        "w": jax.random.normal(kw, (Cout, Cin, K, K, K), jnp.float32)
             * np.sqrt(2.0 / fan_in),
        # Conv3d bias default init: U(-1/sqrt(fan_in), 1/sqrt(fan_in))
        "b": jax.random.uniform(kb, (Cout,), jnp.float32,
                                -1.0 / np.sqrt(fan_in), 1.0 / np.sqrt(fan_in)),
        "gamma": jnp.ones((Cout,), jnp.float32),   # GroupNorm weight
        "beta": jnp.zeros((Cout,), jnp.float32),   # GroupNorm bias
        "alpha": jnp.float32(0.25),                # PReLU default single param
    }

    x = jax.random.normal(kx, (N, Cin, D, H, W), jnp.float32)

    out = aspp_forward(x, params, kernel_size=K, padding=PAD, dilation=DIL)
    out = jax.block_until_ready(out)

    ref = _reference(x, params, kernel_size=K, padding=PAD, dilation=DIL)
    np.testing.assert_allclose(np.asarray(out), np.asarray(ref),
                               atol=2e-2, rtol=2e-2)
    print("KERNEL_OK")
</pallas_src>

<mosaic_0001>
module attributes {stable_mosaic.version = 11 : i64} {
  func.func @_aspp_kernel(%arg0: i32, %arg1: memref<1x16x1792xbf16, #tpu.memory_space<vmem>>, %arg2: memref<32x432xbf16, #tpu.memory_space<vmem>>, %arg3: memref<32x1xf32, #tpu.memory_space<vmem>>, %arg4: memref<32x32xf32, #tpu.memory_space<vmem>>, %arg5: memref<1x1152xf32, #tpu.memory_space<vmem>>, %arg6: memref<32x1xf32, #tpu.memory_space<vmem>>, %arg7: memref<32x1xf32, #tpu.memory_space<vmem>>, %arg8: memref<1x1xf32, #tpu.memory_space<smem>>, %arg9: memref<1x32x1152xf32, #tpu.memory_space<vmem>>, %arg10: memref<432x1152xbf16, #tpu.memory_space<vmem>>) attributes {dimension_semantics = [#tpu.dimension_semantics<parallel>], iteration_bounds = array<i64: 2>, scalar_prefetch = 0 : i64, scratch_operands = 1 : i64, tpu.core_type = #tpu.core_type<tc>, window_params = [{transform_indices = @transform_0, window_bounds = array<i64: 1, 16, 1792>}, {pipeline_mode = #tpu.pipeline_mode<synchronous>, transform_indices = @transform_1, window_bounds = array<i64: 32, 432>}, {pipeline_mode = #tpu.pipeline_mode<synchronous>, transform_indices = @transform_2, window_bounds = array<i64: 32, 1>}, {pipeline_mode = #tpu.pipeline_mode<synchronous>, transform_indices = @transform_3, window_bounds = array<i64: 32, 32>}, {pipeline_mode = #tpu.pipeline_mode<synchronous>, transform_indices = @transform_4, window_bounds = array<i64: 1, 1152>}, {pipeline_mode = #tpu.pipeline_mode<synchronous>, transform_indices = @transform_5, window_bounds = array<i64: 32, 1>}, {pipeline_mode = #tpu.pipeline_mode<synchronous>, transform_indices = @transform_6, window_bounds = array<i64: 32, 1>}, {transform_indices = @transform_7, window_bounds = array<i64: 1, 1>}, {transform_indices = @transform_8, window_bounds = array<i64: 1, 32, 1152>}]} {
    %c0 = arith.constant 0 : index
    %c0_0 = arith.constant 0 : index
    %c0_1 = arith.constant 0 : index
    %0 = vector.load %arg1[%c0, %c0_0, %c0_1] : memref<1x16x1792xbf16, #tpu.memory_space<vmem>>, vector<1x16x1792xbf16>
    %1 = vector.shape_cast %0 : vector<1x16x1792xbf16> to vector<16x1792xbf16>
    %2 = vector.extract_strided_slice %1 {offsets = [0, 0], sizes = [16, 1152], strides = [1, 1]} : vector<16x1792xbf16> to vector<16x1152xbf16>
    %c0_2 = arith.constant 0 : index
    %c0_3 = arith.constant 0 : index
    %3 = vector.load %arg10[%c0_2, %c0_3] : memref<432x1152xbf16, #tpu.memory_space<vmem>>, vector<16x1152xbf16>
    tpu.vector_store %arg10[%c0_2, %c0_3], %2 {strides = array<i32>} : memref<432x1152xbf16, #tpu.memory_space<vmem>>, vector<16x1152xbf16>,
    %4 = vector.extract_strided_slice %1 {offsets = [0, 2], sizes = [16, 1152], strides = [1, 1]} : vector<16x1792xbf16> to vector<16x1152xbf16>
    %c16 = arith.constant 16 : index
    %c0_4 = arith.constant 0 : index
    %5 = vector.load %arg10[%c16, %c0_4] : memref<432x1152xbf16, #tpu.memory_space<vmem>>, vector<16x1152xbf16>
    tpu.vector_store %arg10[%c16, %c0_4], %4 {strides = array<i32>} : memref<432x1152xbf16, #tpu.memory_space<vmem>>, vector<16x1152xbf16>,
    %6 = vector.extract_strided_slice %1 {offsets = [0, 4], sizes = [16, 1152], strides = [1, 1]} : vector<16x1792xbf16> to vector<16x1152xbf16>
    %c32 = arith.constant 32 : index
    %c0_5 = arith.constant 0 : index
    %7 = vector.load %arg10[%c32, %c0_5] : memref<432x1152xbf16, #tpu.memory_space<vmem>>, vector<16x1152xbf16>
    tpu.vector_store %arg10[%c32, %c0_5], %6 {strides = array<i32>} : memref<432x1152xbf16, #tpu.memory_space<vmem>>, vector<16x1152xbf16>,
    %8 = vector.extract_strided_slice %1 {offsets = [0, 24], sizes = [16, 1152], strides = [1, 1]} : vector<16x1792xbf16> to vector<16x1152xbf16>
    %c48 = arith.constant 48 : index
    %c0_6 = arith.constant 0 : index
    %9 = vector.load %arg10[%c48, %c0_6] : memref<432x1152xbf16, #tpu.memory_space<vmem>>, vector<16x1152xbf16>
    tpu.vector_store %arg10[%c48, %c0_6], %8 {strides = array<i32>} : memref<432x1152xbf16, #tpu.memory_space<vmem>>, vector<16x1152xbf16>,
    %10 = vector.extract_strided_slice %1 {offsets = [0, 26], sizes = [16, 1152], strides = [1, 1]} : vector<16x1792xbf16> to vector<16x1152xbf16>
    %c64 = arith.constant 64 : index
    %c0_7 = arith.constant 0 : index
    %11 = vector.load %arg10[%c64, %c0_7] : memref<432x1152xbf16, #tpu.memory_space<vmem>>, vector<16x1152xbf16>
    tpu.vector_store %arg10[%c64, %c0_7], %10 {strides = array<i32>} : memref<432x1152xbf16, #tpu.memory_space<vmem>>, vector<16x1152xbf16>,
    %12 = vector.extract_strided_slice %1 {offsets = [0, 28], sizes = [16, 1152], strides = [1, 1]} : vector<16x1792xbf16> to vector<16x1152xbf16>
    %c80 = arith.constant 80 : index
    %c0_8 = arith.constant 0 : index
    %13 = vector.load %arg10[%c80, %c0_8] : memref<432x1152xbf16, #tpu.memory_space<vmem>>, vector<16x1152xbf16>
    tpu.vector_store %arg10[%c80, %c0_8], %12 {strides = array<i32>} : memref<432x1152xbf16, #tpu.memory_space<vmem>>, vector<16x1152xbf16>,
    %14 = vector.extract_strided_slice %1 {offsets = [0, 48], sizes = [16, 1152], strides = [1, 1]} : vector<16x1792xbf16> to vector<16x1152xbf16>
    %c96 = arith.constant 96 : index
    %c0_9 = arith.constant 0 : index
    %15 = vector.load %arg10[%c96, %c0_9] : memref<432x1152xbf16, #tpu.memory_space<vmem>>, vector<16x1152xbf16>
    tpu.vector_store %arg10[%c96, %c0_9], %14 {strides = array<i32>} : memref<432x1152xbf16, #tpu.memory_space<vmem>>, vector<16x1152xbf16>,
    %16 = vector.extract_strided_slice %1 {offsets = [0, 50], sizes = [16, 1152], strides = [1, 1]} : vector<16x1792xbf16> to vector<16x1152xbf16>
    %c112 = arith.constant 112 : index
    %c0_10 = arith.constant 0 : index
    %17 = vector.load %arg10[%c112, %c0_10] : memref<432x1152xbf16, #tpu.memory_space<vmem>>, vector<16x1152xbf16>
    tpu.vector_store %arg10[%c112, %c0_10], %16 {strides = array<i32>} : memref<432x1152xbf16, #tpu.memory_space<vmem>>, vector<16x1152xbf16>,
    %18 = vector.extract_strided_slice %1 {offsets = [0, 52], sizes = [16, 1152], strides = [1, 1]} : vector<16x1792xbf16> to vector<16x1152xbf16>
    %c128 = arith.constant 128 : index
    %c0_11 = arith.constant 0 : index
    %19 = vector.load %arg10[%c128, %c0_11] : memref<432x1152xbf16, #tpu.memory_space<vmem>>, vector<16x1152xbf16>
    tpu.vector_store %arg10[%c128, %c0_11], %18 {strides = array<i32>} : memref<432x1152xbf16, #tpu.memory_space<vmem>>, vector<16x1152xbf16>,
    %20 = vector.extract_strided_slice %1 {offsets = [0, 288], sizes = [16, 1152], strides = [1, 1]} : vector<16x1792xbf16> to vector<16x1152xbf16>
    %c144 = arith.constant 144 : index
    %c0_12 = arith.constant 0 : index
    %21 = vector.load %arg10[%c144, %c0_12] : memref<432x1152xbf16, #tpu.memory_space<vmem>>, vector<16x1152xbf16>
    tpu.vector_store %arg10[%c144, %c0_12], %20 {strides = array<i32>} : memref<432x1152xbf16, #tpu.memory_space<vmem>>, vector<16x1152xbf16>,
    %22 = vector.extract_strided_slice %1 {offsets = [0, 290], sizes = [16, 1152], strides = [1, 1]} : vector<16x1792xbf16> to vector<16x1152xbf16>
    %c160 = arith.constant 160 : index
    %c0_13 = arith.constant 0 : index
    %23 = vector.load %arg10[%c160, %c0_13] : memref<432x1152xbf16, #tpu.memory_space<vmem>>, vector<16x1152xbf16>
    tpu.vector_store %arg10[%c160, %c0_13], %22 {strides = array<i32>} : memref<432x1152xbf16, #tpu.memory_space<vmem>>, vector<16x1152xbf16>,
    %24 = vector.extract_strided_slice %1 {offsets = [0, 292], sizes = [16, 1152], strides = [1, 1]} : vector<16x1792xbf16> to vector<16x1152xbf16>
    %c176 = arith.constant 176 : index
    %c0_14 = arith.constant 0 : index
    %25 = vector.load %arg10[%c176, %c0_14] : memref<432x1152xbf16, #tpu.memory_space<vmem>>, vector<16x1152xbf16>
    tpu.vector_store %arg10[%c176, %c0_14], %24 {strides = array<i32>} : memref<432x1152xbf16, #tpu.memory_space<vmem>>, vector<16x1152xbf16>,
    %26 = vector.extract_strided_slice %1 {offsets = [0, 312], sizes = [16, 1152], strides = [1, 1]} : vector<16x1792xbf16> to vector<16x1152xbf16>
    %c192 = arith.constant 192 : index
    %c0_15 = arith.constant 0 : index
    %27 = vector.load %arg10[%c192, %c0_15] : memref<432x1152xbf16, #tpu.memory_space<vmem>>, vector<16x1152xbf16>
    tpu.vector_store %arg10[%c192, %c0_15], %26 {strides = array<i32>} : memref<432x1152xbf16, #tpu.memory_space<vmem>>, vector<16x1152xbf16>,
    %28 = vector.extract_strided_slice %1 {offsets = [0, 314], sizes = [16, 1152], strides = [1, 1]} : vector<16x1792xbf16> to vector<16x1152xbf16>
    %c208 = arith.constant 208 : index
    %c0_16 = arith.constant 0 : index
    %29 = vector.load %arg10[%c208, %c0_16] : memref<432x1152xbf16, #tpu.memory_space<vmem>>, vector<16x1152xbf16>
    tpu.vector_store %arg10[%c208, %c0_16], %28 {strides = array<i32>} : memref<432x1152xbf16, #tpu.memory_space<vmem>>, vector<16x1152xbf16>,
    %30 = vector.extract_strided_slice %1 {offsets = [0, 316], sizes = [16, 1152], strides = [1, 1]} : vector<16x1792xbf16> to vector<16x1152xbf16>
    %c224 = arith.constant 224 : index
    %c0_17 = arith.constant 0 : index
    %31 = vector.load %arg10[%c224, %c0_17] : memref<432x1152xbf16, #tpu.memory_space<vmem>>, vector<16x1152xbf16>
    tpu.vector_store %arg10[%c224, %c0_17], %30 {strides = array<i32>} : memref<432x1152xbf16, #tpu.memory_space<vmem>>, vector<16x1152xbf16>,
    %32 = vector.extract_strided_slice %1 {offsets = [0, 336], sizes = [16, 1152], strides = [1, 1]} : vector<16x1792xbf16> to vector<16x1152xbf16>
    %c240 = arith.constant 240 : index
    %c0_18 = arith.constant 0 : index
    %33 = vector.load %arg10[%c240, %c0_18] : memref<432x1152xbf16, #tpu.memory_space<vmem>>, vector<16x1152xbf16>
    tpu.vector_store %arg10[%c240, %c0_18], %32 {strides = array<i32>} : memref<432x1152xbf16, #tpu.memory_space<vmem>>, vector<16x1152xbf16>,
    %34 = vector.extract_strided_slice %1 {offsets = [0, 338], sizes = [16, 1152], strides = [1, 1]} : vector<16x1792xbf16> to vector<16x1152xbf16>
    %c256 = arith.constant 256 : index
    %c0_19 = arith.constant 0 : index
    %35 = vector.load %arg10[%c256, %c0_19] : memref<432x1152xbf16, #tpu.memory_space<vmem>>, vector<16x1152xbf16>
    tpu.vector_store %arg10[%c256, %c0_19], %34 {strides = array<i32>} : memref<432x1152xbf16, #tpu.memory_space<vmem>>, vector<16x1152xbf16>,
    %36 = vector.extract_strided_slice %1 {offsets = [0, 340], sizes = [16, 1152], strides = [1, 1]} : vector<16x1792xbf16> to vector<16x1152xbf16>
    %c272 = arith.constant 272 : index
    %c0_20 = arith.constant 0 : index
    %37 = vector.load %arg10[%c272, %c0_20] : memref<432x1152xbf16, #tpu.memory_space<vmem>>, vector<16x1152xbf16>
    tpu.vector_store %arg10[%c272, %c0_20], %36 {strides = array<i32>} : memref<432x1152xbf16, #tpu.memory_space<vmem>>, vector<16x1152xbf16>,
    %38 = vector.extract_strided_slice %1 {offsets = [0, 576], sizes = [16, 1152], strides = [1, 1]} : vector<16x1792xbf16> to vector<16x1152xbf16>
    %c288 = arith.constant 288 : index
    %c0_21 = arith.constant 0 : index
    %39 = vector.load %arg10[%c288, %c0_21] : memref<432x1152xbf16, #tpu.memory_space<vmem>>, vector<16x1152xbf16>
    tpu.vector_store %arg10[%c288, %c0_21], %38 {strides = array<i32>} : memref<432x1152xbf16, #tpu.memory_space<vmem>>, vector<16x1152xbf16>,
    %40 = vector.extract_strided_slice %1 {offsets = [0, 578], sizes = [16, 1152], strides = [1, 1]} : vector<16x1792xbf16> to vector<16x1152xbf16>
    %c304 = arith.constant 304 : index
    %c0_22 = arith.constant 0 : index
    %41 = vector.load %arg10[%c304, %c0_22] : memref<432x1152xbf16, #tpu.memory_space<vmem>>, vector<16x1152xbf16>
    tpu.vector_store %arg10[%c304, %c0_22], %40 {strides = array<i32>} : memref<432x1152xbf16, #tpu.memory_space<vmem>>, vector<16x1152xbf16>,
    %42 = vector.extract_strided_slice %1 {offsets = [0, 580], sizes = [16, 1152], strides = [1, 1]} : vector<16x1792xbf16> to vector<16x1152xbf16>
    %c320 = arith.constant 320 : index
    %c0_23 = arith.constant 0 : index
    %43 = vector.load %arg10[%c320, %c0_23] : memref<432x1152xbf16, #tpu.memory_space<vmem>>, vector<16x1152xbf16>
    tpu.vector_store %arg10[%c320, %c0_23], %42 {strides = array<i32>} : memref<432x1152xbf16, #tpu.memory_space<vmem>>, vector<16x1152xbf16>,
    %44 = vector.extract_strided_slice %1 {offsets = [0, 600], sizes = [16, 1152], strides = [1, 1]} : vector<16x1792xbf16> to vector<16x1152xbf16>
    %c336 = arith.constant 336 : index
    %c0_24 = arith.constant 0 : index
    %45 = vector.load %arg10[%c336, %c0_24] : memref<432x1152xbf16, #tpu.memory_space<vmem>>, vector<16x1152xbf16>
    tpu.vector_store %arg10[%c336, %c0_24], %44 {strides = array<i32>} : memref<432x1152xbf16, #tpu.memory_space<vmem>>, vector<16x1152xbf16>,
    %46 = vector.extract_strided_slice %1 {offsets = [0, 602], sizes = [16, 1152], strides = [1, 1]} : vector<16x1792xbf16> to vector<16x1152xbf16>
    %c352 = arith.constant 352 : index
    %c0_25 = arith.constant 0 : index
    %47 = vector.load %arg10[%c352, %c0_25] : memref<432x1152xbf16, #tpu.memory_space<vmem>>, vector<16x1152xbf16>
    tpu.vector_store %arg10[%c352, %c0_25], %46 {strides = array<i32>} : memref<432x1152xbf16, #tpu.memory_space<vmem>>, vector<16x1152xbf16>,
    %48 = vector.extract_strided_slice %1 {offsets = [0, 604], sizes = [16, 1152], strides = [1, 1]} : vector<16x1792xbf16> to vector<16x1152xbf16>
    %c368 = arith.constant 368 : index
    %c0_26 = arith.constant 0 : index
    %49 = vector.load %arg10[%c368, %c0_26] : memref<432x1152xbf16, #tpu.memory_space<vmem>>, vector<16x1152xbf16>
    tpu.vector_store %arg10[%c368, %c0_26], %48 {strides = array<i32>} : memref<432x1152xbf16, #tpu.memory_space<vmem>>, vector<16x1152xbf16>,
    %50 = vector.extract_strided_slice %1 {offsets = [0, 624], sizes = [16, 1152], strides = [1, 1]} : vector<16x1792xbf16> to vector<16x1152xbf16>
    %c384 = arith.constant 384 : index
    %c0_27 = arith.constant 0 : index
    %51 = vector.load %arg10[%c384, %c0_27] : memref<432x1152xbf16, #tpu.memory_space<vmem>>, vector<16x1152xbf16>
    tpu.vector_store %arg10[%c384, %c0_27], %50 {strides = array<i32>} : memref<432x1152xbf16, #tpu.memory_space<vmem>>, vector<16x1152xbf16>,
    %52 = vector.extract_strided_slice %1 {offsets = [0, 626], sizes = [16, 1152], strides = [1, 1]} : vector<16x1792xbf16> to vector<16x1152xbf16>
    %c400 = arith.constant 400 : index
    %c0_28 = arith.constant 0 : index
    %53 = vector.load %arg10[%c400, %c0_28] : memref<432x1152xbf16, #tpu.memory_space<vmem>>, vector<16x1152xbf16>
    tpu.vector_store %arg10[%c400, %c0_28], %52 {strides = array<i32>} : memref<432x1152xbf16, #tpu.memory_space<vmem>>, vector<16x1152xbf16>,
    %54 = vector.extract_strided_slice %1 {offsets = [0, 628], sizes = [16, 1152], strides = [1, 1]} : vector<16x1792xbf16> to vector<16x1152xbf16>
    %c416 = arith.constant 416 : index
    %c0_29 = arith.constant 0 : index
    %55 = vector.load %arg10[%c416, %c0_29] : memref<432x1152xbf16, #tpu.memory_space<vmem>>, vector<16x1152xbf16>
    tpu.vector_store %arg10[%c416, %c0_29], %54 {strides = array<i32>} : memref<432x1152xbf16, #tpu.memory_space<vmem>>, vector<16x1152xbf16>,
    %c0_30 = arith.constant 0 : index
    %c0_31 = arith.constant 0 : index
    %56 = vector.load %arg2[%c0_30, %c0_31] : memref<32x432xbf16, #tpu.memory_space<vmem>>, vector<32x432xbf16>
    %c0_32 = arith.constant 0 : index
    %c0_33 = arith.constant 0 : index
    %57 = vector.load %arg10[%c0_32, %c0_33] : memref<432x1152xbf16, #tpu.memory_space<vmem>>, vector<432x1152xbf16>
    %cst = arith.constant dense<0.000000e+00> : vector<32x1152xf32>
    %58 = tpu.matmul %56, %57, %cst {dimension_numbers = #tpu.dot_dimension_numbers<[1], [0], [0], [1], [0, 0, 1, 1], [], []>} : vector<32x432xbf16>, vector<432x1152xbf16>, vector<32x1152xf32> -> vector<32x1152xf32>
    %c0_34 = arith.constant 0 : index
    %c0_35 = arith.constant 0 : index
    %59 = vector.load %arg3[%c0_34, %c0_35] : memref<32x1xf32, #tpu.memory_space<vmem>>, vector<32x1xf32>
    %60 = vector.broadcast %59 : vector<32x1xf32> to vector<32x1152xf32>
    %61 = arith.addf %58, %60 : vector<32x1152xf32>
    %c0_36 = arith.constant 0 : index
    %c0_37 = arith.constant 0 : index
    %62 = vector.load %arg5[%c0_36, %c0_37] : memref<1x1152xf32, #tpu.memory_space<vmem>>, vector<1x1152xf32>
    %63 = vector.broadcast %62 : vector<1x1152xf32> to vector<32x1152xf32>
    %64 = arith.mulf %61, %63 : vector<32x1152xf32>
    %cst_38 = arith.constant dense<0.000000e+00> : vector<32xf32>
    %65 = vector.multi_reduction <add>, %64, %cst_38 [1] : vector<32x1152xf32> to vector<32xf32>
    %66 = vector.shape_cast %65 : vector<32xf32> to vector<32x1xf32>
    %c0_39 = arith.constant 0 : index
    %c0_40 = arith.constant 0 : index
    %67 = vector.load %arg4[%c0_39, %c0_40] : memref<32x32xf32, #tpu.memory_space<vmem>>, vector<32x32xf32>
    %cst_41 = arith.constant dense<0.000000e+00> : vector<32x1xf32>
    %68 = tpu.matmul %67, %66, %cst_41 {dimension_numbers = #tpu.dot_dimension_numbers<[1], [0], [0], [1], [0, 0, 1, 1], [], []>} : vector<32x32xf32>, vector<32x1xf32>, vector<32x1xf32> -> vector<32x1xf32>
    %69 = vector.broadcast %68 : vector<32x1xf32> to vector<32x1152xf32>
    %70 = arith.subf %61, %69 : vector<32x1152xf32>
    %71 = vector.broadcast %62 : vector<1x1152xf32> to vector<32x1152xf32>
    %72 = arith.mulf %70, %71 : vector<32x1152xf32>
    %c0_42 = arith.constant 0 : index
    %c0_43 = arith.constant 0 : index
    %73 = vector.load %arg4[%c0_42, %c0_43] : memref<32x32xf32, #tpu.memory_space<vmem>>, vector<32x32xf32>
    %74 = arith.mulf %72, %72 : vector<32x1152xf32>
    %cst_44 = arith.constant dense<0.000000e+00> : vector<32xf32>
    %75 = vector.multi_reduction <add>, %74, %cst_44 [1] : vector<32x1152xf32> to vector<32xf32>
    %76 = vector.shape_cast %75 : vector<32xf32> to vector<32x1xf32>
    %cst_45 = arith.constant dense<0.000000e+00> : vector<32x1xf32>
    %77 = tpu.matmul %73, %76, %cst_45 {dimension_numbers = #tpu.dot_dimension_numbers<[1], [0], [0], [1], [0, 0, 1, 1], [], []>} : vector<32x32xf32>, vector<32x1xf32>, vector<32x1xf32> -> vector<32x1xf32>
    %cst_46 = arith.constant 9.99999974E-6 : f32
    %78 = vector.broadcast %cst_46 : f32 to vector<32x1xf32>
    %79 = arith.addf %77, %78 : vector<32x1xf32>
    %80 = math.rsqrt %79 : vector<32x1xf32>
    %81 = vector.broadcast %68 : vector<32x1xf32> to vector<32x1152xf32>
    %82 = arith.subf %61, %81 : vector<32x1152xf32>
    %83 = vector.broadcast %80 : vector<32x1xf32> to vector<32x1152xf32>
    %84 = arith.mulf %82, %83 : vector<32x1152xf32>
    %c0_47 = arith.constant 0 : index
    %c0_48 = arith.constant 0 : index
    %85 = vector.load %arg6[%c0_47, %c0_48] : memref<32x1xf32, #tpu.memory_space<vmem>>, vector<32x1xf32>
    %86 = vector.broadcast %85 : vector<32x1xf32> to vector<32x1152xf32>
    %87 = arith.mulf %84, %86 : vector<32x1152xf32>
    %c0_49 = arith.constant 0 : index
    %c0_50 = arith.constant 0 : index
    %88 = vector.load %arg7[%c0_49, %c0_50] : memref<32x1xf32, #tpu.memory_space<vmem>>, vector<32x1xf32>
    %89 = vector.broadcast %88 : vector<32x1xf32> to vector<32x1152xf32>
    %90 = arith.addf %87, %89 : vector<32x1152xf32>
    %c0_51 = arith.constant 0 : index
    %c0_52 = arith.constant 0 : index
    %91 = memref.load %arg8[%c0_51, %c0_52] : memref<1x1xf32, #tpu.memory_space<smem>>
    %cst_53 = arith.constant 0.000000e+00 : f32
    %92 = vector.broadcast %cst_53 : f32 to vector<32x1152xf32>
    %93 = arith.cmpf oge, %90, %92 : vector<32x1152xf32>
    %94 = vector.broadcast %91 : f32 to vector<32x1152xf32>
    %95 = arith.mulf %94, %90 : vector<32x1152xf32>
    %96 = arith.select %93, %90, %95 : vector<32x1152xi1>, vector<32x1152xf32>
    %c0_54 = arith.constant 0 : index
    %c0_55 = arith.constant 0 : index
    %c0_56 = arith.constant 0 : index
    %97 = vector.load %arg9[%c0_54, %c0_55, %c0_56] : memref<1x32x1152xf32, #tpu.memory_space<vmem>>, vector<1x32x1152xf32>
    %98 = vector.shape_cast %97 : vector<1x32x1152xf32> to vector<32x1152xf32>
    %99 = vector.shape_cast %96 : vector<32x1152xf32> to vector<1x32x1152xf32>
    tpu.vector_store %arg9[%c0_54, %c0_55, %c0_56], %99 {strides = array<i32>} : memref<1x32x1152xf32, #tpu.memory_space<vmem>>, vector<1x32x1152xf32>,
    return
  }
  func.func @transform_0(%arg0: i32) -> (i32, i32, i32) {
    %c0_i32 = arith.constant 0 : i32
    %c0_i32_0 = arith.constant 0 : i32
    %c0_i32_1 = arith.constant 0 : i32
    return %arg0, %c0_i32, %c0_i32_0 : i32, i32, i32
  }
  func.func @transform_1(%arg0: i32) -> (i32, i32) {
    %c0_i32 = arith.constant 0 : i32
    %c0_i32_0 = arith.constant 0 : i32
    %c0_i32_1 = arith.constant 0 : i32
    return %c0_i32, %c0_i32_0 : i32, i32
  }
  func.func @transform_2(%arg0: i32) -> (i32, i32) {
    %c0_i32 = arith.constant 0 : i32
    %c0_i32_0 = arith.constant 0 : i32
    %c0_i32_1 = arith.constant 0 : i32
    return %c0_i32, %c0_i32_0 : i32, i32
  }
  func.func @transform_3(%arg0: i32) -> (i32, i32) {
    %c0_i32 = arith.constant 0 : i32
    %c0_i32_0 = arith.constant 0 : i32
    %c0_i32_1 = arith.constant 0 : i32
    return %c0_i32, %c0_i32_0 : i32, i32
  }
  func.func @transform_4(%arg0: i32) -> (i32, i32) {
    %c0_i32 = arith.constant 0 : i32
    %c0_i32_0 = arith.constant 0 : i32
    %c0_i32_1 = arith.constant 0 : i32
    return %c0_i32, %c0_i32_0 : i32, i32
  }
  func.func @transform_5(%arg0: i32) -> (i32, i32) {
    %c0_i32 = arith.constant 0 : i32
    %c0_i32_0 = arith.constant 0 : i32
    %c0_i32_1 = arith.constant 0 : i32
    return %c0_i32, %c0_i32_0 : i32, i32
  }
  func.func @transform_6(%arg0: i32) -> (i32, i32) {
    %c0_i32 = arith.constant 0 : i32
    %c0_i32_0 = arith.constant 0 : i32
    %c0_i32_1 = arith.constant 0 : i32
    return %c0_i32, %c0_i32_0 : i32, i32
  }
  func.func @transform_7(%arg0: i32) -> (i32, i32) {
    %c0_i32 = arith.constant 0 : i32
    %c0_i32_0 = arith.constant 0 : i32
    %c0_i32_1 = arith.constant 0 : i32
    return %c0_i32, %c0_i32_0 : i32, i32
  }
  func.func @transform_8(%arg0: i32) -> (i32, i32, i32) {
    %c0_i32 = arith.constant 0 : i32
    %c0_i32_0 = arith.constant 0 : i32
    %c0_i32_1 = arith.constant 0 : i32
    return %arg0, %c0_i32, %c0_i32_0 : i32, i32, i32
  }
}

</mosaic_0001>

<bundles_post_ra>
// kernel: tpu_custom_call.1
= control target key start
LH: loop header
LB: loop body
LE: loop exit
PB: predicated region body
PF: predicated region fallthrough
CT: control target
= control target key end

     0   :  { %s9259_s0 = inlined_call_operand.hbm [shape: bf16[2,16,1792], index: 0, kind: input, shape index: {}]   ;;  %s9260_s1 = inlined_call_operand.vmem [shape: bf16[32,432], index: 1, kind: input, shape index: {}]   ;;  %s9261_s2 = inlined_call_operand.vmem [shape: f32[32,1], index: 2, kind: input, shape index: {}]   ;;  %s9262_s3 = inlined_call_operand.vmem [shape: f32[32,32], index: 3, kind: input, shape index: {}]   ;;  %s9263_s4 = inlined_call_operand.vmem [shape: f32[1,1152], index: 4, kind: input, shape index: {}]   ;;  %s9264_s5 = inlined_call_operand.vmem [shape: f32[32,1], index: 5, kind: input, shape index: {}]   ;;  %s9265_s6 = inlined_call_operand.vmem [shape: f32[32,1], index: 6, kind: input, shape index: {}]   ;;  %s9266_s7 = inlined_call_operand.<no memory space> [shape: f32[1,1], index: 7, kind: input, shape index: {}]   ;;  %s9267_s8 = inlined_call_operand.hbm [shape: f32[2,32,1152], index: 8, kind: output, shape index: {}]  }
   0x1   :  { %9554 = sst [smem:[#allocation37_spill]] %s9259_s0 }
   0x2   :  { %9555 = sst [smem:[#allocation38_spill]] %s9267_s8 }
   0x3   :  { %13 = sst [smem:[#allocation3]] %s9266_s7 }
   0x4   :  { %14 = vsyncpa [#allocation5], 0 }
   0x5   :  { %16 = vsyncpa [#allocation5 + $0x1], 0 }
   0x6   :  { %17 = vsyncpa [#allocation6], 0 }
   0x7   :  { %19 = vsyncpa [#allocation6 + $0x1], 0  ;;  %s5850_s29 = smov 0   ;;  %s5852_s30 = smov 0  }
   0x8   :  { %s5854_s9 = smov 0   ;;  %s5856_s10 = smov 0  }
   0x9 LB: > { %9556 = sst [smem:[#allocation10_spill]] %s5756_s29  ;;  %s5871_s7 = sadd.s32 4294967295, %s5768_s10   ;;  %s5768_s10 = sphi %s5856_s10, %s9940_s10   ;;  %s5764_s9 = sphi %s5854_s9, %s9943_s9   ;;  %s5760_s30 = sphi %s5852_s30, %s9942_s30   ;;  %s5756_s29 = sphi %s5850_s29, %s9941_s29  }
   0xa   : > { %9557 = sst [smem:[#allocation11_spill]] %s5760_s30  ;;  %s5163_s11 = sadd.s32 4294967294, %s5768_s10  }
   0xb   : > { %9558 = sst [smem:[#allocation12_spill]] %s5764_s9  ;;  %s5875_s12 = sadd.s32 1, %s5768_s10  }
   0xc   : > { %9559 = sst [smem:[#allocation13_spill]] %s5768_s10  ;;  %s32_s13 = sadd.s32 1, %s5764_s9 }
   0xd   : > { %9560 = sst [smem:[#allocation14_spill]] %s5871_s7  ;;  %s29_s14 = ssub.s32 %s5768_s10, %s5875_s12 }
   0xe   : > { %9561 = sst [smem:[#allocation15_spill]] %s5875_s12  ;;  %p39_p0 = scmp.ne.s32.totalorder %s5764_s9, %s5760_s30 }
   0xf   : > { %p30_p1 = scmp.eq.s32.totalorder %s29_s14, 0  ;;  %p40_p2 = scmp.eq.s32.totalorder %s5768_s10, 0 }
  0x10   : > { %p45_p3 = scmp.ne.s32.totalorder %s5760_s30, %s5756_s29  ;;  %p46_p4 = scmp.eq.s32.totalorder %s5871_s7, 0 }
  0x11   : > { %s5887_s15 = scalar_select %p30_p1, %s5764_s9, %s32_s13  }
  0x12   : > { %p41_p5 = por %p40_p2, %p39_p0  ;;  %p5889_p6 = por %p46_p4, %p45_p3 }
  0x13   : > { %9562 = sst [smem:[#allocation16_spill]] %s5887_s15  ;;  %p216_p7 = scmp.eq.s32.totalorder %s5871_s7, 1 }
  0x14   : > { %s9563_s16 = scalar_select %p5889_p6, 1, 0 }
  0x15   : > { %p222_p8 = scmp.eq.s32.totalorder %s5163_s11, 1  ;;  %p5530_p10 = scmp.lt.s32.totalorder %s5768_s10, 2 }
  0x16   : > { %p5896_p11 = por %p216_p7, %p39_p0  ;;  %s263_s19 = sand.u32 1, %s5764_s9  }
  0x17   : > { %p5900_p12 = por %p222_p8, %p45_p3  ;;  %s5514_s20 = smul.u32 1792, %s5768_s10 }
  0x18   : > { %s9564_s17 = scalar_select %p5896_p11, 1, 0 }
  0x19   : > { %s9566_s18 = scalar_select %p5900_p12, 1, 0 }
  0x1a   : > { %9565 = sst [smem:[#allocation17_spill]] %s9564_s17  ;;  %s5513_s21 = smul.u32 112, %s263_s19 }
  0x1b   : > { %9567 = sst [smem:[#allocation18_spill]] %s9566_s18  ;;  %p5911_p13 = pnand %p5530_p10, %p41_p5 }
  0x1c   : > { %s9568_s0 = sld [smem:[#allocation37_spill]]  ;;  %s267_s26 = scalar_lea.vmem [#allocation4], %s5513_s21 }
  0x1d   : > { %s274_s27 = sshll.u32 %s267_s26, 4  ;;  %s5917_s28 = scalar_lea.sflag [#allocation5], %s263_s19  ;;  %s5915_s27 = int_to_ptr.vmem [resolvable:$true] %s274_s27 }
  0x1e   : > { %p5678_p1 = pneg %p5911_p13 }
  0x22   : > { %s5909_s24 = scalar_lea.hbm %s9568_s0, %s5514_s20  ;;  %s5681_s20 = scalar_lea.hbm %s9568_s0, 3584 }
  0x23   : > { %s5676_s11 = scalar_lea.hbm %s5909_s24, 1792  ;;  %p5682_p4 = scmp.lt.s32.totalorder %s5909_s24, %s9568_s0 }
  0x24   : > { %p5677_p0 = scmp.ne.s32.totalorder %s5909_s24, %s5676_s11  ;;  %p5683_p5 = scmp.lt.s32.totalorder %s5681_s20, %s5676_s11 }
  0x26   : > { %p5679_p2 = pnand %p5678_p1, %p5677_p0  ;;  %p5684_p7 = por %p5683_p5, %p5682_p4 }
  0x28   : > { %p5680_p3 = pneg %p5679_p2 }
  0x2a   : > { %p5685_p8 = pnand %p5684_p7, %p5680_p3 }
  0x2c   : > { %5688 = shalt.err (!%p5685_p8)
}
  0x2d   : > { %s5689_s19 = scalar_lea.vmem %s5915_s27, 1792  ;;  %s5770_s21 = smov [#allocation4]  }
  0x2e   : > { %p5690_p10 = scmp.ne.s32.totalorder %s5915_s27, %s5689_s19  ;;  %s5694_s26 = sshll.u32 %s5770_s21, 4  ;;  %s5695_s26 = int_to_ptr.vmem [resolvable:$false] %s5694_s26 }
  0x2f   : > { %s5696_s13 = scalar_lea.vmem %s5695_s26, 3584  ;;  %p5697_p2 = scmp.lt.s32.totalorder %s5915_s27, %s5695_s26 }
  0x30   : > { %p5692_p9 = pnand %p5690_p10, %p5678_p1  ;;  %p5698_p12 = scmp.lt.s32.totalorder %s5696_s13, %s5689_s19 }
  0x32   : > { %p5693_p0 = pneg %p5692_p9  ;;  %p5699_p11 = por %p5698_p12, %p5697_p2 }
  0x34   : > { %p5700_p6 = pnand %p5699_p11, %p5693_p0 }
  0x36   : > { %5703 = shalt.err (!%p5700_p6)
}
  0x37   : > { %s5771_s11 = smov 896   ;;  %s5772_s14 = smov 56  }
  0x38   : > { %5525 = dma.hbm_to_vmem [thread:$0]  (!%p5911_p13), %s5909_s24, 1792, %s5915_s27, %s5917_s28, %s5771_s11, %s5771_s11, %s5772_s14  }
  0x39   : > { %p5167_p9 = scmp.ge.s32.totalorder %s5768_s10, 1  ;;  %p282_p1 = scmp.lt.s32.totalorder %s5768_s10, 3 }
  0x3b   : > { %p283_p3 = pnand %p5167_p9, %p282_p1 }
  0x3d   : > { %286 = sbr.rel (%p283_p3) target bundleno = 2024 (0x7e8), region = 52 }
  0x42   : > { %s5941_s20 = sand.u32 1, %s5760_s30   ;;  %p9571_p6 = scmp.ne.s32.totalorder %s9563_s16, 0 }
  0x43   : > { %9570 = sst [smem:[#allocation19_spill]] %s5941_s20  ;;  %s5515_s22 = smul.u32 112, %s5941_s20 }
  0x44   : > { %s289_s23 = scalar_lea.sflag [#allocation5], %s5941_s20 }
  0x45   : > { %s5945_s19 = scalar_lea.vmem [#allocation4], %s5515_s22 }
  0x46   : > { %5747 = dma.done.wait (%p9571_p6), %s289_s23, 1792  }
  0x47   : > { %5749 = vsyncadd (%p9571_p6), %s289_s23, 4294965504  ;;  %v5952_v0 = vld [vmem:[%s5945_s19 + $0x48] sm:$0xff]  ;;  %v5955_v1 = vld [vmem:[%s5945_s19 + $0x10] sm:$0xff]  ;;  %s9343_s24 = smov 36   ;;  %s9288_s16 = smov 38   ;;  %vm390_vm0 = vcmask 1043456  }
  0x48   : > { %v5958_v2 = vld [vmem:[%s5945_s19 + $0x50] sm:$0xff]  ;;  %1893 = vrot.lane.b32.xlu1 %v5952_v0, %s9343_s24  ;;  %347 = vst [vmem:[#allocation2 + $0x34] sm:$0xff] %v5952_v0  ;;  %1883 = vrot.lane.b32.xlu0 %v5955_v1, %s9343_s24  ;;  %342 = vst [vmem:[#allocation2 + $0x10] sm:$0xff] %v5955_v1  ;;  %v5968_v3 = vld [vmem:[%s5945_s19 + $0x18] sm:$0xff]  ;;  %s9314_s25 = smov 78   ;;  %s9284_s27 = smov 40  }
  0x49   : > { %348 = vst [vmem:[#allocation2 + $0x3c] sm:$0xff] %v5958_v2  ;;  %v5971_v4 = vld [vmem:[%s5945_s19 + $0x8] sm:$0xff]  ;;  %343 = vst [vmem:[#allocation2 + $0x18] sm:$0xff] %v5968_v3  ;;  %v5976_v5 = vld [vmem:[%s5945_s19] sm:$0xff]  ;;  %s9290_s28 = smov 80   ;;  %s9278_s21 = smov 60  }
  0x4a   : > { %341 = vst [vmem:[#allocation2 + $0x8] sm:$0xff] %v5971_v4  ;;  %v5979_v6 = vld [vmem:[%s5945_s19 + $0x40] sm:$0xff]  ;;  %v5982_v7 = vld [vmem:[%s5945_s19 + $0x38] sm:$0xff]  ;;  %340 = vst [vmem:[#allocation2] sm:$0xff] %v5976_v5  ;;  %s9292_s26 = smov 100   ;;  %s9272_s13 = smov 62  }
  0x4b   : > { %346 = vst [vmem:[#allocation2 + $0x2c] sm:$0xff] %v5979_v6  ;;  %345 = vst [vmem:[#allocation2 + $0x24] sm:$0xff] %v5982_v7  ;;  %s9299_s11 = smov 102   ;;  %s9270_s14 = smov 64   ;;  %v6092_v8 = vld [vmem:[%s5945_s19 + $0x58] sm:$0xff]  ;;  %v6095_v9 = vld [vmem:[%s5945_s19 + $0x20] sm:$0xff] }
  0x4c   : > { %1895 = vrot.lane.b32.xlu1 %v5958_v2, %s9343_s24  ;;  %1885 = vrot.lane.b32.xlu0 %v5968_v3, %s9343_s24  ;;  %s9307_s22 = smov 104   ;;  %s9274_s23 = smov 44   ;;  %349 = vst [vmem:[#allocation2 + $0x44] sm:$0xf] %v6092_v8  ;;  %344 = vst [vmem:[#allocation2 + $0x20] sm:$0xf] %v6095_v9 }
  0x4d   : > { %vm1914_vm1 = vcmask 293888   ;;  %vm1845_vm2 = vcmask 310272   ;;  %vm9356_vm3 = vcmask 637952   ;;  %vm1776_vm4 = vcmask 326656   ;;  %s9585_s0 = smov 76   ;;  %s9594_s15 = smov 78  }
  0x4e   : > { %vm9369_vm5 = vcmask 654336   ;;  %vm1360_vm6 = vcmask 392192   ;;  %vm9541_vm7 = vcmask 490496   ;;  %vm9379_vm8 = vcmask 818176   ;;  %s9599_s9 = smov 80   ;;  %s9602_s30 = smov 100  }
  0x4f   : > { %vm9540_vm9 = vcmask 506880   ;;  %vm9389_vm10 = vcmask 834560   ;;  %vm9319_vm11 = vcmask 523264   ;;  %vm9400_vm12 = vcmask 850944   ;;  %s9605_s12 = smov 102   ;;  %s9610_s10 = smov 104  }
  0x50   : > { %1816 = vrot.lane.b32.xlu1 %v5968_v3, %s9288_s16  ;;  %1814 = vrot.lane.b32.xlu0 %v5955_v1, %s9288_s16  ;;  %vm9309_vm13 = vcmask 359424   ;;  %vm461_vm14 = vcmask 1014784   ;;  %vm9316_vm15 = vcmask 375808   ;;  %s9617_s18 = smov 124   ;;  %s9622_s29 = smov 126  }
  0x51   : > { %s9633_s17 = smov 68  }
  0x54   : > { %1826 = vrot.lane.b32.xlu1 %v5958_v2, %s9288_s16  ;;  %1824 = vrot.lane.b32.xlu0 %v5952_v0, %s9288_s16  ;;  %s9336_s16 = smov 68  }
  0x58   : > { %777 = vrot.lane.b32.xlu1 %v5971_v4, %s9314_s25  ;;  %775 = vrot.lane.b32.xlu0 %v5976_v5, %s9314_s25 }
  0x5c   : > { %787 = vrot.lane.b32.xlu1 %v5979_v6, %s9314_s25  ;;  %785 = vrot.lane.b32.xlu0 %v5982_v7, %s9314_s25 }
  0x60   : > { %1747 = vrot.lane.b32.xlu1 %v5968_v3, %s9284_s27  ;;  %1745 = vrot.lane.b32.xlu0 %v5955_v1, %s9284_s27 }
  0x64   : > { %1757 = vrot.lane.b32.xlu1 %v5958_v2, %s9284_s27  ;;  %1755 = vrot.lane.b32.xlu0 %v5952_v0, %s9284_s27  ;;  %s9341_s27 = smov 70  }
  0x68   : > { %708 = vrot.lane.b32.xlu1 %v5971_v4, %s9290_s28  ;;  %706 = vrot.lane.b32.xlu0 %v5976_v5, %s9290_s28 }
  0x6c   : > { %718 = vrot.lane.b32.xlu1 %v5979_v6, %s9290_s28  ;;  %716 = vrot.lane.b32.xlu0 %v5982_v7, %s9290_s28 }
  0x70   : > { %1678 = vrot.lane.b32.xlu1 %v5968_v3, %s9278_s21  ;;  %1676 = vrot.lane.b32.xlu0 %v5955_v1, %s9278_s21 }
  0x74   : > { %1688 = vrot.lane.b32.xlu1 %v5958_v2, %s9278_s21  ;;  %1686 = vrot.lane.b32.xlu0 %v5952_v0, %s9278_s21  ;;  %s9282_s21 = smov 14  }
  0x78   : > { %639 = vrot.lane.b32.xlu1 %v5971_v4, %s9292_s26  ;;  %637 = vrot.lane.b32.xlu0 %v5976_v5, %s9292_s26 }
  0x7c   : > { %649 = vrot.lane.b32.xlu1 %v5979_v6, %s9292_s26  ;;  %647 = vrot.lane.b32.xlu0 %v5982_v7, %s9292_s26 }
  0x80   : > { %1609 = vrot.lane.b32.xlu1 %v5968_v3, %s9272_s13  ;;  %1607 = vrot.lane.b32.xlu0 %v5955_v1, %s9272_s13 }
  0x84   : > { %1619 = vrot.lane.b32.xlu1 %v5958_v2, %s9272_s13  ;;  %1617 = vrot.lane.b32.xlu0 %v5952_v0, %s9272_s13  ;;  %s9276_s13 = smov 46  }
  0x88   : > { %570 = vrot.lane.b32.xlu1 %v5971_v4, %s9299_s11  ;;  %568 = vrot.lane.b32.xlu0 %v5976_v5, %s9299_s11 }
  0x8c   : > { %580 = vrot.lane.b32.xlu1 %v5979_v6, %s9299_s11  ;;  %578 = vrot.lane.b32.xlu0 %v5982_v7, %s9299_s11 }
  0x90   : > { %1540 = vrot.lane.b32.xlu1 %v5968_v3, %s9270_s14  ;;  %1538 = vrot.lane.b32.xlu0 %v5955_v1, %s9270_s14 }
  0x94   : > { %1550 = vrot.lane.b32.xlu1 %v5958_v2, %s9270_s14  ;;  %1548 = vrot.lane.b32.xlu0 %v5952_v0, %s9270_s14  ;;  %s9312_s14 = smov 124  }
  0x98   : > { %501 = vrot.lane.b32.xlu1 %v5971_v4, %s9307_s22  ;;  %499 = vrot.lane.b32.xlu0 %v5976_v5, %s9307_s22 }
  0x9c   : > { %511 = vrot.lane.b32.xlu1 %v5979_v6, %s9307_s22  ;;  %509 = vrot.lane.b32.xlu0 %v5982_v7, %s9307_s22 }
  0xa0   : > { %1469 = vrot.lane.b32.xlu1 %v5955_v1, %s9274_s23  ;;  %1467 = vrot.lane.b32.xlu0 %v5971_v4, %s9274_s23 }
  0xa4   : > { %1479 = vrot.lane.b32.xlu1 %v5952_v0, %s9274_s23  ;;  %1477 = vrot.lane.b32.xlu0 %v5979_v6, %s9274_s23  ;;  %s9323_s23 = smov 126  }
  0xa8   : > { %432 = vrot.lane.b32.xlu1 %v5971_v4, %s9312_s14  ;;  %430 = vrot.lane.b32.xlu0 %v5976_v5, %s9312_s14 }
  0xac   : > { %442 = vrot.lane.b32.xlu1 %v5979_v6, %s9312_s14  ;;  %440 = vrot.lane.b32.xlu0 %v5982_v7, %s9312_s14 }
  0xb0   : > { %1400 = vrot.lane.b32.xlu1 %v5955_v1, %s9276_s13  ;;  %1398 = vrot.lane.b32.xlu0 %v5971_v4, %s9276_s13 }
  0xb4   : > { %1410 = vrot.lane.b32.xlu1 %v5952_v0, %s9276_s13  ;;  %1408 = vrot.lane.b32.xlu0 %v5979_v6, %s9276_s13  ;;  %s9280_s13 = smov 12  }
  0xb8   : > { %362 = vrot.lane.b32.xlu1 %v5971_v4, %s9323_s23  ;;  %360 = vrot.lane.b32.xlu0 %v5976_v5, %s9323_s23 }
  0xba   : > { %v1894_v10 = vpop.permute.xlu1 %1893  ;;  %v1884_v11 = vpop.permute.xlu0 %1883 }
  0xbb   : > { %v1908_v14 = vrot.slane %v1894_v10, 4  ;;  %v1903_v15 = vrot.slane %v1884_v11, 4 }
  0xbc   : > { %372 = vrot.lane.b32.xlu1 %v5979_v6, %s9323_s23  ;;  %370 = vrot.lane.b32.xlu0 %v5982_v7, %s9323_s23 }
  0xbe   : > { %v6111_v12 = vpop.permute.xlu1 %1895  ;;  %v6113_v13 = vpop.permute.xlu0 %1885 }
  0xbf   : > { %v9321_v16 = vrot.slane %v6111_v12, 4  ;;  %v9318_v17 = vrot.slane %v6113_v13, 4 }
  0xc0   : > { %2092 = vrot.lane.b32.xlu1 %v5968_v3, %s9280_s13  ;;  %2090 = vrot.lane.b32.xlu0 %v5955_v1, %s9280_s13 }
  0xc1   : > { %v1923_v18 = vsel %vm390_vm0, %v1908_v14, %v9321_v16  ;;  %v1913_v19 = vsel %vm390_vm0, %v1903_v15, %v9318_v17  ;;  %v5596_v17 = vld [vmem:[#allocation2 + $0x4] ss:$36 sps:$4 sm:$0xff]  }
  0xc2   : > { %v1924_v20 = vsel %vm1914_vm1, %v1894_v10, %v1923_v18  ;;  %v1915_v21 = vsel %vm1914_vm1, %v1884_v11, %v1913_v19  ;;  %v6129_v22 = vpop.permute.xlu1 %1816  ;;  %v1815_v23 = vpop.permute.xlu0 %1814 }
  0xc3   : > { %v9306_v24 = vrot.slane %v6129_v22, 4  ;;  %v1834_v25 = vrot.slane %v1815_v23, 4  ;;  %v5384_v26 = vcombine.high %v1915_v21, %v1924_v20  ;;  %v5383_v27 = vcombine.low %v1915_v21, %v1924_v20 }
  0xc4   : > { %2102 = vrot.lane.b32.xlu1 %v5958_v2, %s9280_s13  ;;  %2100 = vrot.lane.b32.xlu0 %v5952_v0, %s9280_s13  ;;  %s9286_s13 = smov 48  }
  0xc5   : > { %v1844_v28 = vsel %vm390_vm0, %v1834_v25, %v9306_v24  ;;  %3801 = vmatprep.subr.bf16.mxu1 %v5384_v26 }
  0xc6   : > { %v1846_v29 = vsel %vm1845_vm2, %v1815_v23, %v1844_v28  ;;  %v6140_v30 = vpop.permute.xlu1 %1826  ;;  %v1825_v31 = vpop.permute.xlu0 %1824  ;;  %3802 = vmatpush1.bf16.msra.mxu1 %v5383_v27  ;;  %v5599_v28 = vld [vmem:[%s9260_s1 + $0xc] ss:$16 sps:$4 sm:$0xff]  }
  0xc7   : > { %v9311_v32 = vrot.slane %v6140_v30, 4  ;;  %v1839_v33 = vrot.slane %v1825_v31, 4  ;;  %5419 = vmatprep.mubr.msk.bf16.mxu1 %vm1360_vm6, %v5599_v28 }
  0xc8   : > { %2023 = vrot.lane.b32.xlu1 %v5968_v3, %s9282_s21  ;;  %2021 = vrot.lane.b32.xlu0 %v5955_v1, %s9282_s21 }
  0xc9   : > { %v1854_v34 = vsel %vm390_vm0, %v1839_v33, %v9311_v32 }
  0xca   : > { %v1855_v35 = vsel %vm1845_vm2, %v1825_v31, %v1854_v34  ;;  %v6151_v36 = vpop.permute.xlu1 %777  ;;  %v776_v37 = vpop.permute.xlu0 %775 }
  0xcb   : > { %v796_v38 = vrot.slane %v6151_v36, 4  ;;  %v795_v39 = vrot.slane %v776_v37, 4  ;;  %v5375_v40 = vcombine.high %v1846_v29, %v1855_v35  ;;  %v5374_v41 = vcombine.low %v1846_v29, %v1855_v35 }
  0xcc   : > { %2033 = vrot.lane.b32.xlu1 %v5958_v2, %s9282_s21  ;;  %2031 = vrot.lane.b32.xlu0 %v5952_v0, %s9282_s21  ;;  %s9328_s21 = smov 16  }
  0xcd   : > { %v805_v42 = vsel %vm390_vm0, %v795_v39, %v796_v38  ;;  %3803 = vmatprep.subr.bf16.mxu1 %v5375_v40 }
  0xce   : > { %v807_v43 = vsel %vm9356_vm3, %v776_v37, %v805_v42  ;;  %v6162_v44 = vpop.permute.xlu1 %787  ;;  %v786_v45 = vpop.permute.xlu0 %785  ;;  %3804 = vmatpush1.bf16.msra.mxu1 %v5374_v41 }
  0xcf   : > { %v801_v46 = vrot.slane %v6162_v44, 4  ;;  %v800_v47 = vrot.slane %v786_v45, 4 }
  0xd0   : > { %1331 = vrot.lane.b32.xlu1 %v5955_v1, %s9286_s13  ;;  %1329 = vrot.lane.b32.xlu0 %v5971_v4, %s9286_s13 }
  0xd1   : > { %v815_v48 = vsel %vm390_vm0, %v800_v47, %v801_v46 }
  0xd2   : > { %v816_v49 = vsel %vm9356_vm3, %v786_v45, %v815_v48  ;;  %v6173_v50 = vpop.permute.xlu1 %1747  ;;  %v1746_v51 = vpop.permute.xlu0 %1745 }
  0xd3   : > { %v9304_v52 = vrot.slane %v6173_v50, 4  ;;  %v1765_v53 = vrot.slane %v1746_v51, 4  ;;  %v5240_v54 = vcombine.high %v807_v43, %v816_v49  ;;  %v5239_v55 = vcombine.low %v807_v43, %v816_v49 }
  0xd4   : > { %1341 = vrot.lane.b32.xlu1 %v5952_v0, %s9286_s13  ;;  %1339 = vrot.lane.b32.xlu0 %v5979_v6, %s9286_s13  ;;  %s9365_s13 = smov 72  }
  0xd5   : > { %v1775_v56 = vsel %vm390_vm0, %v1765_v53, %v9304_v52  ;;  %3748 = vmatprep.subr.bf16.mxu0 %v5240_v54 }
  0xd6   : > { %v1777_v57 = vsel %vm1776_vm4, %v1746_v51, %v1775_v56  ;;  %v6184_v58 = vpop.permute.xlu1 %1757  ;;  %v1756_v59 = vpop.permute.xlu0 %1755  ;;  %3749 = vmatpush1.bf16.msra.mxu0 %v5239_v55 }
  0xd7   : > { %v9305_v60 = vrot.slane %v6184_v58, 4  ;;  %v1770_v61 = vrot.slane %v1756_v59, 4 }
  0xd8   : > { %1954 = vrot.lane.b32.xlu1 %v5968_v3, %s9328_s21  ;;  %1952 = vrot.lane.b32.xlu0 %v5955_v1, %s9328_s21 }
  0xd9   : > { %v1785_v62 = vsel %vm390_vm0, %v1770_v61, %v9305_v60 }
  0xda   : > { %v1786_v63 = vsel %vm1776_vm4, %v1756_v59, %v1785_v62  ;;  %v6195_v10 = vpop.permute.xlu1 %708  ;;  %v707_v11 = vpop.permute.xlu0 %706 }
  0xdb   : > { %v727_v14 = vrot.slane %v6195_v10, 4  ;;  %v726_v15 = vrot.slane %v707_v11, 4  ;;  %v5366_v18 = vcombine.high %v1777_v57, %v1786_v63  ;;  %v5365_v19 = vcombine.low %v1777_v57, %v1786_v63 }
  0xdc   : > { %1964 = vrot.lane.b32.xlu1 %v5958_v2, %s9328_s21  ;;  %1962 = vrot.lane.b32.xlu0 %v5952_v0, %s9328_s21  ;;  %s9575_s21 = smov 60  }
  0xdd   : > { %v736_v20 = vsel %vm390_vm0, %v726_v15, %v727_v14  ;;  %3805 = vmatprep.subr.bf16.mxu1 %v5366_v18 }
  0xde   : > { %v738_v21 = vsel %vm9369_vm5, %v707_v11, %v736_v20  ;;  %v6206_v23 = vpop.permute.xlu1 %718  ;;  %v717_v25 = vpop.permute.xlu0 %716  ;;  %3806 = vmatpush1.bf16.msra.mxu1 %v5365_v19 }
  0xdf   : > { %v732_v26 = vrot.slane %v6206_v23, 4  ;;  %v731_v27 = vrot.slane %v717_v25, 4 }
  0xe0   : > { %1262 = vrot.lane.b32.xlu1 %v5955_v1, %s9336_s16  ;;  %1260 = vrot.lane.b32.xlu0 %v5971_v4, %s9336_s16 }
  0xe1   : > { %v746_v29 = vsel %vm390_vm0, %v731_v27, %v732_v26 }
  0xe2   : > { %v747_v31 = vsel %vm9369_vm5, %v717_v25, %v746_v29  ;;  %v6221_v33 = vpop.permute.xlu1 %1678  ;;  %v1677_v34 = vpop.permute.xlu0 %1676 }
  0xe3   : > { %v9302_v35 = vrot.slane %v6221_v33, 4  ;;  %v1696_v37 = vrot.slane %v1677_v34, 4  ;;  %v5231_v39 = vcombine.high %v738_v21, %v747_v31  ;;  %v5230_v40 = vcombine.low %v738_v21, %v747_v31 }
  0xe4   : > { %1272 = vrot.lane.b32.xlu1 %v5952_v0, %s9336_s16  ;;  %1270 = vrot.lane.b32.xlu0 %v5979_v6, %s9336_s16 }
  0xe5   : > { %v1706_v41 = vsel %vm390_vm0, %v1696_v37, %v9302_v35  ;;  %3750 = vmatprep.subr.bf16.mxu0 %v5231_v39 }
  0xe6   : > { %v1708_v42 = vsel %vm9541_vm7, %v1677_v34, %v1706_v41  ;;  %v6232_v43 = vpop.permute.xlu1 %1688  ;;  %v1687_v45 = vpop.permute.xlu0 %1686  ;;  %3751 = vmatpush1.bf16.msra.mxu0 %v5230_v40 }
  0xe7   : > { %v9303_v47 = vrot.slane %v6232_v43, 4  ;;  %v1701_v48 = vrot.slane %v1687_v45, 4 }
  0xe8   : > { %789 = vrot.lane.b32.xlu1 %v5952_v0, %s9314_s25  ;;  %779 = vrot.lane.b32.xlu0 %v5955_v1, %s9314_s25  ;;  %s9572_s25 = smov 38  }
  0xe9   : > { %v1716_v49 = vsel %vm390_vm0, %v1701_v48, %v9303_v47 }
  0xea   : > { %v1717_v51 = vsel %vm9541_vm7, %v1687_v45, %v1716_v49  ;;  %v6243_v53 = vpop.permute.xlu1 %639  ;;  %v638_v54 = vpop.permute.xlu0 %637 }
  0xeb   : > { %v9355_v55 = vrot.slane %v6243_v53, 4  ;;  %v657_v56 = vrot.slane %v638_v54, 4  ;;  %v5357_v57 = vcombine.high %v1708_v42, %v1717_v51  ;;  %v5356_v59 = vcombine.low %v1708_v42, %v1717_v51 }
  0xec   : > { %1193 = vrot.lane.b32.xlu1 %v5955_v1, %s9341_s27  ;;  %1191 = vrot.lane.b32.xlu0 %v5971_v4, %s9341_s27 }
  0xed   : > { %v667_v61 = vsel %vm390_vm0, %v657_v56, %v9355_v55  ;;  %3807 = vmatprep.subr.bf16.mxu1 %v5357_v57 }
  0xee   : > { %v669_v62 = vsel %vm9379_vm8, %v638_v54, %v667_v61  ;;  %v6254_v63 = vpop.permute.xlu1 %649  ;;  %v648_v11 = vpop.permute.xlu0 %647  ;;  %3808 = vmatpush1.bf16.msra.mxu1 %v5356_v59 }
  0xef   : > { %v663_v15 = vrot.slane %v6254_v63, 4  ;;  %v662_v18 = vrot.slane %v648_v11, 4 }
  0xf0   : > { %1203 = vrot.lane.b32.xlu1 %v5952_v0, %s9341_s27  ;;  %1201 = vrot.lane.b32.xlu0 %v5979_v6, %s9341_s27 }
  0xf1   : > { %v677_v19 = vsel %vm390_vm0, %v662_v18, %v663_v15 }
  0xf2   : > { %v678_v20 = vsel %vm9379_vm8, %v648_v11, %v677_v19  ;;  %v6265_v21 = vpop.permute.xlu1 %1609  ;;  %v1608_v25 = vpop.permute.xlu0 %1607 }
  0xf3   : > { %v9296_v27 = vrot.slane %v6265_v21, 4  ;;  %v1627_v28 = vrot.slane %v1608_v25, 4  ;;  %v5222_v29 = vcombine.high %v669_v62, %v678_v20  ;;  %v5221_v31 = vcombine.low %v669_v62, %v678_v20 }
  0xf4   : > { %720 = vrot.lane.b32.xlu1 %v5952_v0, %s9290_s28  ;;  %710 = vrot.lane.b32.xlu0 %v5955_v1, %s9290_s28  ;;  %s9363_s28 = smov 92  }
  0xf5   : > { %v1637_v34 = vsel %vm390_vm0, %v1627_v28, %v9296_v27  ;;  %3752 = vmatprep.subr.bf16.mxu0 %v5222_v29 }
  0xf6   : > { %v1639_v37 = vsel %vm9540_vm9, %v1608_v25, %v1637_v34  ;;  %v6276_v39 = vpop.permute.xlu1 %1619  ;;  %v1618_v40 = vpop.permute.xlu0 %1617  ;;  %3753 = vmatpush1.bf16.msra.mxu0 %v5221_v31 }
  0xf7   : > { %v9298_v41 = vrot.slane %v6276_v39, 4  ;;  %v1632_v42 = vrot.slane %v1618_v40, 4 }
  0xf8   : > { %1124 = vrot.lane.b32.xlu1 %v5955_v1, %s9365_s13  ;;  %1122 = vrot.lane.b32.xlu0 %v5971_v4, %s9365_s13 }
  0xf9   : > { %v1647_v45 = vsel %vm390_vm0, %v1632_v42, %v9298_v41 }
  0xfa   : > { %v1648_v48 = vsel %vm9540_vm9, %v1618_v40, %v1647_v45  ;;  %v6287_v49 = vpop.permute.xlu1 %570  ;;  %v569_v51 = vpop.permute.xlu0 %568 }
  0xfb   : > { %v9350_v54 = vrot.slane %v6287_v49, 4  ;;  %v588_v56 = vrot.slane %v569_v51, 4  ;;  %v5348_v57 = vcombine.high %v1639_v37, %v1648_v48  ;;  %v5347_v59 = vcombine.low %v1639_v37, %v1648_v48 }
  0xfc   : > { %1134 = vrot.lane.b32.xlu1 %v5952_v0, %s9365_s13  ;;  %1132 = vrot.lane.b32.xlu0 %v5979_v6, %s9365_s13 }
  0xfd   : > { %v598_v61 = vsel %vm390_vm0, %v588_v56, %v9350_v54  ;;  %3809 = vmatprep.subr.bf16.mxu1 %v5348_v57 }
  0xfe   : > { %v600_v62 = vsel %vm9389_vm10, %v569_v51, %v598_v61  ;;  %v6298_v11 = vpop.permute.xlu1 %580  ;;  %v579_v18 = vpop.permute.xlu0 %578  ;;  %3810 = vmatpush1.bf16.msra.mxu1 %v5347_v59 }
  0xff   : > { %v9351_v19 = vrot.slane %v6298_v11, 4  ;;  %v593_v20 = vrot.slane %v579_v18, 4 }
 0x100   : > { %651 = vrot.lane.b32.xlu1 %v5952_v0, %s9292_s26  ;;  %641 = vrot.lane.b32.xlu0 %v5955_v1, %s9292_s26  ;;  %s9361_s26 = smov 94  }
 0x101   : > { %v608_v25 = vsel %vm390_vm0, %v593_v20, %v9351_v19 }
 0x102   : > { %v609_v28 = vsel %vm9389_vm10, %v579_v18, %v608_v25  ;;  %v6309_v29 = vpop.permute.xlu1 %1540  ;;  %v1539_v31 = vpop.permute.xlu0 %1538 }
 0x103   : > { %v9294_v34 = vrot.slane %v6309_v29, 4  ;;  %v1558_v37 = vrot.slane %v1539_v31, 4  ;;  %v5213_v40 = vcombine.high %v600_v62, %v609_v28  ;;  %v5212_v42 = vcombine.low %v600_v62, %v609_v28 }
 0x104   : > { %1055 = vrot.lane.b32.xlu1 %v5955_v1, %s9363_s28  ;;  %1053 = vrot.lane.b32.xlu0 %v5971_v4, %s9363_s28 }
 0x105   : > { %v1568_v45 = vsel %vm390_vm0, %v1558_v37, %v9294_v34  ;;  %3754 = vmatprep.subr.bf16.mxu0 %v5213_v40 }
 0x106   : > { %v1570_v48 = vsel %vm9319_vm11, %v1539_v31, %v1568_v45  ;;  %v6320_v51 = vpop.permute.xlu1 %1550  ;;  %v1549_v56 = vpop.permute.xlu0 %1548  ;;  %3755 = vmatpush1.bf16.msra.mxu0 %v5212_v42 }
 0x107   : > { %v9295_v57 = vrot.slane %v6320_v51, 4  ;;  %v1563_v59 = vrot.slane %v1549_v56, 4 }
 0x108   : > { %1065 = vrot.lane.b32.xlu1 %v5952_v0, %s9363_s28  ;;  %1063 = vrot.lane.b32.xlu0 %v5979_v6, %s9363_s28 }
 0x109   : > { %v1578_v61 = vsel %vm390_vm0, %v1563_v59, %v9295_v57 }
 0x10a   : > { %v1579_v62 = vsel %vm9319_vm11, %v1549_v56, %v1578_v61  ;;  %v6331_v18 = vpop.permute.xlu1 %501  ;;  %v500_v20 = vpop.permute.xlu0 %499  ;;  %vm9330_vm11 = vcmask 113664  }
 0x10b   : > { %v9340_v25 = vrot.slane %v6331_v18, 4  ;;  %v519_v28 = vrot.slane %v500_v20, 4  ;;  %v5339_v31 = vcombine.high %v1570_v48, %v1579_v62  ;;  %v5338_v37 = vcombine.low %v1570_v48, %v1579_v62 }
 0x10c   : > { %582 = vrot.lane.b32.xlu1 %v5952_v0, %s9299_s11  ;;  %572 = vrot.lane.b32.xlu0 %v5955_v1, %s9299_s11  ;;  %s9374_s11 = smov 96  }
 0x10d   : > { %v529_v40 = vsel %vm390_vm0, %v519_v28, %v9340_v25  ;;  %3811 = vmatprep.subr.bf16.mxu1 %v5339_v31 }
 0x10e   : > { %v531_v42 = vsel %vm9400_vm12, %v500_v20, %v529_v40  ;;  %v6342_v45 = vpop.permute.xlu1 %511  ;;  %v510_v56 = vpop.permute.xlu0 %509  ;;  %3812 = vmatpush1.bf16.msra.mxu1 %v5338_v37 }
 0x10f   : > { %v9346_v59 = vrot.slane %v6342_v45, 4  ;;  %v524_v48 = vrot.slane %v510_v56, 4 }
 0x110   : > { %986 = vrot.lane.b32.xlu1 %v5955_v1, %s9361_s26  ;;  %984 = vrot.lane.b32.xlu0 %v5971_v4, %s9361_s26 }
 0x111   : > { %v539_v61 = vsel %vm390_vm0, %v524_v48, %v9346_v59 }
 0x112   : > { %v540_v62 = vsel %vm9400_vm12, %v510_v56, %v539_v61  ;;  %v6353_v20 = vpop.permute.xlu1 %1469  ;;  %v1468_v28 = vpop.permute.xlu0 %1467 }
 0x113   : > { %v9297_v31 = vrot.slane %v6353_v20, 4  ;;  %v1487_v37 = vrot.slane %v1468_v28, 4  ;;  %v5204_v40 = vcombine.high %v531_v42, %v540_v62  ;;  %v5203_v34 = vcombine.low %v531_v42, %v540_v62 }
 0x114   : > { %996 = vrot.lane.b32.xlu1 %v5952_v0, %s9361_s26  ;;  %994 = vrot.lane.b32.xlu0 %v5979_v6, %s9361_s26 }
 0x115   : > { %v1497_v48 = vsel %vm390_vm0, %v1487_v37, %v9297_v31  ;;  %3756 = vmatprep.subr.bf16.mxu0 %v5204_v40 }
 0x116   : > { %v1499_v56 = vsel %vm9309_vm13, %v1468_v28, %v1497_v48  ;;  %v6364_v61 = vpop.permute.xlu1 %1479  ;;  %v1478_v57 = vpop.permute.xlu0 %1477  ;;  %3757 = vmatpush1.bf16.msra.mxu0 %v5203_v34 }
 0x117   : > { %v9301_v27 = vrot.slane %v6364_v61, 4  ;;  %v1492_v42 = vrot.slane %v1478_v57, 4 }
 0x118   : > { %513 = vrot.lane.b32.xlu1 %v5952_v0, %s9307_s22  ;;  %503 = vrot.lane.b32.xlu0 %v5955_v1, %s9307_s22  ;;  %s9347_s22 = smov 76  }
 0x119   : > { %v1507_v62 = vsel %vm390_vm0, %v1492_v42, %v9301_v27 }
 0x11a   : > { %v1508_v37 = vsel %vm9309_vm13, %v1478_v57, %v1507_v62  ;;  %v6375_v28 = vpop.permute.xlu1 %432  ;;  %v431_v40 = vpop.permute.xlu0 %430  ;;  %vm392_vm13 = vcmask 1031168  }
 0x11b   : > { %v9333_v34 = vrot.slane %v6375_v28, 4  ;;  %v450_v48 = vrot.slane %v431_v40, 4  ;;  %v5330_v31 = vcombine.high %v1499_v56, %v1508_v37  ;;  %v5329_v41 = vcombine.low %v1499_v56, %v1508_v37 }
 0x11c   : > { %917 = vrot.lane.b32.xlu1 %v5955_v1, %s9374_s11  ;;  %915 = vrot.lane.b32.xlu0 %v5971_v4, %s9374_s11 }
 0x11d   : > { %v460_v57 = vsel %vm390_vm0, %v450_v48, %v9333_v34  ;;  %3813 = vmatprep.subr.bf16.mxu1 %v5330_v31 }
 0x11e   : > { %v462_v42 = vsel %vm461_vm14, %v431_v40, %v460_v57  ;;  %v6386_v62 = vpop.permute.xlu1 %442  ;;  %v441_v27 = vpop.permute.xlu0 %440  ;;  %3814 = vmatpush1.bf16.msra.mxu1 %v5329_v41 }
 0x11f   : > { %v9335_v56 = vrot.slane %v6386_v62, 4  ;;  %v455_v37 = vrot.slane %v441_v27, 4 }
 0x120   : > { %927 = vrot.lane.b32.xlu1 %v5952_v0, %s9374_s11  ;;  %925 = vrot.lane.b32.xlu0 %v5979_v6, %s9374_s11 }
 0x121   : > { %v470_v48 = vsel %vm390_vm0, %v455_v37, %v9335_v56 }
 0x122   : > { %v471_v31 = vsel %vm461_vm14, %v441_v27, %v470_v48  ;;  %v6397_v40 = vpop.permute.xlu1 %1400  ;;  %v1399_v57 = vpop.permute.xlu0 %1398 }
 0x123   : > { %v9310_v41 = vrot.slane %v6397_v40, 4  ;;  %v1418_v35 = vrot.slane %v1399_v57, 4  ;;  %v5195_v47 = vcombine.high %v462_v42, %v471_v31  ;;  %v5194_v52 = vcombine.low %v462_v42, %v471_v31 }
 0x124   : > { %444 = vrot.lane.b32.xlu1 %v5952_v0, %s9312_s14  ;;  %434 = vrot.lane.b32.xlu0 %v5955_v1, %s9312_s14  ;;  %s9573_s14 = smov 48  }
 0x125   : > { %v1428_v37 = vsel %vm390_vm0, %v1418_v35, %v9310_v41  ;;  %3758 = vmatprep.subr.bf16.mxu0 %v5195_v47 }
 0x126   : > { %v1430_v27 = vsel %vm9316_vm15, %v1399_v57, %v1428_v37  ;;  %v6408_v48 = vpop.permute.xlu1 %1410  ;;  %v1409_v60 = vpop.permute.xlu0 %1408  ;;  %3759 = vmatpush1.bf16.msra.mxu0 %v5194_v52 }
 0x127   : > { %v9317_v24 = vrot.slane %v6408_v48, 4  ;;  %v1423_v42 = vrot.slane %v1409_v60, 4 }
 0x128   : > { %846 = vrot.lane.b32.xlu1 %v5971_v4, %s9347_s22  ;;  %844 = vrot.lane.b32.xlu0 %v5976_v5, %s9347_s22  ;;  %v6425_v4 = vld [vmem:[%s9260_s1 + $0x4] ss:$16 sps:$4 sm:$0xff]  }
 0x129   : > { %v1438_v35 = vsel %vm390_vm0, %v1423_v42, %v9317_v24  ;;  %3780 = vmatprep.mubr.bf16.mxu0 %v6425_v4 }
 0x12a   : > { %v1439_v47 = vsel %vm9316_vm15, %v1409_v60, %v1438_v35  ;;  %v6419_v31 = vpop.permute.xlu1 %362  ;;  %v361_v52 = vpop.permute.xlu0 %360  ;;  %vm9338_vm15 = vcmask 97280  }
 0x12b   : > { %v9326_v57 = vrot.slane %v6419_v31, 4  ;;  %v380_v37 = vrot.slane %v361_v52, 4  ;;  %v5321_v41 = vcombine.high %v1430_v27, %v1439_v47  ;;  %v5320_v32 = vcombine.low %v1430_v27, %v1439_v47 }
 0x12c   : > { %856 = vrot.lane.b32.xlu1 %v5979_v6, %s9347_s22  ;;  %854 = vrot.lane.b32.xlu0 %v5982_v7, %s9347_s22  ;;  %s9577_s22 = smov 64  }
 0x12d   : > { %v391_v5 = vsel %vm390_vm0, %v380_v37, %v9326_v57  ;;  %3815 = vmatprep.subr.bf16.mxu1 %v5321_v41  ;;  %v6498_v57 = vld [vmem:[#allocation2 + $0x18] sm:$0xff] }
 0x12e   : > { %v393_v60 = vsel %vm392_vm13, %v361_v52, %v391_v5  ;;  %v6436_v27 = vpop.permute.xlu1 %372  ;;  %v371_v42 = vpop.permute.xlu0 %370  ;;  %3816 = vmatpush1.bf16.msra.mxu1 %v5320_v32 }
 0x12f   : > { %v9332_v35 = vrot.slane %v6436_v27, 4  ;;  %v385_v47 = vrot.slane %v371_v42, 4 }
 0x130   : > { %374 = vrot.lane.b32.xlu1 %v5952_v0, %s9323_s23  ;;  %364 = vrot.lane.b32.xlu0 %v5955_v1, %s9323_s23  ;;  %s9574_s23 = smov 40  }
 0x131   : > { %v401_v6 = vsel %vm390_vm0, %v385_v47, %v9332_v35 }
 0x132   : > { %v402_v7 = vsel %vm392_vm13, %v371_v42, %v401_v6  ;;  %v6447_v41 = vpop.permute.xlu1 %2092  ;;  %v2091_v52 = vpop.permute.xlu0 %2090  ;;  %v5598_v6 = vld [vmem:[#allocation2] ss:$36 sps:$4 sm:$0xff]  }
 0x133   : > { %v9320_v32 = vrot.slane %v6447_v41, 4  ;;  %v2110_v37 = vrot.slane %v2091_v52, 4  ;;  %v5186_v5 = vcombine.high %v393_v60, %v402_v7  ;;  %v5185_v24 = vcombine.low %v393_v60, %v402_v7 }
 0x134   : > { %1897 = vrot.lane.b32.xlu1 %v6092_v8, %s9343_s24  ;;  %1887 = vrot.lane.b32.xlu0 %v6095_v9, %s9343_s24  ;;  %s9578_s24 = smov 44  }
 0x135   : > { %v2120_v0 = vsel %vm390_vm0, %v2110_v37, %v9320_v32  ;;  %3760 = vmatprep.subr.bf16.mxu0 %v5186_v5 }
 0x136   : > { %v2122_v1 = vsel %vm9338_vm15, %v2091_v52, %v2120_v0  ;;  %v6458_v42 = vpop.permute.xlu1 %2102  ;;  %v2101_v47 = vpop.permute.xlu0 %2100  ;;  %3761 = vmatpush1.bf16.msra.mxu0 %v5185_v24 }
 0x137   : > { %v9322_v60 = vrot.slane %v6458_v42, 4  ;;  %v2115_v7 = vrot.slane %v2101_v47, 4  ;;  %3762 = vmatprep.subr.bf16.mxu0 %v5596_v17 }
 0x138   : > { %1828 = vrot.lane.b32.xlu1 %v6092_v8, %s9572_s25  ;;  %1818 = vrot.lane.b32.xlu0 %v6095_v9, %s9572_s25 }
 0x139   : > { %v2130_v37 = vsel %vm390_vm0, %v2115_v7, %v9322_v60 }
 0x13a   : > { %v2131_v52 = vsel %vm9338_vm15, %v2101_v47, %v2130_v37  ;;  %v6469_v5 = vpop.permute.xlu1 %2023  ;;  %v2022_v24 = vpop.permute.xlu0 %2021  ;;  %3763 = vmatpush1.bf16.msra.mxu0 %v5598_v6  ;;  %vm1291_vm15 = vcmask 556032  }
 0x13b   : > { %v9325_v0 = vrot.slane %v6469_v5, 4  ;;  %v2041_v17 = vrot.slane %v2022_v24, 4  ;;  %v5411_v32 = vcombine.high %v2122_v1, %v2131_v52  ;;  %v5410_v16 = vcombine.low %v2122_v1, %v2131_v52 }
 0x13c   : > { %1343 = vrot.lane.b32.xlu1 %v5958_v2, %s9573_s14  ;;  %1333 = vrot.lane.b32.xlu0 %v5968_v3, %s9573_s14 }
 0x13d   : > { %v2051_v47 = vsel %vm390_vm0, %v2041_v17, %v9325_v0  ;;  %3827 = vmatprep.subr.bf16.mxu1 %v5411_v32  ;;  %v6494_v0 = vld [vmem:[#allocation2 + $0x3c] sm:$0xff] }
 0x13e   : > { %v2053_v7 = vsel %vm9330_vm11, %v2022_v24, %v2051_v47  ;;  %v6480_v37 = vpop.permute.xlu1 %2033  ;;  %v2032_v6 = vpop.permute.xlu0 %2031  ;;  %3828 = vmatpush2.bf16.msra.mxu1 %v5410_v16 }
 0x13f   : > { %v9327_v60 = vrot.slane %v6480_v37, 4  ;;  %v2046_v1 = vrot.slane %v2032_v6, 4 }
 0x140   : > { %1759 = vrot.lane.b32.xlu1 %v6092_v8, %s9574_s23  ;;  %1749 = vrot.lane.b32.xlu0 %v6095_v9, %s9574_s23 }
 0x141   : > { %v2061_v2 = vsel %vm390_vm0, %v2046_v1, %v9327_v60 }
 0x142   : > { %v2062_v3 = vsel %vm9330_vm11, %v2032_v6, %v2061_v2  ;;  %v6491_v32 = vpop.permute.xlu1 %1331  ;;  %v1330_v52 = vpop.permute.xlu0 %1329  ;;  %vm9352_vm11 = vcmask 130048  }
 0x143   : > { %v9331_v16 = vrot.slane %v6491_v32, 4  ;;  %v1349_v24 = vrot.slane %v1330_v52, 4  ;;  %v5402_v17 = vcombine.high %v2053_v7, %v2062_v3  ;;  %v5401_v47 = vcombine.low %v2053_v7, %v2062_v3 }
 0x144   : > { %1274 = vrot.lane.b32.xlu1 %v6494_v0, %s9336_s16  ;;  %1264 = vrot.lane.b32.xlu0 %v6498_v57, %s9336_s16  ;;  %s9576_s16 = smov 62  }
 0x145   : > { %v1359_v6 = vsel %vm390_vm0, %v1349_v24, %v9331_v16  ;;  %3829 = vmatprep.subr.bf16.mxu1 %v5402_v17 }
 0x146   : > { %v1361_v1 = vsel %vm1360_vm6, %v1330_v52, %v1359_v6  ;;  %v6506_v2 = vpop.permute.xlu1 %1341  ;;  %v1340_v7 = vpop.permute.xlu0 %1339  ;;  %3830 = vmatpush2.bf16.msra.mxu1 %v5401_v47 }
 0x147   : > { %v9334_v3 = vrot.slane %v6506_v2, 4  ;;  %v1354_v60 = vrot.slane %v1340_v7, 4 }
 0x148   : > { %1690 = vrot.lane.b32.xlu1 %v6092_v8, %s9575_s21  ;;  %1680 = vrot.lane.b32.xlu0 %v6095_v9, %s9575_s21 }
 0x149   : > { %v1369_v24 = vsel %vm390_vm0, %v1354_v60, %v9334_v3 }
 0x14a   : > { %v1370_v17 = vsel %vm1360_vm6, %v1340_v7, %v1369_v24  ;;  %v6517_v52 = vpop.permute.xlu1 %1954  ;;  %v1953_v6 = vpop.permute.xlu0 %1952 }
 0x14b   : > { %v9339_v47 = vrot.slane %v6517_v52, 4  ;;  %v1972_v16 = vrot.slane %v1953_v6, 4  ;;  %v5312_v35 = vcombine.high %v1361_v1, %v1370_v17  ;;  %v5311_v34 = vcombine.low %v1361_v1, %v1370_v17 }
 0x14c   : > { %1205 = vrot.lane.b32.xlu1 %v6494_v0, %s9341_s27  ;;  %1195 = vrot.lane.b32.xlu0 %v6498_v57, %s9341_s27  ;;  %s9581_s27 = smov 46  }
 0x14d   : > { %v1982_v60 = vsel %vm390_vm0, %v1972_v16, %v9339_v47  ;;  %3764 = vmatprep.subr.bf16.mxu0 %v5312_v35 }
 0x14e   : > { %v1984_v7 = vsel %vm9352_vm11, %v1953_v6, %v1982_v60  ;;  %v6528_v24 = vpop.permute.xlu1 %1964  ;;  %v1963_v3 = vpop.permute.xlu0 %1962  ;;  %3765 = vmatpush2.bf16.msra.mxu0 %v5311_v34 }
 0x14f   : > { %v9345_v56 = vrot.slane %v6528_v24, 4  ;;  %v1977_v1 = vrot.slane %v1963_v3, 4 }
 0x150   : > { %1621 = vrot.lane.b32.xlu1 %v6092_v8, %s9576_s16  ;;  %1611 = vrot.lane.b32.xlu0 %v6095_v9, %s9576_s16 }
 0x151   : > { %v1992_v16 = vsel %vm390_vm0, %v1977_v1, %v9345_v56 }
 0x152   : > { %v1993_v35 = vsel %vm9352_vm11, %v1963_v3, %v1992_v16  ;;  %v6539_v17 = vpop.permute.xlu1 %1262  ;;  %v1261_v6 = vpop.permute.xlu0 %1260  ;;  %v5601_v3 = vld [vmem:[%s9260_s1 + $0x8] ss:$16 sps:$4 sm:$0xff]   ;;  %vm9445_vm11 = vcmask 572416  }
 0x153   : > { %v9349_v34 = vrot.slane %v6539_v17, 4  ;;  %v1280_v60 = vrot.slane %v1261_v6, 4  ;;  %v5393_v47 = vcombine.high %v1984_v7, %v1993_v35  ;;  %v5392_v25 = vcombine.low %v1984_v7, %v1993_v35 }
 0x154   : > { %1136 = vrot.lane.b32.xlu1 %v6494_v0, %s9365_s13  ;;  %1126 = vrot.lane.b32.xlu0 %v6498_v57, %s9365_s13  ;;  %s9588_s13 = smov 36  }
 0x155   : > { %v1290_v1 = vsel %vm390_vm0, %v1280_v60, %v9349_v34  ;;  %3831 = vmatprep.subr.bf16.mxu1 %v5393_v47 }
 0x156   : > { %v1292_v16 = vsel %vm1291_vm15, %v1261_v6, %v1290_v1  ;;  %v6553_v56 = vpop.permute.xlu1 %1272  ;;  %v1271_v7 = vpop.permute.xlu0 %1270  ;;  %3832 = vmatpush2.bf16.msra.mxu1 %v5392_v25 }
 0x157   : > { %v9354_v35 = vrot.slane %v6553_v56, 4  ;;  %v1285_v59 = vrot.slane %v1271_v7, 4 }
 0x158   : > { %1552 = vrot.lane.b32.xlu1 %v6092_v8, %s9577_s22  ;;  %1542 = vrot.lane.b32.xlu0 %v6095_v9, %s9577_s22 }
 0x159   : > { %v1300_v47 = vsel %vm390_vm0, %v1285_v59, %v9354_v35  ;;  %3834 = vmatmul.mubr.bf16.vlgmr.msra.gmra.mxu1 %v5601_v3 }
 0x15a   : > { %v1301_v6 = vsel %vm1291_vm15, %v1271_v7, %v1300_v47  ;;  %v6564_v60 = vpop.permute.xlu1 %789  ;;  %v6566_v1 = vpop.permute.xlu0 %779 }
 0x15b   : > { %v9353_v25 = vrot.slane %v6564_v60, 4  ;;  %v9357_v34 = vrot.slane %v6566_v1, 4  ;;  %v5303_v54 = vcombine.high %v1292_v16, %v1301_v6  ;;  %v5302_v19 = vcombine.low %v1292_v16, %v1301_v6 }
 0x15c   : > { %1067 = vrot.lane.b32.xlu1 %v6494_v0, %s9363_s28  ;;  %1057 = vrot.lane.b32.xlu0 %v6498_v57, %s9363_s28  ;;  %s9582_s28 = smov 12  }
 0x15d   : > { %v817_v59 = vsel %vm390_vm0, %v801_v46, %v9353_v25  ;;  %v808_v3 = vsel %vm390_vm0, %v796_v38, %v9357_v34  ;;  %3766 = vmatprep.subr.bf16.mxu0 %v5303_v54 }
 0x15e   : > { %v818_v16 = vsel %vm9356_vm3, %v6162_v44, %v817_v59  ;;  %v809_v7 = vsel %vm9356_vm3, %v6151_v36, %v808_v3  ;;  %v6588_v47 = vpop.permute.xlu1 %1193  ;;  %v1192_v6 = vpop.permute.xlu0 %1191  ;;  %3767 = vmatpush2.bf16.msra.mxu0 %v5302_v19  ;;  %vm9444_vm3 = vcmask 588800  }
 0x15f   : > { %v9359_v46 = vrot.slane %v6588_v47, 4  ;;  %v1211_v25 = vrot.slane %v1192_v6, 4  ;;  %v5241_v35 = vcombine.low %v809_v7, %v818_v16  ;;  %v5242_v55 = vcombine.high %v809_v7, %v818_v16 }
 0x160   : > { %1481 = vrot.lane.b32.xlu1 %v6494_v0, %s9578_s24  ;;  %1471 = vrot.lane.b32.xlu0 %v6498_v57, %s9578_s24 }
 0x161   : > { %v1221_v36 = vsel %vm390_vm0, %v1211_v25, %v9359_v46  ;;  %3854 = vmatprep.subr.bf16.mxu1 %v5242_v55 }
 0x162   : > { %v1223_v38 = vsel %vm9445_vm11, %v1192_v6, %v1221_v36  ;;  %v6599_v44 = vpop.permute.xlu1 %1203  ;;  %v1202_v54 = vpop.permute.xlu0 %1201  ;;  %3855 = vmatpush1.bf16.msra.mxu1 %v5241_v35 }
 0x163   : > { %v9360_v19 = vrot.slane %v6599_v44, 4  ;;  %v1216_v59 = vrot.slane %v1202_v54, 4 }
 0x164   : > { %998 = vrot.lane.b32.xlu1 %v6494_v0, %s9361_s26  ;;  %988 = vrot.lane.b32.xlu0 %v6498_v57, %s9361_s26  ;;  %s9587_s26 = smov 14  }
 0x165   : > { %v1231_v25 = vsel %vm390_vm0, %v1216_v59, %v9360_v19 }
 0x166   : > { %v1232_v55 = vsel %vm9445_vm11, %v1202_v54, %v1231_v25  ;;  %v6610_v3 = vpop.permute.xlu1 %720  ;;  %v6612_v16 = vpop.permute.xlu0 %710 }
 0x167   : > { %9579 = vst [vmem:[#allocation20_spill] sm:$0xff] %v6610_v3  ;;  %9580 = vst [vmem:[#allocation21_spill] sm:$0xff] %v6612_v16  ;;  %v9358_v35 = vrot.slane %v6610_v3, 4  ;;  %v9367_v7 = vrot.slane %v6612_v16, 4  ;;  %v5294_v6 = vcombine.high %v1223_v38, %v1232_v55  ;;  %v5293_v36 = vcombine.low %v1223_v38, %v1232_v55 }
 0x168   : > { %1412 = vrot.lane.b32.xlu1 %v6494_v0, %s9581_s27  ;;  %1402 = vrot.lane.b32.xlu0 %v6498_v57, %s9581_s27 }
 0x169   : > { %v748_v54 = vsel %vm390_vm0, %v732_v26, %v9358_v35  ;;  %v739_v59 = vsel %vm390_vm0, %v727_v14, %v9367_v7  ;;  %3768 = vmatprep.subr.bf16.mxu0 %v5294_v6  ;;  %v5608_v14 = vld [vmem:[%s9260_s1 + $0x2c] ss:$16 sps:$4 sm:$0xff]   ;;  %v5657_v7 = vld [vmem:[#allocation2 + $0x34] sm:$0xff] }
 0x16a   : > { %v749_v38 = vsel %vm9369_vm5, %v6206_v23, %v748_v54  ;;  %v740_v25 = vsel %vm9369_vm5, %v6195_v10, %v739_v59  ;;  %v6634_v55 = vpop.permute.xlu1 %1124  ;;  %v1123_v34 = vpop.permute.xlu0 %1122  ;;  %3769 = vmatpush2.bf16.msra.mxu0 %v5293_v36  ;;  %v5610_v10 = vld [vmem:[%s9260_s1 + $0x28] ss:$16 sps:$4 sm:$0xff]   ;;  %5420 = vmatprep.mubr.msk.bf16.mxu1 %vm1360_vm6, %v5608_v14  ;;  %vm1084_vm5 = vcmask 752640  }
 0x16b   : > { %v9368_v26 = vrot.slane %v6634_v55, 4  ;;  %v1142_v35 = vrot.slane %v1123_v34, 4  ;;  %v5232_v46 = vcombine.low %v740_v25, %v749_v38  ;;  %v5233_v19 = vcombine.high %v740_v25, %v749_v38  ;;  %3844 = vmatmul.mubr.bf16.gmra.mxu1 %v5610_v10 }
 0x16c   : > { %929 = vrot.lane.b32.xlu1 %v6494_v0, %s9374_s11  ;;  %919 = vrot.lane.b32.xlu0 %v6498_v57, %s9374_s11  ;;  %s9591_s11 = smov 16  }
 0x16d   : > { %v1152_v23 = vsel %vm390_vm0, %v1142_v35, %v9368_v26  ;;  %3856 = vmatprep.subr.bf16.mxu1 %v5233_v19  ;;  %3886 = vmatprep.mubr.bf16.mxu1 %v6425_v4  ;;  %v5658_v26 = vld [vmem:[#allocation2 + $0x10] sm:$0xff] }
 0x16e   : > { %v1154_v6 = vsel %vm9444_vm3, %v1123_v34, %v1152_v23  ;;  %v6652_v36 = vpop.permute.xlu1 %1134  ;;  %v1133_v54 = vpop.permute.xlu0 %1132  ;;  %3857 = vmatpush1.bf16.msra.mxu1 %v5232_v46 }
 0x16f   : > { %v9371_v59 = vrot.slane %v6652_v36, 4  ;;  %v1147_v38 = vrot.slane %v1133_v54, 4 }
 0x170   : > { %2104 = vrot.lane.b32.xlu1 %v6092_v8, %s9582_s28  ;;  %2094 = vrot.lane.b32.xlu0 %v6095_v9, %s9582_s28 }
 0x171   : > { %v1162_v19 = vsel %vm390_vm0, %v1147_v38, %v9371_v59 }
 0x172   : > { %v1163_v34 = vsel %vm9444_vm3, %v1133_v54, %v1162_v19  ;;  %v6664_v35 = vpop.permute.xlu1 %651  ;;  %v6666_v46 = vpop.permute.xlu0 %641  ;;  %v9586_v54 = vrot.slane %v6243_v53, 4 }
 0x173   : > { %9583 = vst [vmem:[#allocation22_spill] sm:$0xff] %v6664_v35  ;;  %9584 = vst [vmem:[#allocation23_spill] sm:$0xff] %v6666_v46  ;;  %v9370_v25 = vrot.slane %v6664_v35, 4  ;;  %v9372_v14 = vrot.slane %v6666_v46, 4  ;;  %v5285_v10 = vcombine.high %v1154_v6, %v1163_v34  ;;  %v5284_v23 = vcombine.low %v1154_v6, %v1163_v34 }
 0x174   : > { %858 = vrot.lane.b32.xlu1 %v5657_v7, %s9585_s0  ;;  %848 = vrot.lane.b32.xlu0 %v5658_v26, %s9585_s0 }
 0x175   : > { %v679_v4 = vsel %vm390_vm0, %v663_v15, %v9370_v25  ;;  %v670_v38 = vsel %vm390_vm0, %v9586_v54, %v9372_v14  ;;  %3770 = vmatprep.subr.bf16.mxu0 %v5285_v10  ;;  %v6700_v10 = vld [vmem:[%s5945_s19 + $0x28] sm:$0xff] }
 0x176   : > { %v680_v7 = vsel %vm9379_vm8, %v6254_v63, %v679_v4  ;;  %v671_v26 = vsel %vm9379_vm8, %v6243_v53, %v670_v38  ;;  %v6686_v6 = vpop.permute.xlu1 %1055  ;;  %v1054_v19 = vpop.permute.xlu0 %1053  ;;  %3771 = vmatpush2.bf16.msra.mxu0 %v5284_v23  ;;  %v6697_v63 = vld [vmem:[%s5945_s19 + $0x60] sm:$0xff]  ;;  %vm1015_vm8 = vcmask 769024  }
 0x177   : > { %v9373_v15 = vrot.slane %v6686_v6, 4  ;;  %v1073_v34 = vrot.slane %v1054_v19, 4  ;;  %v5223_v25 = vcombine.low %v671_v26, %v680_v7  ;;  %v5224_v59 = vcombine.high %v671_v26, %v680_v7 }
 0x178   : > { %2035 = vrot.lane.b32.xlu1 %v6092_v8, %s9587_s26  ;;  %2025 = vrot.lane.b32.xlu0 %v6095_v9, %s9587_s26 }
 0x179   : > { %v1083_v53 = vsel %vm390_vm0, %v1073_v34, %v9373_v15  ;;  %3858 = vmatprep.subr.bf16.mxu1 %v5224_v59 }
 0x17a   : > { %v1085_v23 = vsel %vm1084_vm5, %v1054_v19, %v1083_v53  ;;  %v6703_v4 = vpop.permute.xlu1 %1065  ;;  %v1064_v54 = vpop.permute.xlu0 %1063  ;;  %3859 = vmatpush1.bf16.msra.mxu1 %v5223_v25 }
 0x17b   : > { %v9376_v38 = vrot.slane %v6703_v4, 4  ;;  %v1078_v7 = vrot.slane %v1064_v54, 4 }
 0x17c   : > { %1899 = vrot.lane.b32.xlu1 %v6697_v63, %s9588_s13  ;;  %1889 = vrot.lane.b32.xlu0 %v6700_v10, %s9588_s13 }
 0x17d   : > { %v1093_v26 = vsel %vm390_vm0, %v1078_v7, %v9376_v38 }
 0x17e   : > { %v1094_v59 = vsel %vm1084_vm5, %v1064_v54, %v1093_v26  ;;  %v6714_v19 = vpop.permute.xlu1 %582  ;;  %v6716_v34 = vpop.permute.xlu0 %572  ;;  %v9592_v54 = vrot.slane %v6298_v11, 4  ;;  %v9593_v26 = vrot.slane %v6287_v49, 4 }
 0x17f   : > { %9589 = vst [vmem:[#allocation24_spill] sm:$0xff] %v6714_v19  ;;  %9590 = vst [vmem:[#allocation25_spill] sm:$0xff] %v6716_v34  ;;  %v9382_v25 = vrot.slane %v6714_v19, 4  ;;  %v9387_v53 = vrot.slane %v6716_v34, 4  ;;  %v5276_v14 = vcombine.high %v1085_v23, %v1094_v59  ;;  %v5275_v15 = vcombine.low %v1085_v23, %v1094_v59 }
 0x180   : > { %1966 = vrot.lane.b32.xlu1 %v6092_v8, %s9591_s11  ;;  %1956 = vrot.lane.b32.xlu0 %v6095_v9, %s9591_s11 }
 0x181   : > { %v610_v7 = vsel %vm390_vm0, %v9592_v54, %v9382_v25  ;;  %v601_v38 = vsel %vm390_vm0, %v9593_v26, %v9387_v53  ;;  %3772 = vmatprep.subr.bf16.mxu0 %v5276_v14 }
 0x182   : > { %v611_v23 = vsel %vm9389_vm10, %v6298_v11, %v610_v7  ;;  %v602_v59 = vsel %vm9389_vm10, %v6287_v49, %v601_v38  ;;  %v6738_v46 = vpop.permute.xlu1 %986  ;;  %v985_v19 = vpop.permute.xlu0 %984  ;;  %3773 = vmatpush2.bf16.msra.mxu0 %v5275_v15  ;;  %vm946_vm10 = vcmask 785408  }
 0x183   : > { %v9388_v54 = vrot.slane %v6738_v46, 4  ;;  %v1004_v25 = vrot.slane %v985_v19, 4  ;;  %v5214_v34 = vcombine.low %v602_v59, %v611_v23  ;;  %v5215_v35 = vcombine.high %v602_v59, %v611_v23 }
 0x184   : > { %1830 = vrot.lane.b32.xlu1 %v6697_v63, %s9572_s25  ;;  %1820 = vrot.lane.b32.xlu0 %v6700_v10, %s9572_s25 }
 0x185   : > { %v1014_v49 = vsel %vm390_vm0, %v1004_v25, %v9388_v54  ;;  %3860 = vmatprep.subr.bf16.mxu1 %v5215_v35 }
 0x186   : > { %v1016_v11 = vsel %vm1015_vm8, %v985_v19, %v1014_v49  ;;  %v6749_v14 = vpop.permute.xlu1 %996  ;;  %v995_v15 = vpop.permute.xlu0 %994  ;;  %3861 = vmatpush1.bf16.msra.mxu1 %v5214_v34 }
 0x187   : > { %v9390_v38 = vrot.slane %v6749_v14, 4  ;;  %v1009_v7 = vrot.slane %v995_v15, 4 }
 0x188   : > { %791 = vrot.lane.b32.xlu1 %v6494_v0, %s9594_s15  ;;  %781 = vrot.lane.b32.xlu0 %v6498_v57, %s9594_s15 }
 0x189   : > { %v1024_v25 = vsel %vm390_vm0, %v1009_v7, %v9390_v38 }
 0x18a   : > { %v1025_v35 = vsel %vm1015_vm8, %v995_v15, %v1024_v25  ;;  %v6760_v19 = vpop.permute.xlu1 %513  ;;  %v6762_v26 = vpop.permute.xlu0 %503  ;;  %v9597_v15 = vrot.slane %v6342_v45, 4  ;;  %v9598_v25 = vrot.slane %v6331_v18, 4 }
 0x18b   : > { %9595 = vst [vmem:[#allocation26_spill] sm:$0xff] %v6760_v19  ;;  %9596 = vst [vmem:[#allocation27_spill] sm:$0xff] %v6762_v26  ;;  %v9391_v34 = vrot.slane %v6760_v19, 4  ;;  %v9398_v23 = vrot.slane %v6762_v26, 4  ;;  %v5267_v59 = vcombine.high %v1016_v11, %v1025_v35  ;;  %v5266_v49 = vcombine.low %v1016_v11, %v1025_v35 }
 0x18c   : > { %1761 = vrot.lane.b32.xlu1 %v6697_v63, %s9574_s23  ;;  %1751 = vrot.lane.b32.xlu0 %v6700_v10, %s9574_s23 }
 0x18d   : > { %v541_v7 = vsel %vm390_vm0, %v9597_v15, %v9391_v34  ;;  %v532_v53 = vsel %vm390_vm0, %v9598_v25, %v9398_v23  ;;  %3774 = vmatprep.subr.bf16.mxu0 %v5267_v59 }
 0x18e   : > { %v542_v11 = vsel %vm9400_vm12, %v6342_v45, %v541_v7  ;;  %v533_v35 = vsel %vm9400_vm12, %v6331_v18, %v532_v53  ;;  %v6784_v54 = vpop.permute.xlu1 %917  ;;  %v916_v38 = vpop.permute.xlu0 %915  ;;  %3775 = vmatpush2.bf16.msra.mxu0 %v5266_v49  ;;  %vm875_vm12 = vcmask 621568  }
 0x18f   : > { %v9399_v15 = vrot.slane %v6784_v54, 4  ;;  %v935_v34 = vrot.slane %v916_v38, 4  ;;  %v5205_v26 = vcombine.low %v533_v35, %v542_v11  ;;  %v5206_v19 = vcombine.high %v533_v35, %v542_v11 }
 0x190   : > { %722 = vrot.lane.b32.xlu1 %v6494_v0, %s9599_s9  ;;  %712 = vrot.lane.b32.xlu0 %v6498_v57, %s9599_s9 }
 0x191   : > { %v945_v18 = vsel %vm390_vm0, %v935_v34, %v9399_v15  ;;  %3862 = vmatprep.subr.bf16.mxu1 %v5206_v19 }
 0x192   : > { %v947_v45 = vsel %vm946_vm10, %v916_v38, %v945_v18  ;;  %v6795_v53 = vpop.permute.xlu1 %927  ;;  %v926_v59 = vpop.permute.xlu0 %925  ;;  %3863 = vmatpush1.bf16.msra.mxu1 %v5205_v26 }
 0x193   : > { %v9401_v49 = vrot.slane %v6795_v53, 4  ;;  %v940_v7 = vrot.slane %v926_v59, 4 }
 0x194   : > { %1692 = vrot.lane.b32.xlu1 %v6697_v63, %s9575_s21  ;;  %1682 = vrot.lane.b32.xlu0 %v6700_v10, %s9575_s21 }
 0x195   : > { %v955_v34 = vsel %vm390_vm0, %v940_v7, %v9401_v49 }
 0x196   : > { %v956_v19 = vsel %vm946_vm10, %v926_v59, %v955_v34  ;;  %v6806_v38 = vpop.permute.xlu1 %444  ;;  %v6808_v25 = vpop.permute.xlu0 %434  ;;  %v9603_v59 = vrot.slane %v6386_v62, 4  ;;  %v9604_v34 = vrot.slane %v6375_v28, 4 }
 0x197   : > { %9600 = vst [vmem:[#allocation28_spill] sm:$0xff] %v6806_v38  ;;  %9601 = vst [vmem:[#allocation29_spill] sm:$0xff] %v6808_v25  ;;  %v9402_v26 = vrot.slane %v6806_v38, 4  ;;  %v9409_v11 = vrot.slane %v6808_v25, 4  ;;  %v5258_v35 = vcombine.high %v947_v45, %v956_v19  ;;  %v5257_v18 = vcombine.low %v947_v45, %v956_v19 }
 0x198   : > { %653 = vrot.lane.b32.xlu1 %v6494_v0, %s9602_s30  ;;  %643 = vrot.lane.b32.xlu0 %v6498_v57, %s9602_s30 }
 0x199   : > { %v472_v7 = vsel %vm390_vm0, %v9603_v59, %v9402_v26  ;;  %v463_v23 = vsel %vm390_vm0, %v9604_v34, %v9409_v11  ;;  %3776 = vmatprep.subr.bf16.mxu0 %v5258_v35 }
 0x19a   : > { %v473_v45 = vsel %vm461_vm14, %v6386_v62, %v472_v7  ;;  %v464_v19 = vsel %vm461_vm14, %v6375_v28, %v463_v23  ;;  %v6830_v15 = vpop.permute.xlu1 %846  ;;  %v845_v49 = vpop.permute.xlu0 %844  ;;  %3777 = vmatpush2.bf16.msra.mxu0 %v5257_v18 }
 0x19b   : > { %v9412_v59 = vrot.slane %v6830_v15, 4  ;;  %v864_v26 = vrot.slane %v845_v49, 4  ;;  %v5196_v25 = vcombine.low %v464_v19, %v473_v45  ;;  %v5197_v38 = vcombine.high %v464_v19, %v473_v45 }
 0x19c   : > { %1623 = vrot.lane.b32.xlu1 %v6697_v63, %s9576_s16  ;;  %1613 = vrot.lane.b32.xlu0 %v6700_v10, %s9576_s16 }
 0x19d   : > { %v874_v28 = vsel %vm390_vm0, %v864_v26, %v9412_v59  ;;  %3864 = vmatprep.subr.bf16.mxu1 %v5197_v38 }
 0x19e   : > { %v876_v62 = vsel %vm875_vm12, %v845_v49, %v874_v28  ;;  %v6841_v23 = vpop.permute.xlu1 %856  ;;  %v855_v35 = vpop.permute.xlu0 %854  ;;  %3865 = vmatpush1.bf16.msra.mxu1 %v5196_v25 }
 0x19f   : > { %v9413_v18 = vrot.slane %v6841_v23, 4  ;;  %v869_v7 = vrot.slane %v855_v35, 4 }
 0x1a0   : > { %584 = vrot.lane.b32.xlu1 %v6494_v0, %s9605_s12  ;;  %574 = vrot.lane.b32.xlu0 %v6498_v57, %s9605_s12 }
 0x1a1   : > { %v884_v26 = vsel %vm390_vm0, %v869_v7, %v9413_v18 }
 0x1a2   : > { %v885_v38 = vsel %vm875_vm12, %v855_v35, %v884_v26  ;;  %v6852_v49 = vpop.permute.xlu1 %374  ;;  %v6854_v34 = vpop.permute.xlu0 %364  ;;  %v9608_v35 = vrot.slane %v6436_v27, 4  ;;  %v9609_v26 = vrot.slane %v6419_v31, 4 }
 0x1a3   : > { %9606 = vst [vmem:[#allocation30_spill] sm:$0xff] %v6852_v49  ;;  %9607 = vst [vmem:[#allocation31_spill] sm:$0xff] %v6854_v34  ;;  %v9418_v25 = vrot.slane %v6852_v49, 4  ;;  %v9417_v45 = vrot.slane %v6854_v34, 4  ;;  %v5249_v19 = vcombine.high %v876_v62, %v885_v38  ;;  %v5248_v28 = vcombine.low %v876_v62, %v885_v38  ;;  %v6875_v62 = vld [vmem:[%s9260_s1] ss:$16 sps:$4 sm:$0xff]  }
 0x1a4   : > { %1554 = vrot.lane.b32.xlu1 %v6697_v63, %s9577_s22  ;;  %1544 = vrot.lane.b32.xlu0 %v6700_v10, %s9577_s22 }
 0x1a5   : > { %v403_v7 = vsel %vm390_vm0, %v9608_v35, %v9418_v25  ;;  %v394_v11 = vsel %vm390_vm0, %v9609_v26, %v9417_v45  ;;  %3778 = vmatprep.subr.bf16.mxu0 %v5249_v19  ;;  %v6888_v19 = vld [vmem:[%s9260_s1 + $0x24] ss:$16 sps:$4 sm:$0xff]  }
 0x1a6   : > { %v404_v38 = vsel %vm392_vm13, %v6436_v27, %v403_v7  ;;  %v395_v59 = vsel %vm392_vm13, %v6419_v31, %v394_v11  ;;  %v6881_v18 = vpop.permute.xlu1 %1897  ;;  %v6883_v35 = vpop.permute.xlu0 %1887  ;;  %3779 = vmatpush2.bf16.msra.mxu0 %v5248_v28  ;;  %v5607_v27 = vld [vmem:[#allocation2 + $0xc] ss:$36 sps:$4 sm:$0xff]   ;;  %v9611_v31 = vrot.slane %v6111_v12, 4  ;;  %v9612_v28 = vrot.slane %v6113_v13, 4 }
 0x1a7   : > { %v9425_v26 = vrot.slane %v6881_v18, 4  ;;  %v9426_v45 = vrot.slane %v6883_v35, 4  ;;  %v5187_v25 = vcombine.low %v395_v59, %v404_v38  ;;  %v5188_v34 = vcombine.high %v395_v59, %v404_v38 }
 0x1a8   : > { %515 = vrot.lane.b32.xlu1 %v6494_v0, %s9610_s10  ;;  %505 = vrot.lane.b32.xlu0 %v6498_v57, %s9610_s10 }
 0x1a9   : > { %v1925_v11 = vsel %vm390_vm0, %v9611_v31, %v9425_v26  ;;  %v1916_v7 = vsel %vm390_vm0, %v9612_v28, %v9426_v45  ;;  %3866 = vmatprep.subr.bf16.mxu1 %v5188_v34  ;;  %3781 = vmatmul.mubr.bf16.vlgmr.msra.gmra.mxu0 %v6875_v62  ;;  %v5605_v31 = vld [vmem:[#allocation2 + $0x8] ss:$36 sps:$4 sm:$0xff]  }
 0x1aa   : > { %v1926_v59 = vsel %vm1914_vm1, %v6111_v12, %v1925_v11  ;;  %v1917_v38 = vsel %vm1914_vm1, %v6113_v13, %v1916_v7  ;;  %v6911_v49 = vpop.permute.xlu1 %1828  ;;  %v6913_v16 = vpop.permute.xlu0 %1818  ;;  %3867 = vmatpush1.bf16.msra.mxu1 %v5187_v25  ;;  %3790 = vmatprep.mubr.bf16.mxu0 %v6888_v19  ;;  %v9613_v12 = vrot.slane %v6140_v30, 4  ;;  %v9614_v25 = vrot.slane %v6129_v22, 4 }
 0x1ab   : > { %v9428_v26 = vrot.slane %v6911_v49, 4  ;;  %v9427_v34 = vrot.slane %v6913_v16, 4  ;;  %v5385_v28 = vcombine.low %v1917_v38, %v1926_v59  ;;  %v5386_v45 = vcombine.high %v1917_v38, %v1926_v59  ;;  %3868 = vmatprep.subr.bf16.mxu1 %v5607_v27  ;;  %v6935_v27 = vld [vmem:[%s9260_s1 + $0x20] ss:$16 sps:$4 sm:$0xff]  }
 0x1ac   : > { %1483 = vrot.lane.b32.xlu1 %v6092_v8, %s9578_s24  ;;  %1473 = vrot.lane.b32.xlu0 %v6095_v9, %s9578_s24 }
 0x1ad   : > { %v1856_v13 = vsel %vm390_vm0, %v9613_v12, %v9428_v26  ;;  %v1847_v11 = vsel %vm390_vm0, %v9614_v25, %v9427_v34  ;;  %3907 = vmatprep.subr.bf16.mxu0 %v5386_v45 }
 0x1ae   : > { %v1857_v7 = vsel %vm1845_vm2, %v6140_v30, %v1856_v13  ;;  %v1848_v59 = vsel %vm1845_vm2, %v6129_v22, %v1847_v11  ;;  %v6941_v38 = vpop.permute.xlu1 %1343  ;;  %v6943_v12 = vpop.permute.xlu0 %1333  ;;  %3908 = vmatpush1.bf16.msra.mxu0 %v5385_v28  ;;  %3869 = vmatpush1.bf16.msra.mxu1 %v5605_v31  ;;  %v9618_v22 = vrot.slane %v6506_v2, 4  ;;  %v9619_v31 = vrot.slane %v6491_v32, 4 }
 0x1af   : > { %9615 = vst [vmem:[#allocation32_spill] sm:$0xff] %v6941_v38  ;;  %9616 = vst [vmem:[#allocation33_spill] sm:$0xff] %v6943_v12  ;;  %v9430_v25 = vrot.slane %v6941_v38, 4  ;;  %v9429_v45 = vrot.slane %v6943_v12, 4  ;;  %v5376_v34 = vcombine.low %v1848_v59, %v1857_v7  ;;  %v5377_v26 = vcombine.high %v1848_v59, %v1857_v7 }
 0x1b0   : > { %446 = vrot.lane.b32.xlu1 %v6494_v0, %s9617_s18  ;;  %436 = vrot.lane.b32.xlu0 %v6498_v57, %s9617_s18 }
 0x1b1   : > { %v1371_v30 = vsel %vm390_vm0, %v9618_v22, %v9430_v25  ;;  %v1362_v28 = vsel %vm390_vm0, %v9619_v31, %v9429_v45  ;;  %3909 = vmatprep.subr.bf16.mxu0 %v5377_v26  ;;  %3791 = vmatmul.mubr.bf16.gmra.mxu0 %v6935_v27  ;;  %v6973_v22 = vld [vmem:[%s9260_s1 + $0xc] ss:$16 sps:$4 sm:$0xff]  }
 0x1b2   : > { %v1372_v13 = vsel %vm1360_vm6, %v6506_v2, %v1371_v30  ;;  %v1363_v11 = vsel %vm1360_vm6, %v6491_v32, %v1362_v28  ;;  %v6966_v7 = vpop.permute.xlu1 %1759  ;;  %v6968_v59 = vpop.permute.xlu0 %1749  ;;  %3910 = vmatpush1.bf16.msra.mxu0 %v5376_v34  ;;  %5421 = vmatprep.mubr.msk.bf16.mxu0 %vm1360_vm6, %v6973_v22  ;;  %v9620_v32 = vrot.slane %v6184_v58, 4  ;;  %v9621_v28 = vrot.slane %v6173_v50, 4 }
 0x1b3   : > { %v9433_v26 = vrot.slane %v6966_v7, 4  ;;  %v1767_v2 = vrot.slane %v6968_v59, 4  ;;  %v5313_v30 = vcombine.low %v1363_v11, %v1372_v13  ;;  %v5314_v31 = vcombine.high %v1363_v11, %v1372_v13 }
 0x1b4   : > { %1414 = vrot.lane.b32.xlu1 %v6092_v8, %s9581_s27  ;;  %1404 = vrot.lane.b32.xlu0 %v6095_v9, %s9581_s27 }
 0x1b5   : > { %v1787_v34 = vsel %vm390_vm0, %v9620_v32, %v9433_v26  ;;  %v1778_v45 = vsel %vm390_vm0, %v9621_v28, %v1767_v2  ;;  %3870 = vmatprep.subr.bf16.mxu1 %v5314_v31 }
 0x1b6   : > { %v1788_v13 = vsel %vm1776_vm4, %v6184_v58, %v1787_v34  ;;  %v1779_v11 = vsel %vm1776_vm4, %v6173_v50, %v1778_v45  ;;  %v6997_v25 = vpop.permute.xlu1 %1274  ;;  %v6999_v12 = vpop.permute.xlu0 %1264  ;;  %3871 = vmatpush2.bf16.msra.mxu1 %v5313_v30  ;;  %v9623_v50 = vrot.slane %v6553_v56, 4  ;;  %v9624_v45 = vrot.slane %v6539_v17, 4 }
 0x1b7   : > { %v9439_v32 = vrot.slane %v6997_v25, 4  ;;  %v9438_v26 = vrot.slane %v6999_v12, 4  ;;  %v5367_v38 = vcombine.low %v1779_v11, %v1788_v13  ;;  %v5368_v3 = vcombine.high %v1779_v11, %v1788_v13 }
 0x1b8   : > { %376 = vrot.lane.b32.xlu1 %v6494_v0, %s9622_s29  ;;  %366 = vrot.lane.b32.xlu0 %v6498_v57, %s9622_s29 }
 0x1b9   : > { %v1302_v58 = vsel %vm390_vm0, %v9623_v50, %v9439_v32  ;;  %v1293_v30 = vsel %vm390_vm0, %v9624_v45, %v9438_v26  ;;  %3911 = vmatprep.subr.bf16.mxu0 %v5368_v3  ;;  %v9626_v3 = vrot.slane %v6221_v33, 4 }
 0x1ba   : > { %v1303_v31 = vsel %vm1291_vm15, %v6553_v56, %v1302_v58  ;;  %v1294_v0 = vsel %vm1291_vm15, %v6539_v17, %v1293_v30  ;;  %v7021_v57 = vpop.permute.xlu1 %1690  ;;  %v7023_v34 = vpop.permute.xlu0 %1680  ;;  %3912 = vmatpush1.bf16.msra.mxu0 %v5367_v38  ;;  %v9625_v56 = vrot.slane %v6232_v43, 4 }
 0x1bb   : > { %v1703_v28 = vrot.slane %v7021_v57, 4  ;;  %v9441_v13 = vrot.slane %v7023_v34, 4  ;;  %v5304_v11 = vcombine.low %v1294_v0, %v1303_v31  ;;  %v5305_v50 = vcombine.high %v1294_v0, %v1303_v31 }
 0x1bc   : > { %2106 = vrot.lane.b32.xlu1 %v6697_v63, %s9582_s28  ;;  %2096 = vrot.lane.b32.xlu0 %v6700_v10, %s9582_s28 }
 0x1bd   : > { %v1718_v17 = vsel %vm390_vm0, %v9625_v56, %v1703_v28  ;;  %v1709_v38 = vsel %vm390_vm0, %v9626_v3, %v9441_v13  ;;  %3872 = vmatprep.subr.bf16.mxu1 %v5305_v50 }
 0x1be   : > { %v1719_v58 = vsel %vm9541_vm7, %v6232_v43, %v1718_v17  ;;  %v1710_v45 = vsel %vm9541_vm7, %v6221_v33, %v1709_v38  ;;  %v7045_v30 = vpop.permute.xlu1 %1205  ;;  %v7047_v31 = vpop.permute.xlu0 %1195  ;;  %3873 = vmatpush2.bf16.msra.mxu1 %v5304_v11  ;;  %v9627_v33 = vrot.slane %v6599_v44, 4  ;;  %v9628_v11 = vrot.slane %v6588_v47, 4 }
 0x1bf   : > { %v9440_v0 = vrot.slane %v7045_v30, 4  ;;  %v9442_v56 = vrot.slane %v7047_v31, 4  ;;  %v5358_v26 = vcombine.low %v1710_v45, %v1719_v58  ;;  %v5359_v32 = vcombine.high %v1710_v45, %v1719_v58 }
 0x1c0   : > { %2037 = vrot.lane.b32.xlu1 %v6697_v63, %s9587_s26  ;;  %2027 = vrot.lane.b32.xlu0 %v6700_v10, %s9587_s26 }
 0x1c1   : > { %v1233_v43 = vsel %vm390_vm0, %v9627_v33, %v9440_v0  ;;  %v1224_v50 = vsel %vm390_vm0, %v9628_v11, %v9442_v56  ;;  %3913 = vmatprep.subr.bf16.mxu0 %v5359_v32 }
 0x1c2   : > { %v1234_v17 = vsel %vm9445_vm11, %v6599_v44, %v1233_v43  ;;  %v1225_v3 = vsel %vm9445_vm11, %v6588_v47, %v1224_v50  ;;  %v7069_v38 = vpop.permute.xlu1 %1621  ;;  %v7071_v58 = vpop.permute.xlu0 %1611  ;;  %3914 = vmatpush1.bf16.msra.mxu0 %v5358_v26  ;;  %v9629_v47 = vrot.slane %v6276_v39, 4  ;;  %v9630_v26 = vrot.slane %v6265_v21, 4 }
 0x1c3   : > { %v9443_v45 = vrot.slane %v7069_v38, 4  ;;  %v9485_v33 = vrot.slane %v7071_v58, 4  ;;  %v5295_v0 = vcombine.low %v1225_v3, %v1234_v17  ;;  %v5296_v13 = vcombine.high %v1225_v3, %v1234_v17 }
 0x1c4   : > { %1345 = vrot.lane.b32.xlu1 %v6092_v8, %s9573_s14  ;;  %1335 = vrot.lane.b32.xlu0 %v6095_v9, %s9573_s14 }
 0x1c5   : > { %v1649_v44 = vsel %vm390_vm0, %v9629_v47, %v9443_v45  ;;  %v1640_v32 = vsel %vm390_vm0, %v9630_v26, %v9485_v33  ;;  %3874 = vmatprep.subr.bf16.mxu1 %v5296_v13  ;;  %v9632_v13 = vrot.slane %v6634_v55, 4 }
 0x1c6   : > { %v1650_v43 = vsel %vm9540_vm9, %v6276_v39, %v1649_v44  ;;  %v1641_v11 = vsel %vm9540_vm9, %v6265_v21, %v1640_v32  ;;  %v7093_v50 = vpop.permute.xlu1 %1136  ;;  %v7095_v17 = vpop.permute.xlu0 %1126  ;;  %3875 = vmatpush2.bf16.msra.mxu1 %v5295_v0  ;;  %v9631_v21 = vrot.slane %v6652_v36, 4 }
 0x1c7   : > { %v9447_v3 = vrot.slane %v7093_v50, 4  ;;  %v9446_v47 = vrot.slane %v7095_v17, 4  ;;  %v5349_v56 = vcombine.low %v1641_v11, %v1650_v43  ;;  %v5350_v45 = vcombine.high %v1641_v11, %v1650_v43 }
 0x1c8   : > { %1968 = vrot.lane.b32.xlu1 %v6697_v63, %s9591_s11  ;;  %1958 = vrot.lane.b32.xlu0 %v6700_v10, %s9591_s11 }
 0x1c9   : > { %v1164_v39 = vsel %vm390_vm0, %v9631_v21, %v9447_v3  ;;  %v1155_v0 = vsel %vm390_vm0, %v9632_v13, %v9446_v47  ;;  %3915 = vmatprep.subr.bf16.mxu0 %v5350_v45 }
 0x1ca   : > { %v1165_v44 = vsel %vm9444_vm3, %v6652_v36, %v1164_v39  ;;  %v1156_v63 = vsel %vm9444_vm3, %v6634_v55, %v1155_v0  ;;  %v7117_v10 = vpop.permute.xlu1 %1552  ;;  %v7119_v26 = vpop.permute.xlu0 %1542  ;;  %3916 = vmatpush1.bf16.msra.mxu0 %v5349_v56  ;;  %v9634_v55 = vrot.slane %v6320_v51, 4  ;;  %v9635_v56 = vrot.slane %v6309_v29, 4 }
 0x1cb   : > { %v9484_v32 = vrot.slane %v7117_v10, 4  ;;  %v9449_v43 = vrot.slane %v7119_v26, 4  ;;  %v5286_v11 = vcombine.low %v1156_v63, %v1165_v44  ;;  %v5287_v21 = vcombine.high %v1156_v63, %v1165_v44 }
 0x1cc   : > { %1276 = vrot.lane.b32.xlu1 %v6092_v8, %s9633_s17  ;;  %1266 = vrot.lane.b32.xlu0 %v6095_v9, %s9633_s17  ;;  %vm9636_vm3 = vcmask 523264  }
 0x1cd   : > { %v1580_v36 = vsel %vm390_vm0, %v9634_v55, %v9484_v32  ;;  %v1571_v45 = vsel %vm390_vm0, %v9635_v56, %v9449_v43  ;;  %3876 = vmatprep.subr.bf16.mxu1 %v5287_v21  ;;  %vm9637_vm11 = vmmov %vm9636_vm3 }
 0x1ce   : > { %v1581_v39 = vsel %vm9636_vm3, %v6320_v51, %v1580_v36  ;;  %v1572_v13 = vsel %vm9637_vm11, %v6309_v29, %v1571_v45  ;;  %v7141_v0 = vpop.permute.xlu1 %1067  ;;  %v7143_v44 = vpop.permute.xlu0 %1057  ;;  %3877 = vmatpush2.bf16.msra.mxu1 %v5286_v11  ;;  %v9638_v29 = vrot.slane %v6703_v4, 4  ;;  %v9639_v11 = vrot.slane %v6686_v6, 4 }
 0x1cf   : > { %v9448_v63 = vrot.slane %v7141_v0, 4  ;;  %v9450_v55 = vrot.slane %v7143_v44, 4  ;;  %v5340_v47 = vcombine.low %v1572_v13, %v1581_v39  ;;  %v5341_v3 = vcombine.high %v1572_v13, %v1581_v39 }
 0x1d0   : > { %793 = vrot.lane.b32.xlu1 %v6092_v8, %s9594_s15  ;;  %783 = vrot.lane.b32.xlu0 %v6095_v9, %s9594_s15  ;;  %s9640_s15 = smov 70   ;;  %vm9643_vm3 = vcmask 359424  }
 0x1d1   : > { %v1095_v51 = vsel %vm390_vm0, %v9638_v29, %v9448_v63  ;;  %v1086_v21 = vsel %vm390_vm0, %v9639_v11, %v9450_v55  ;;  %3917 = vmatprep.subr.bf16.mxu0 %v5341_v3  ;;  %v9642_v3 = vrot.slane %v6353_v20, 4  ;;  %vm9644_vm11 = vmmov %vm9643_vm3 }
 0x1d2   : > { %v1096_v36 = vsel %vm1084_vm5, %v6703_v4, %v1095_v51  ;;  %v1087_v56 = vsel %vm1084_vm5, %v6686_v6, %v1086_v21  ;;  %v7165_v45 = vpop.permute.xlu1 %1481  ;;  %v7167_v39 = vpop.permute.xlu0 %1471  ;;  %3918 = vmatpush1.bf16.msra.mxu0 %v5340_v47  ;;  %v9641_v6 = vrot.slane %v6364_v61, 4 }
 0x1d3   : > { %v9455_v13 = vrot.slane %v7165_v45, 4  ;;  %v9454_v29 = vrot.slane %v7167_v39, 4  ;;  %v5277_v63 = vcombine.low %v1087_v56, %v1096_v36  ;;  %v5278_v43 = vcombine.high %v1087_v56, %v1096_v36 }
 0x1d4   : > { %1207 = vrot.lane.b32.xlu1 %v6092_v8, %s9640_s15  ;;  %1197 = vrot.lane.b32.xlu0 %v6095_v9, %s9640_s15  ;;  %v9451_v56 = vmov 0  }
 0x1d5   : > { %v1509_v4 = vsel %vm390_vm0, %v9641_v6, %v9455_v13  ;;  %v1500_v47 = vsel %vm390_vm0, %v9642_v3, %v9454_v29  ;;  %3878 = vmatprep.subr.bf16.mxu1 %v5278_v43  ;;  %5595 = vset.pattern.permute.xlu1 %v9451_v56 }
 0x1d6   : > { %v1510_v51 = vsel %vm9643_vm3, %v6364_v61, %v1509_v4  ;;  %v1501_v11 = vsel %vm9644_vm11, %v6353_v20, %v1500_v47  ;;  %v7189_v21 = vpop.permute.xlu1 %998  ;;  %v7191_v36 = vpop.permute.xlu0 %988  ;;  %3879 = vmatpush2.bf16.msra.mxu1 %v5277_v63  ;;  %5594 = vset.pattern.permute.xlu0 %v9451_v56  ;;  %v9645_v20 = vrot.slane %v6749_v14, 4  ;;  %v9646_v63 = vrot.slane %v6738_v46, 4 }
 0x1d7   : > { %v9453_v6 = vrot.slane %v7189_v21, 4  ;;  %v9456_v55 = vrot.slane %v7191_v36, 4  ;;  %v5331_v3 = vcombine.low %v1501_v11, %v1510_v51  ;;  %v5332_v43 = vcombine.high %v1501_v11, %v1510_v51 }
 0x1d8   : > { %724 = vrot.lane.b32.xlu1 %v6092_v8, %s9599_s9  ;;  %714 = vrot.lane.b32.xlu0 %v6095_v9, %s9599_s9  ;;  %s9647_s9 = smov 72   ;;  %vm9650_vm3 = vcmask 375808  }
 0x1d9   : > { %v1026_v61 = vsel %vm390_vm0, %v9645_v20, %v9453_v6  ;;  %v1017_v4 = vsel %vm390_vm0, %v9646_v63, %v9456_v55  ;;  %3919 = vmatprep.subr.bf16.mxu0 %v5332_v43  ;;  %vm9651_vm11 = vmmov %vm9650_vm3 }
 0x1da   : > { %v1027_v47 = vsel %vm1015_vm8, %v6749_v14, %v1026_v61  ;;  %v1018_v51 = vsel %vm1015_vm8, %v6738_v46, %v1017_v4  ;;  %v7215_v11 = vpop.permute.xlu1 %1412  ;;  %v7217_v56 = vpop.permute.xlu0 %1402  ;;  %3920 = vmatpush1.bf16.msra.mxu0 %v5331_v3  ;;  %v9648_v46 = vrot.slane %v6408_v48, 4  ;;  %v9649_v3 = vrot.slane %v6397_v40, 4 }
 0x1db   : > { %v9457_v20 = vrot.slane %v7215_v11, 4  ;;  %v9459_v6 = vrot.slane %v7217_v56, 4  ;;  %v5268_v29 = vcombine.low %v1018_v51, %v1027_v47  ;;  %v5269_v13 = vcombine.high %v1018_v51, %v1027_v47 }
 0x1dc   : > { %1138 = vrot.lane.b32.xlu1 %v6092_v8, %s9647_s9  ;;  %1128 = vrot.lane.b32.xlu0 %v6095_v9, %s9647_s9 }
 0x1dd   : > { %v1440_v14 = vsel %vm390_vm0, %v9648_v46, %v9457_v20  ;;  %v1431_v43 = vsel %vm390_vm0, %v9649_v3, %v9459_v6  ;;  %3880 = vmatprep.subr.bf16.mxu1 %v5269_v13  ;;  %v9653_v13 = vrot.slane %v6784_v54, 4 }
 0x1de   : > { %v1441_v61 = vsel %vm9650_vm3, %v6408_v48, %v1440_v14  ;;  %v1432_v63 = vsel %vm9651_vm11, %v6397_v40, %v1431_v43  ;;  %v7239_v4 = vpop.permute.xlu1 %929  ;;  %v7241_v47 = vpop.permute.xlu0 %919  ;;  %3881 = vmatpush2.bf16.msra.mxu1 %v5268_v29  ;;  %v9652_v40 = vrot.slane %v6795_v53, 4  ;;  %vm9657_vm3 = vcmask 97280  }
 0x1df   : > { %v9458_v51 = vrot.slane %v7239_v4, 4  ;;  %v9460_v46 = vrot.slane %v7241_v47, 4  ;;  %v5322_v55 = vcombine.low %v1432_v63, %v1441_v61  ;;  %v5323_v20 = vcombine.high %v1432_v63, %v1441_v61  ;;  %vm9658_vm11 = vmmov %vm9657_vm3 }
 0x1e0   : > { %655 = vrot.lane.b32.xlu1 %v6092_v8, %s9602_s30  ;;  %645 = vrot.lane.b32.xlu0 %v6095_v9, %s9602_s30  ;;  %s9654_s30 = smov 92  }
 0x1e1   : > { %v957_v48 = vsel %vm390_vm0, %v9652_v40, %v9458_v51  ;;  %v948_v29 = vsel %vm390_vm0, %v9653_v13, %v9460_v46  ;;  %3921 = vmatprep.subr.bf16.mxu0 %v5323_v20 }
 0x1e2   : > { %v958_v14 = vsel %vm946_vm10, %v6795_v53, %v957_v48  ;;  %v949_v3 = vsel %vm946_vm10, %v6784_v54, %v948_v29  ;;  %v7263_v43 = vpop.permute.xlu1 %2104  ;;  %v7265_v61 = vpop.permute.xlu0 %2094  ;;  %3922 = vmatpush1.bf16.msra.mxu0 %v5322_v55  ;;  %v9655_v54 = vrot.slane %v6458_v42, 4  ;;  %v9656_v55 = vrot.slane %v6447_v41, 4 }
 0x1e3   : > { %v9461_v63 = vrot.slane %v7263_v43, 4  ;;  %v9463_v40 = vrot.slane %v7265_v61, 4  ;;  %v5259_v51 = vcombine.low %v949_v3, %v958_v14  ;;  %v5260_v6 = vcombine.high %v949_v3, %v958_v14 }
 0x1e4   : > { %1069 = vrot.lane.b32.xlu1 %v6092_v8, %s9654_s30  ;;  %1059 = vrot.lane.b32.xlu0 %v6095_v9, %s9654_s30 }
 0x1e5   : > { %v2132_v53 = vsel %vm390_vm0, %v9655_v54, %v9461_v63  ;;  %v2123_v20 = vsel %vm390_vm0, %v9656_v55, %v9463_v40  ;;  %3882 = vmatprep.subr.bf16.mxu1 %v5260_v6  ;;  %v9660_v6 = vrot.slane %v6830_v15, 4 }
 0x1e6   : > { %v2133_v48 = vsel %vm9657_vm3, %v6458_v42, %v2132_v53  ;;  %v2124_v13 = vsel %vm9658_vm11, %v6447_v41, %v2123_v20  ;;  %v7287_v29 = vpop.permute.xlu1 %858  ;;  %v7289_v14 = vpop.permute.xlu0 %848  ;;  %3883 = vmatpush2.bf16.msra.mxu1 %v5259_v51  ;;  %v9659_v41 = vrot.slane %v6841_v23, 4  ;;  %vm9664_vm3 = vcmask 113664  }
 0x1e7   : > { %v9462_v3 = vrot.slane %v7287_v29, 4  ;;  %v9464_v54 = vrot.slane %v7289_v14, 4  ;;  %v5412_v46 = vcombine.low %v2124_v13, %v2133_v48  ;;  %v5413_v63 = vcombine.high %v2124_v13, %v2133_v48  ;;  %vm9665_vm11 = vmmov %vm9664_vm3 }
 0x1e8   : > { %586 = vrot.lane.b32.xlu1 %v6092_v8, %s9605_s12  ;;  %576 = vrot.lane.b32.xlu0 %v6095_v9, %s9605_s12  ;;  %s9661_s12 = smov 94  }
 0x1e9   : > { %v886_v42 = vsel %vm390_vm0, %v9659_v41, %v9462_v3  ;;  %v877_v51 = vsel %vm390_vm0, %v9660_v6, %v9464_v54  ;;  %3933 = vmatprep.subr.bf16.mxu0 %v5413_v63 }
 0x1ea   : > { %v887_v53 = vsel %vm875_vm12, %v6841_v23, %v886_v42  ;;  %v878_v55 = vsel %vm875_vm12, %v6830_v15, %v877_v51  ;;  %v7311_v20 = vpop.permute.xlu1 %2035  ;;  %v7313_v48 = vpop.permute.xlu0 %2025  ;;  %3934 = vmatpush2.bf16.msra.mxu0 %v5412_v46  ;;  %v9662_v15 = vrot.slane %v6480_v37, 4  ;;  %v9663_v46 = vrot.slane %v6469_v5, 4 }
 0x1eb   : > { %v9465_v13 = vrot.slane %v7311_v20, 4  ;;  %v9482_v41 = vrot.slane %v7313_v48, 4  ;;  %v5250_v3 = vcombine.low %v878_v55, %v887_v53  ;;  %v5251_v40 = vcombine.high %v878_v55, %v887_v53 }
 0x1ec   : > { %1000 = vrot.lane.b32.xlu1 %v6092_v8, %s9661_s12  ;;  %990 = vrot.lane.b32.xlu0 %v6095_v9, %s9661_s12 }
 0x1ed   : > { %v2063_v23 = vsel %vm390_vm0, %v9662_v15, %v9465_v13  ;;  %v2054_v63 = vsel %vm390_vm0, %v9663_v46, %v9482_v41  ;;  %3884 = vmatprep.subr.bf16.mxu1 %v5251_v40  ;;  %v9667_v40 = vrot.slane %v6883_v35, 4 }
 0x1ee   : > { %v2064_v42 = vsel %vm9664_vm3, %v6480_v37, %v2063_v23  ;;  %v2055_v6 = vsel %vm9665_vm11, %v6469_v5, %v2054_v63  ;;  %v7335_v51 = vpop.permute.xlu1 %1899  ;;  %v7337_v53 = vpop.permute.xlu0 %1889  ;;  %3885 = vmatpush2.bf16.msra.mxu1 %v5250_v3  ;;  %v9666_v5 = vrot.slane %v6881_v18, 4  ;;  %vm9671_vm3 = vcmask 130048  }
 0x1ef   : > { %v9467_v55 = vrot.slane %v7335_v51, 4  ;;  %v9466_v15 = vrot.slane %v7337_v53, 4  ;;  %v5403_v54 = vcombine.low %v2055_v6, %v2064_v42  ;;  %v5404_v13 = vcombine.high %v2055_v6, %v2064_v42  ;;  %vm9672_vm11 = vmmov %vm9671_vm3 }
 0x1f0   : > { %517 = vrot.lane.b32.xlu1 %v6092_v8, %s9610_s10  ;;  %507 = vrot.lane.b32.xlu0 %v6095_v9, %s9610_s10  ;;  %s9668_s10 = smov 96  }
 0x1f1   : > { %v1927_v37 = vsel %vm390_vm0, %v9666_v5, %v9467_v55  ;;  %v1918_v3 = vsel %vm390_vm0, %v9667_v40, %v9466_v15  ;;  %3935 = vmatprep.subr.bf16.mxu0 %v5404_v13  ;;  %3887 = vmatmul.mubr.bf16.vlgmr.msra.gmra.mxu1 %v6875_v62 }
 0x1f2   : > { %v1928_v23 = vsel %vm1914_vm1, %v6881_v18, %v1927_v37  ;;  %v1919_v46 = vsel %vm1914_vm1, %v6883_v35, %v1918_v3  ;;  %v7360_v63 = vpop.permute.xlu1 %1966  ;;  %v7362_v42 = vpop.permute.xlu0 %1956  ;;  %3936 = vmatpush2.bf16.msra.mxu0 %v5403_v54  ;;  %3896 = vmatprep.mubr.bf16.mxu1 %v6888_v19  ;;  %v9669_v18 = vrot.slane %v6528_v24, 4  ;;  %v9670_v35 = vrot.slane %v6517_v52, 4 }
 0x1f3   : > { %v9481_v6 = vrot.slane %v7360_v63, 4  ;;  %v9479_v5 = vrot.slane %v7362_v42, 4  ;;  %v5387_v13 = vcombine.low %v1919_v46, %v1928_v23  ;;  %v5388_v40 = vcombine.high %v1919_v46, %v1928_v23 }
 0x1f4   : > { %931 = vrot.lane.b32.xlu1 %v6092_v8, %s9668_s10  ;;  %921 = vrot.lane.b32.xlu0 %v6095_v9, %s9668_s10 }
 0x1f5   : > { %v1994_v62 = vsel %vm390_vm0, %v9669_v18, %v9481_v6  ;;  %v1985_v19 = vsel %vm390_vm0, %v9670_v35, %v9479_v5  ;;  %4013 = vmatprep.subr.bf16.mxu1 %v5388_v40 }
 0x1f6   : > { %v1995_v54 = vsel %vm9671_vm3, %v6528_v24, %v1994_v62  ;;  %v1986_v37 = vsel %vm9672_vm11, %v6517_v52, %v1985_v19  ;;  %v7385_v3 = vpop.permute.xlu1 %1830  ;;  %v7387_v23 = vpop.permute.xlu0 %1820  ;;  %4014 = vmatpush1.bf16.msra.mxu1 %v5387_v13  ;;  %v9674_v52 = vrot.slane %v6911_v49, 4  ;;  %v9675_v13 = vrot.slane %v6913_v16, 4 }
 0x1f7   : > { %9673 = vst [vmem:[#allocation34_spill] sm:$0xff] %v7387_v23  ;;  %v9473_v46 = vrot.slane %v7385_v3, 4  ;;  %v9472_v18 = vrot.slane %v7387_v23, 4  ;;  %v5394_v15 = vcombine.low %v1986_v37, %v1995_v54  ;;  %v5395_v55 = vcombine.high %v1986_v37, %v1995_v54  ;;  %v5616_v23 = vld [vmem:[#allocation2 + $0x14] ss:$36 sps:$4 sm:$0xff]  }
 0x1f8   : > { %448 = vrot.lane.b32.xlu1 %v6092_v8, %s9617_s18  ;;  %438 = vrot.lane.b32.xlu0 %v6095_v9, %s9617_s18  ;;  %vm9678_vm3 = vcmask 637952   ;;  %s5800_s18 = smov [#allocation7]  }
 0x1f9   : > { %v1858_v24 = vsel %vm390_vm0, %v9674_v52, %v9473_v46  ;;  %v1849_v40 = vsel %vm390_vm0, %v9675_v13, %v9472_v18  ;;  %3937 = vmatprep.subr.bf16.mxu0 %v5395_v55  ;;  %3897 = vmatmul.mubr.bf16.gmra.mxu1 %v6935_v27  ;;  %v5660_v13 = vld [vmem:[#allocation2 + $0x3c] sm:$0xff]  ;;  %vm9679_vm11 = vmmov %vm9678_vm3  ;;  %s5708_s8 = sshll.u32 %s5800_s18, 4  ;;  %s5709_s8 = int_to_ptr.vmem [resolvable:$false] %s5708_s8 }
 0x1fa   : > { %v1859_v62 = vsel %vm1845_vm2, %v6911_v49, %v1858_v24  ;;  %v1850_v35 = vsel %vm1845_vm2, %v6913_v16, %v1849_v40  ;;  %v7410_v19 = vpop.permute.xlu1 %791  ;;  %v7412_v54 = vpop.permute.xlu0 %781  ;;  %3938 = vmatpush2.bf16.msra.mxu0 %v5394_v15  ;;  %5423 = vmatprep.mubr.msk.bf16.mxu1 %vm1360_vm6, %v6973_v22  ;;  %v5661_v49 = vld [vmem:[#allocation2 + $0x18] sm:$0xff]  ;;  %v9676_v16 = vrot.slane %v6564_v60, 4  ;;  %v9677_v22 = vrot.slane %v6566_v1, 4  ;;  %v7468_v18 = vld [vmem:[%s5945_s19 + $0x68] sm:$0xff]  ;;  %s5710_s7 = scalar_lea.vmem %s5709_s8, 9216 }
 0x1fb   : > { %v9477_v37 = vrot.slane %v7410_v19, 4  ;;  %v9474_v55 = vrot.slane %v7412_v54, 4  ;;  %v5378_v52 = vcombine.low %v1850_v35, %v1859_v62  ;;  %v5379_v27 = vcombine.high %v1850_v35, %v1859_v62  ;;  %v7433_v40 = vld [vmem:[%s9260_s1 + $0x8] ss:$16 sps:$4 sm:$0xff]  }
 0x1fc   : > { %860 = vrot.lane.b32.xlu1 %v5660_v13, %s9585_s0  ;;  %850 = vrot.lane.b32.xlu0 %v5661_v49, %s9585_s0 }
 0x1fd   : > { %v819_v15 = vsel %vm390_vm0, %v9676_v16, %v9477_v37  ;;  %v810_v24 = vsel %vm390_vm0, %v9677_v22, %v9474_v55  ;;  %4015 = vmatprep.subr.bf16.mxu1 %v5379_v27  ;;  %3940 = vmatmul.mubr.bf16.vlgmr.msra.gmra.mxu0 %v7433_v40  ;;  %v7447_v27 = vld [vmem:[%s9260_s1 + $0x2c] ss:$16 sps:$4 sm:$0xff]  }
 0x1fe   : > { %v820_v62 = vsel %vm9678_vm3, %v6564_v60, %v819_v15  ;;  %v811_v35 = vsel %vm9679_vm11, %v6566_v1, %v810_v24  ;;  %v7440_v13 = vpop.permute.xlu1 %1761  ;;  %v7442_v49 = vpop.permute.xlu0 %1751  ;;  %4016 = vmatpush1.bf16.msra.mxu1 %v5378_v52  ;;  %5422 = vmatprep.mubr.msk.bf16.mxu0 %vm1360_vm6, %v7447_v27  ;;  %v9682_v1 = vrot.slane %v6966_v7, 4  ;;  %vm9687_vm3 = vcmask 654336  }
 0x1ff   : > { %9680 = vst [vmem:[#allocation35_spill] sm:$0xff] %v7440_v13  ;;  %9681 = vst [vmem:[#allocation36_spill] sm:$0xff] %v7442_v49  ;;  %v9475_v16 = vrot.slane %v7440_v13, 4  ;;  %v9476_v60 = vrot.slane %v7442_v49, 4  ;;  %v5243_v15 = vcombine.low %v811_v35, %v820_v62  ;;  %v5244_v22 = vcombine.high %v811_v35, %v820_v62  ;;  %v7471_v62 = vld [vmem:[%s5945_s19 + $0x30] sm:$0xff] }
 0x200   : > { %378 = vrot.lane.b32.xlu1 %v6092_v8, %s9622_s29  ;;  %368 = vrot.lane.b32.xlu0 %v6095_v9, %s9622_s29  ;;  %vm9688_vm11 = vmmov %vm9687_vm3  ;;  %s9931_s29 = sld [smem:[#allocation38_spill]] }
 0x201   : > { %v1789_v52 = vsel %vm390_vm0, %v9682_v1, %v9475_v16  ;;  %v1780_v24 = vsel %vm390_vm0, %v1767_v2, %v9476_v60  ;;  %3960 = vmatprep.subr.bf16.mxu0 %v5244_v22 }
 0x202   : > { %v1790_v35 = vsel %vm1776_vm4, %v6966_v7, %v1789_v52  ;;  %v1781_v46 = vsel %vm1776_vm4, %v6968_v59, %v1780_v24  ;;  %v7477_v55 = vpop.permute.xlu1 %722  ;;  %v7479_v1 = vpop.permute.xlu0 %712  ;;  %3961 = vmatpush1.bf16.msra.mxu0 %v5243_v15  ;;  %v9683_v7 = vld [vmem:[#allocation20_spill] sm:$0xff]  ;;  %v9685_v15 = vld [vmem:[#allocation21_spill] sm:$0xff] }
 0x203   : > { %v9478_v16 = vrot.slane %v7477_v55, 4  ;;  %v9480_v2 = vrot.slane %v7479_v1, 4  ;;  %v5369_v60 = vcombine.low %v1781_v46, %v1790_v35  ;;  %v5370_v37 = vcombine.high %v1781_v46, %v1790_v35  ;;  %v7500_v46 = vld [vmem:[%s9260_s1 + $0x28] ss:$16 sps:$4 sm:$0xff]  }
 0x204   : > { %1901 = vrot.lane.b32.xlu1 %v7468_v18, %s9588_s13  ;;  %1891 = vrot.lane.b32.xlu0 %v7471_v62, %s9588_s13  ;;  %v9684_v59 = vrot.slane %v9683_v7, 4  ;;  %v9686_v52 = vrot.slane %v9685_v15, 4 }
 0x205   : > { %4017 = vmatprep.subr.bf16.mxu1 %v5370_v37  ;;  %3950 = vmatmul.mubr.bf16.gmra.mxu0 %v7500_v46  ;;  %v7514_v37 = vld [vmem:[%s9260_s1 + $0x4] ss:$16 sps:$4 sm:$0xff]  }
 0x206   : > { %v750_v22 = vsel %vm390_vm0, %v9684_v59, %v9478_v16  ;;  %v741_v24 = vsel %vm390_vm0, %v9686_v52, %v9480_v2  ;;  %v7507_v16 = vpop.permute.xlu1 %1692  ;;  %v7509_v5 = vpop.permute.xlu0 %1682  ;;  %4018 = vmatpush1.bf16.msra.mxu1 %v5369_v60  ;;  %3992 = vmatprep.mubr.bf16.mxu0 %v7514_v37 }
 0x207   : > { %v751_v35 = vsel %vm9687_vm3, %v9683_v7, %v750_v22  ;;  %v742_v59 = vsel %vm9688_vm11, %v9685_v15, %v741_v24  ;;  %9689 = vst [vmem:[#allocation20_spill] sm:$0xff] %v7507_v16  ;;  %9690 = vst [vmem:[#allocation21_spill] sm:$0xff] %v7509_v5  ;;  %v9483_v52 = vrot.slane %v7507_v16, 4  ;;  %v9488_v2 = vrot.slane %v7509_v5, 4  ;;  %v7544_v5 = vld [vmem:[%s5945_s19 + $0x60] sm:$0xff] }
 0x208   : > { %v5234_v7 = vcombine.low %v742_v59, %v751_v35  ;;  %v5235_v22 = vcombine.high %v742_v59, %v751_v35  ;;  %1832 = vrot.lane.b32.xlu1 %v7468_v18, %s9572_s25  ;;  %1822 = vrot.lane.b32.xlu0 %v7471_v62, %s9572_s25  ;;  %v9691_v15 = vrot.slane %v7023_v34, 4  ;;  %vm9696_vm3 = vcmask 818176  }
 0x209   : > { %v1720_v60 = vsel %vm390_vm0, %v1703_v28, %v9483_v52  ;;  %vm9697_vm11 = vmmov %vm9696_vm3 }
 0x20a   : > { %v1711_v24 = vsel %vm390_vm0, %v9691_v15, %v9488_v2  ;;  %3962 = vmatprep.subr.bf16.mxu0 %v5235_v22  ;;  %v1721_v35 = vsel %vm9541_vm7, %v7021_v57, %v1720_v60  ;;  %v7537_v6 = vpop.permute.xlu1 %653  ;;  %v7539_v41 = vpop.permute.xlu0 %643  ;;  %v7549_v57 = vld [vmem:[%s5945_s19 + $0x28] sm:$0xff] }
 0x20b   : > { %v1712_v59 = vsel %vm9541_vm7, %v7023_v34, %v1711_v24  ;;  %3963 = vmatpush1.bf16.msra.mxu0 %v5234_v7  ;;  %v9491_v28 = vrot.slane %v7537_v6, 4  ;;  %v9497_v52 = vrot.slane %v7539_v41, 4  ;;  %v9692_v34 = vld [vmem:[#allocation22_spill] sm:$0xff]  ;;  %v9694_v60 = vld [vmem:[#allocation23_spill] sm:$0xff] }
 0x20c   : > { %v5360_v32 = vcombine.low %v1712_v59, %v1721_v35  ;;  %v5361_v33 = vcombine.high %v1712_v59, %v1721_v35  ;;  %1347 = vrot.lane.b32.xlu1 %v7544_v5, %s9573_s14  ;;  %1337 = vrot.lane.b32.xlu0 %v7549_v57, %s9573_s14  ;;  %v9693_v7 = vrot.slane %v9692_v34, 4  ;;  %v9695_v15 = vrot.slane %v9694_v60, 4 }
 0x20e   : > { %v681_v22 = vsel %vm390_vm0, %v9693_v7, %v9491_v28  ;;  %v672_v24 = vsel %vm390_vm0, %v9695_v15, %v9497_v52  ;;  %4019 = vmatprep.subr.bf16.mxu1 %v5361_v33  ;;  %v7567_v2 = vpop.permute.xlu1 %1623  ;;  %v7569_v16 = vpop.permute.xlu0 %1613  ;;  %v9700_v33 = vrot.slane %v7069_v38, 4 }
 0x20f   : > { %v682_v35 = vsel %vm9696_vm3, %v9692_v34, %v681_v22  ;;  %v673_v59 = vsel %vm9697_vm11, %v9694_v60, %v672_v24  ;;  %9698 = vst [vmem:[#allocation22_spill] sm:$0xff] %v7567_v2  ;;  %9699 = vst [vmem:[#allocation23_spill] sm:$0xff] %v7569_v16  ;;  %4020 = vmatpush1.bf16.msra.mxu1 %v5360_v32  ;;  %v9496_v7 = vrot.slane %v7567_v2, 4  ;;  %v9498_v28 = vrot.slane %v7569_v16, 4 }
 0x210   : > { %v5225_v49 = vcombine.low %v673_v59, %v682_v35  ;;  %v5226_v13 = vcombine.high %v673_v59, %v682_v35  ;;  %1763 = vrot.lane.b32.xlu1 %v7468_v18, %s9574_s23  ;;  %1753 = vrot.lane.b32.xlu0 %v7471_v62, %s9574_s23  ;;  %v9701_v32 = vrot.slane %v7071_v58, 4  ;;  %vm9706_vm3 = vcmask 834560   ;;  %s9926_s23 = sld [smem:[#allocation19_spill]] }
 0x211   : > { %v1651_v34 = vsel %vm390_vm0, %v9700_v33, %v9496_v7  ;;  %vm9707_vm11 = vmmov %vm9706_vm3 }
 0x212   : > { %v1642_v22 = vsel %vm390_vm0, %v9701_v32, %v9498_v28  ;;  %3964 = vmatprep.subr.bf16.mxu0 %v5226_v13  ;;  %v1652_v60 = vsel %vm9540_vm9, %v7069_v38, %v1651_v34  ;;  %v7591_v24 = vpop.permute.xlu1 %584  ;;  %v7593_v35 = vpop.permute.xlu0 %574  ;;  %v9702_v38 = vld [vmem:[#allocation24_spill] sm:$0xff] }
 0x213   : > { %v1643_v15 = vsel %vm9540_vm9, %v7071_v58, %v1642_v22  ;;  %3965 = vmatpush1.bf16.msra.mxu0 %v5225_v49  ;;  %v9499_v59 = vrot.slane %v7591_v24, 4  ;;  %v9505_v33 = vrot.slane %v7593_v35, 4  ;;  %v9703_v58 = vrot.slane %v9702_v38, 4  ;;  %v9704_v49 = vld [vmem:[#allocation25_spill] sm:$0xff] }
 0x214   : > { %v5351_v7 = vcombine.low %v1643_v15, %v1652_v60  ;;  %v5352_v52 = vcombine.high %v1643_v15, %v1652_v60  ;;  %1278 = vrot.lane.b32.xlu1 %v7544_v5, %s9633_s17  ;;  %1268 = vrot.lane.b32.xlu0 %v7549_v57, %s9633_s17  ;;  %v9705_v34 = vrot.slane %v9704_v49, 4  ;;  %s9932_s17 = smov %s9931_s29 }
 0x215   : > { %v612_v13 = vsel %vm390_vm0, %v9703_v58, %v9499_v59 }
 0x216   : > { %v603_v32 = vsel %vm390_vm0, %v9705_v34, %v9505_v33  ;;  %4021 = vmatprep.subr.bf16.mxu1 %v5352_v52  ;;  %v613_v22 = vsel %vm9706_vm3, %v9702_v38, %v612_v13  ;;  %v7615_v15 = vpop.permute.xlu1 %1554  ;;  %v7617_v28 = vpop.permute.xlu0 %1544  ;;  %v9710_v52 = vrot.slane %v7117_v10, 4  ;;  %vm9712_vm3 = vcmask 523264   ;;  %s5516_s25 = smul.u32 288, %s9926_s23 }
 0x217   : > { %v604_v60 = vsel %vm9707_vm11, %v9704_v49, %v603_v32  ;;  %9708 = vst [vmem:[#allocation24_spill] sm:$0xff] %v7615_v15  ;;  %9709 = vst [vmem:[#allocation25_spill] sm:$0xff] %v7617_v28  ;;  %4022 = vmatpush1.bf16.msra.mxu1 %v5351_v7  ;;  %v9504_v58 = vrot.slane %v7615_v15, 4  ;;  %v9506_v59 = vrot.slane %v7617_v28, 4  ;;  %v9711_v7 = vrot.slane %v7119_v26, 4 }
 0x218   : > { %v5216_v16 = vcombine.low %v604_v60, %v613_v22  ;;  %v5217_v2 = vcombine.high %v604_v60, %v613_v22  ;;  %1694 = vrot.lane.b32.xlu1 %v7468_v18, %s9575_s21  ;;  %1684 = vrot.lane.b32.xlu0 %v7471_v62, %s9575_s21  ;;  %vm9713_vm11 = vmmov %vm9712_vm3  ;;  %s9051_s14 = scalar_lea.vmem [#allocation7], %s5516_s25 }
 0x219   : > { %v1582_v38 = vsel %vm390_vm0, %v9710_v52, %v9504_v58  ;;  %v1573_v13 = vsel %vm390_vm0, %v9711_v7, %v9506_v59 }
 0x21a   : > { %3966 = vmatprep.subr.bf16.mxu0 %v5217_v2  ;;  %v1583_v49 = vsel %vm9712_vm3, %v7117_v10, %v1582_v38  ;;  %v1574_v34 = vsel %vm9713_vm11, %v7119_v26, %v1573_v13  ;;  %v7639_v32 = vpop.permute.xlu1 %515  ;;  %v7641_v22 = vpop.permute.xlu0 %505  ;;  %v9714_v10 = vld [vmem:[#allocation26_spill] sm:$0xff]  ;;  %vm9718_vm3 = vcmask 850944  }
 0x21b   : > { %3967 = vmatpush1.bf16.msra.mxu0 %v5216_v16  ;;  %v9507_v60 = vrot.slane %v7639_v32, 4  ;;  %v9513_v52 = vrot.slane %v7641_v22, 4  ;;  %v5342_v58 = vcombine.low %v1574_v34, %v1583_v49  ;;  %v5343_v33 = vcombine.high %v1574_v34, %v1583_v49  ;;  %v9716_v16 = vld [vmem:[#allocation27_spill] sm:$0xff]  ;;  %vm9719_vm11 = vmmov %vm9718_vm3 }
 0x21c   : > { %1209 = vrot.lane.b32.xlu1 %v7544_v5, %s9640_s15  ;;  %1199 = vrot.lane.b32.xlu0 %v7549_v57, %s9640_s15  ;;  %v9715_v26 = vrot.slane %v9714_v10, 4  ;;  %v9717_v38 = vrot.slane %v9716_v16, 4 }
 0x21d   : > { %4023 = vmatprep.subr.bf16.mxu1 %v5343_v33  ;;  %v9722_v33 = vrot.slane %v7165_v45, 4 }
 0x21e   : > { %v543_v2 = vsel %vm390_vm0, %v9715_v26, %v9507_v60  ;;  %v534_v7 = vsel %vm390_vm0, %v9717_v38, %v9513_v52  ;;  %v7663_v34 = vpop.permute.xlu1 %1483  ;;  %v7665_v59 = vpop.permute.xlu0 %1473  ;;  %4024 = vmatpush1.bf16.msra.mxu1 %v5342_v58  ;;  %v9723_v58 = vrot.slane %v7167_v39, 4 }
 0x21f   : > { %v544_v13 = vsel %vm9718_vm3, %v9714_v10, %v543_v2  ;;  %v535_v49 = vsel %vm9719_vm11, %v9716_v16, %v534_v7  ;;  %9720 = vst [vmem:[#allocation26_spill] sm:$0xff] %v7663_v34  ;;  %9721 = vst [vmem:[#allocation27_spill] sm:$0xff] %v7665_v59  ;;  %v9512_v26 = vrot.slane %v7663_v34, 4  ;;  %v9514_v60 = vrot.slane %v7665_v59, 4 }
 0x220   : > { %v5207_v28 = vcombine.low %v535_v49, %v544_v13  ;;  %v5208_v15 = vcombine.high %v535_v49, %v544_v13  ;;  %1625 = vrot.lane.b32.xlu1 %v7468_v18, %s9576_s16  ;;  %1615 = vrot.lane.b32.xlu0 %v7471_v62, %s9576_s16  ;;  %vm9724_vm3 = vcmask 359424  }
 0x221   : > { %v1511_v10 = vsel %vm390_vm0, %v9722_v33, %v9512_v26  ;;  %v1502_v2 = vsel %vm390_vm0, %v9723_v58, %v9514_v60  ;;  %vm9725_vm11 = vmmov %vm9724_vm3 }
 0x222   : > { %3968 = vmatprep.subr.bf16.mxu0 %v5208_v15  ;;  %v1512_v16 = vsel %vm9724_vm3, %v7165_v45, %v1511_v10  ;;  %v1503_v38 = vsel %vm9725_vm11, %v7167_v39, %v1502_v2  ;;  %v7687_v7 = vpop.permute.xlu1 %446  ;;  %v7689_v13 = vpop.permute.xlu0 %436  ;;  %v9726_v45 = vld [vmem:[#allocation28_spill] sm:$0xff]  ;;  %vm9734_vm3 = vcmask 375808  }
 0x223   : > { %3969 = vmatpush1.bf16.msra.mxu0 %v5207_v28  ;;  %v9515_v49 = vrot.slane %v7687_v7, 4  ;;  %v9521_v33 = vrot.slane %v7689_v13, 4  ;;  %v5333_v26 = vcombine.low %v1503_v38, %v1512_v16  ;;  %v5334_v52 = vcombine.high %v1503_v38, %v1512_v16  ;;  %v9728_v28 = vld [vmem:[#allocation29_spill] sm:$0xff]  ;;  %vm9735_vm11 = vmmov %vm9734_vm3 }
 0x224   : > { %1140 = vrot.lane.b32.xlu1 %v7544_v5, %s9647_s9  ;;  %1130 = vrot.lane.b32.xlu0 %v7549_v57, %s9647_s9  ;;  %v9727_v39 = vrot.slane %v9726_v45, 4  ;;  %v9729_v10 = vrot.slane %v9728_v28, 4 }
 0x225   : > { %4025 = vmatprep.subr.bf16.mxu1 %v5334_v52  ;;  %v9732_v52 = vrot.slane %v7215_v11, 4 }
 0x226   : > { %v474_v15 = vsel %vm390_vm0, %v9727_v39, %v9515_v49  ;;  %v465_v58 = vsel %vm390_vm0, %v9729_v10, %v9521_v33  ;;  %v7711_v38 = vpop.permute.xlu1 %1414  ;;  %v7713_v60 = vpop.permute.xlu0 %1404  ;;  %4026 = vmatpush1.bf16.msra.mxu1 %v5333_v26  ;;  %v9733_v26 = vrot.slane %v7217_v56, 4 }
 0x227   : > { %v475_v2 = vsel %vm461_vm14, %v9726_v45, %v474_v15  ;;  %v466_v16 = vsel %vm461_vm14, %v9728_v28, %v465_v58  ;;  %9730 = vst [vmem:[#allocation28_spill] sm:$0xff] %v7711_v38  ;;  %9731 = vst [vmem:[#allocation29_spill] sm:$0xff] %v7713_v60  ;;  %v9520_v39 = vrot.slane %v7711_v38, 4  ;;  %v9522_v49 = vrot.slane %v7713_v60, 4 }
 0x228   : > { %v5198_v59 = vcombine.low %v466_v16, %v475_v2  ;;  %v5199_v34 = vcombine.high %v466_v16, %v475_v2  ;;  %1556 = vrot.lane.b32.xlu1 %v7468_v18, %s9577_s22  ;;  %1546 = vrot.lane.b32.xlu0 %v7471_v62, %s9577_s22 }
 0x229   : > { %v1442_v45 = vsel %vm390_vm0, %v9732_v52, %v9520_v39  ;;  %v1433_v15 = vsel %vm390_vm0, %v9733_v26, %v9522_v49 }
 0x22a   : > { %3970 = vmatprep.subr.bf16.mxu0 %v5199_v34  ;;  %v1443_v28 = vsel %vm9734_vm3, %v7215_v11, %v1442_v45  ;;  %v1434_v10 = vsel %vm9735_vm11, %v7217_v56, %v1433_v15  ;;  %v7735_v58 = vpop.permute.xlu1 %376  ;;  %v7737_v2 = vpop.permute.xlu0 %366  ;;  %v9736_v56 = vld [vmem:[#allocation30_spill] sm:$0xff]  ;;  %vm9743_vm3 = vcmask 97280  }
 0x22b   : > { %3971 = vmatpush1.bf16.msra.mxu0 %v5198_v59  ;;  %v9523_v16 = vrot.slane %v7735_v58, 4  ;;  %v9531_v52 = vrot.slane %v7737_v2, 4  ;;  %v5324_v39 = vcombine.low %v1434_v10, %v1443_v28  ;;  %v5325_v33 = vcombine.high %v1434_v10, %v1443_v28  ;;  %v9738_v59 = vld [vmem:[#allocation31_spill] sm:$0xff]  ;;  %vm9744_vm11 = vmmov %vm9743_vm3 }
 0x22c   : > { %1071 = vrot.lane.b32.xlu1 %v7544_v5, %s9654_s30  ;;  %1061 = vrot.lane.b32.xlu0 %v7549_v57, %s9654_s30  ;;  %v9737_v11 = vrot.slane %v9736_v56, 4  ;;  %v9739_v45 = vrot.slane %v9738_v59, 4  ;;  %s9933_s30 = sld [smem:[#allocation17_spill]] }
 0x22d   : > { %4027 = vmatprep.subr.bf16.mxu1 %v5325_v33  ;;  %v9741_v33 = vrot.slane %v7263_v43, 4 }
 0x22e   : > { %v405_v34 = vsel %vm390_vm0, %v9737_v11, %v9523_v16  ;;  %v396_v26 = vsel %vm390_vm0, %v9739_v45, %v9531_v52  ;;  %v7759_v10 = vpop.permute.xlu1 %2106  ;;  %v7761_v49 = vpop.permute.xlu0 %2096  ;;  %4028 = vmatpush1.bf16.msra.mxu1 %v5324_v39  ;;  %v9742_v39 = vrot.slane %v7265_v61, 4 }
 0x22f   : > { %v406_v15 = vsel %vm392_vm13, %v9736_v56, %v405_v34  ;;  %v397_v28 = vsel %vm392_vm13, %v9738_v59, %v396_v26  ;;  %9740 = vst [vmem:[#allocation30_spill] sm:$0xff] %v7761_v49  ;;  %v9530_v11 = vrot.slane %v7759_v10, 4  ;;  %v9536_v16 = vrot.slane %v7761_v49, 4 }
 0x230   : > { %v5189_v60 = vcombine.low %v397_v28, %v406_v15  ;;  %v5190_v38 = vcombine.high %v397_v28, %v406_v15  ;;  %1485 = vrot.lane.b32.xlu1 %v7544_v5, %s9578_s24  ;;  %1475 = vrot.lane.b32.xlu0 %v7549_v57, %s9578_s24  ;;  %v5614_v28 = vld [vmem:[#allocation2 + $0x10] ss:$36 sps:$4 sm:$0xff]   ;;  %s9930_s24 = sld [smem:[#allocation14_spill]] }
 0x231   : > { %v2134_v56 = vsel %vm390_vm0, %v9741_v33, %v9530_v11  ;;  %v2125_v34 = vsel %vm390_vm0, %v9742_v39, %v9536_v16 }
 0x232   : > { %3972 = vmatprep.subr.bf16.mxu0 %v5190_v38  ;;  %v2135_v59 = vsel %vm9743_vm3, %v7263_v43, %v2134_v56  ;;  %v2126_v45 = vsel %vm9744_vm11, %v7265_v61, %v2125_v34  ;;  %v7783_v26 = vpop.permute.xlu1 %2037  ;;  %v7785_v15 = vpop.permute.xlu0 %2027  ;;  %v9745_v43 = vrot.slane %v7311_v20, 4  ;;  %vm9747_vm3 = vcmask 113664   ;;  %p9934_p12 = scmp.ne.s32.totalorder %s9933_s30, 0 }
 0x233   : > { %3973 = vmatpush1.bf16.msra.mxu0 %v5189_v60  ;;  %v9534_v33 = vrot.slane %v7783_v26, 4  ;;  %v9535_v11 = vrot.slane %v7785_v15, 4  ;;  %v5414_v52 = vcombine.low %v2126_v45, %v2135_v59  ;;  %v5415_v49 = vcombine.high %v2126_v45, %v2135_v59  ;;  %vm9748_vm11 = vmmov %vm9747_vm3 }
 0x234   : > { %3974 = vmatprep.subr.bf16.mxu0 %v5616_v23  ;;  %1002 = vrot.lane.b32.xlu1 %v7544_v5, %s9661_s12  ;;  %v9746_v60 = vrot.slane %v7313_v48, 4 }
 0x235   : > { %992 = vrot.lane.b32.xlu0 %v7549_v57, %s9661_s12  ;;  %v2065_v61 = vsel %vm390_vm0, %v9745_v43, %v9534_v33  ;;  %4039 = vmatprep.subr.bf16.mxu1 %v5415_v49  ;;  %s5077_s12 = scalar_lea.sflag [#allocation6], %s9926_s23 }
 0x236   : > { %v2056_v38 = vsel %vm390_vm0, %v9746_v60, %v9535_v11  ;;  %v2066_v23 = vsel %vm9747_vm3, %v7311_v20, %v2065_v61  ;;  %v7807_v39 = vpop.permute.xlu1 %1345  ;;  %v7809_v34 = vpop.permute.xlu0 %1335  ;;  %4040 = vmatpush2.bf16.msra.mxu1 %v5414_v52  ;;  %v9749_v20 = vld [vmem:[#allocation32_spill] sm:$0xff]  ;;  %v9751_v52 = vld [vmem:[#allocation33_spill] sm:$0xff]  ;;  %vm9755_vm3 = vcmask 130048  }
 0x237   : > { %v2057_v56 = vsel %vm9748_vm11, %v7313_v48, %v2056_v38  ;;  %3975 = vmatpush1.bf16.msra.mxu0 %v5614_v28  ;;  %v9537_v59 = vrot.slane %v7807_v39, 4  ;;  %v1352_v45 = vrot.slane %v7809_v34, 4  ;;  %v9750_v48 = vrot.slane %v9749_v20, 4  ;;  %vm9756_vm11 = vmmov %vm9755_vm3 }
 0x238   : > { %v5405_v43 = vcombine.low %v2057_v56, %v2066_v23  ;;  %v5406_v33 = vcombine.high %v2057_v56, %v2066_v23  ;;  %1416 = vrot.lane.b32.xlu1 %v7544_v5, %s9581_s27  ;;  %v9752_v28 = vrot.slane %v9751_v52, 4 }
 0x239   : > { %1406 = vrot.lane.b32.xlu0 %v7549_v57, %s9581_s27  ;;  %v1373_v49 = vsel %vm390_vm0, %v9750_v48, %v9537_v59  ;;  %s5517_s27 = smul.u32 4608, %s9930_s24 }
 0x23a   : > { %v1364_v61 = vsel %vm390_vm0, %v9752_v28, %v1352_v45  ;;  %4041 = vmatprep.subr.bf16.mxu1 %v5406_v33  ;;  %v1374_v60 = vsel %vm1360_vm6, %v9749_v20, %v1373_v49  ;;  %v7831_v23 = vpop.permute.xlu1 %1968  ;;  %v7833_v56 = vpop.permute.xlu0 %1958  ;;  %v9753_v33 = vrot.slane %v7360_v63, 4 }
 0x23b   : > { %v1365_v38 = vsel %vm1360_vm6, %v9751_v52, %v1364_v61  ;;  %4042 = vmatpush2.bf16.msra.mxu1 %v5405_v43  ;;  %v9539_v48 = vrot.slane %v7831_v23, 4  ;;  %v9538_v11 = vrot.slane %v7833_v56, 4  ;;  %v9754_v43 = vrot.slane %v7362_v42, 4  ;;  %s9196_s15 = scalar_lea.hbm %s9931_s29, %s5517_s27 }
 0x23c   : > { %v5315_v16 = vcombine.low %v1365_v38, %v1374_v60  ;;  %v5316_v59 = vcombine.high %v1365_v38, %v1374_v60  ;;  %933 = vrot.lane.b32.xlu1 %v7544_v5, %s9668_s10 }
 0x23d   : > { %923 = vrot.lane.b32.xlu0 %v7549_v57, %s9668_s10  ;;  %v1996_v20 = vsel %vm390_vm0, %v9753_v33, %v9539_v48  ;;  %v1987_v49 = vsel %vm390_vm0, %v9754_v43, %v9538_v11 }
 0x23e   : > { %3976 = vmatprep.subr.bf16.mxu0 %v5316_v59  ;;  %v1997_v52 = vsel %vm9755_vm3, %v7360_v63, %v1996_v20  ;;  %v1988_v5 = vsel %vm9756_vm11, %v7362_v42, %v1987_v49  ;;  %v7855_v57 = vpop.permute.xlu1 %1276  ;;  %v7857_v28 = vpop.permute.xlu0 %1266  ;;  %v9757_v63 = vrot.slane %v6997_v25, 4  ;;  %vm9760_vm3 = vcmask 637952  }
 0x23f   : > { %3977 = vmatpush2.bf16.msra.mxu0 %v5315_v16  ;;  %v1288_v61 = vrot.slane %v7855_v57, 4  ;;  %v1283_v60 = vrot.slane %v7857_v28, 4  ;;  %v5396_v38 = vcombine.low %v1988_v5, %v1997_v52  ;;  %v5397_v33 = vcombine.high %v1988_v5, %v1997_v52  ;;  %vm9762_vm11 = vmmov %vm9760_vm3 }
 0x240   : > { %2108 = vrot.lane.b32.xlu1 %v7468_v18, %s9582_s28  ;;  %v9758_v16 = vrot.slane %v6999_v12, 4  ;;  %vm9763_vm9 = vmmov %vm9760_vm3 }
 0x241   : > { %2098 = vrot.lane.b32.xlu0 %v7471_v62, %s9582_s28  ;;  %v1304_v42 = vsel %vm390_vm0, %v9757_v63, %v1288_v61  ;;  %4043 = vmatprep.subr.bf16.mxu1 %v5397_v33  ;;  %v9759_v33 = vrot.slane %v7410_v19, 4  ;;  %vm9764_vm7 = vmmov %vm9760_vm3  ;;  %s5090_s28 = sshll.u32 %s9051_s14, 4  ;;  %s9203_s28 = int_to_ptr.vmem [resolvable:$true] %s5090_s28 }
 0x242   : > { %v1295_v59 = vsel %vm390_vm0, %v9758_v16, %v1283_v60  ;;  %v1305_v20 = vsel %vm1291_vm15, %v6997_v25, %v1304_v42  ;;  %v794_v49 = vpop.permute.xlu1 %793  ;;  %v784_v52 = vpop.permute.xlu0 %783  ;;  %4044 = vmatpush2.bf16.msra.mxu1 %v5396_v38  ;;  %s5704_s10 = scalar_lea.vmem %s9203_s28, 4608  ;;  %p5711_p5 = scmp.lt.s32.totalorder %s9203_s28, %s5709_s8 }
 0x243   : > { %v1296_v43 = vsel %vm1291_vm15, %v6999_v12, %v1295_v59  ;;  %v804_v5 = vrot.slane %v794_v49, 4  ;;  %v799_v11 = vrot.slane %v784_v52, 4  ;;  %v9761_v12 = vrot.slane %v7412_v54, 4  ;;  %p5705_p11 = scmp.ne.s32.totalorder %s9203_s28, %s5704_s10  ;;  %p5712_p7 = scmp.lt.s32.totalorder %s5710_s7, %s5704_s10 }
 0x244   : > { %v5306_v48 = vcombine.low %v1296_v43, %v1305_v20  ;;  %v5307_v63 = vcombine.high %v1296_v43, %v1305_v20  ;;  %862 = vrot.lane.b32.xlu1 %v6092_v8, %s9585_s0 }
 0x245   : > { %852 = vrot.lane.b32.xlu0 %v6095_v9, %s9585_s0  ;;  %v821_v25 = vsel %vm390_vm0, %v9759_v33, %v804_v5  ;;  %v823_v42 = vsel %vm9760_vm3, %v794_v49, %v804_v5  ;;  %v812_v38 = vsel %vm390_vm0, %v9761_v12, %v799_v11  ;;  %v814_v16 = vsel %vm9762_vm11, %v784_v52, %v799_v11  ;;  %p5706_p13 = pnand %p5705_p11, %p9934_p12  ;;  %p5713_p8 = por %p5712_p7, %p5711_p5 }
 0x246   : > { %3978 = vmatprep.subr.bf16.mxu0 %v5307_v63  ;;  %v822_v59 = vsel %vm9763_vm9, %v7410_v19, %v821_v25  ;;  %843 = vst [vmem:[#allocation2 + $0x23c] sm:$0xf] %v823_v42  ;;  %v813_v8 = vsel %vm9764_vm7, %v7412_v54, %v812_v38  ;;  %838 = vst [vmem:[#allocation2 + $0x218] sm:$0xf] %v814_v16  ;;  %v7895_v9 = vpop.permute.xlu1 %1207  ;;  %v7897_v20 = vpop.permute.xlu0 %1197  ;;  %4046 = vmatmul.mubr.bf16.vlgmr.msra.gmra.mxu1 %v7433_v40  ;;  %v9765_v19 = vrot.slane %v7045_v30, 4  ;;  %vm9767_vm7 = vcmask 572416  }
 0x247   : > { %3979 = vmatpush2.bf16.msra.mxu0 %v5306_v48  ;;  %v1219_v43 = vrot.slane %v7895_v9, 4  ;;  %v1214_v11 = vrot.slane %v7897_v20, 4  ;;  %v5245_v49 = vcombine.low %v813_v8, %v822_v59  ;;  %v5246_v52 = vcombine.high %v813_v8, %v822_v59  ;;  %5424 = vmatprep.mubr.msk.bf16.mxu1 %vm1360_vm6, %v7447_v27  ;;  %vm9768_vm9 = vmmov %vm9767_vm7  ;;  %p5707_p4 = pneg %p5706_p13 }
 0x248   : > { %2039 = vrot.lane.b32.xlu1 %v7468_v18, %s9587_s26  ;;  %v9766_v40 = vrot.slane %v7047_v31, 4  ;;  %v9769_v16 = vrot.slane %v7477_v55, 4  ;;  %vm9770_vm3 = vcmask 654336   ;;  %v9771_v8 = vrot.slane %v7479_v1, 4 }
 0x249   : > { %2029 = vrot.lane.b32.xlu0 %v7471_v62, %s9587_s26  ;;  %v1235_v54 = vsel %vm390_vm0, %v9765_v19, %v1219_v43  ;;  %4066 = vmatprep.subr.bf16.mxu1 %v5246_v52  ;;  %vm9772_vm11 = vmmov %vm9770_vm3  ;;  %p5714_p10 = pnand %p5713_p8, %p5707_p4 }
 0x24a   : > { %v1226_v48 = vsel %vm390_vm0, %v9766_v40, %v1214_v11  ;;  %v1236_v27 = vsel %vm9767_vm7, %v7045_v30, %v1235_v54  ;;  %v725_v63 = vpop.permute.xlu1 %724  ;;  %v715_v33 = vpop.permute.xlu0 %714  ;;  %4067 = vmatpush1.bf16.msra.mxu1 %v5245_v49  ;;  %v2439_v30 = vld [vmem:[%s9261_s2 + $0x10] sm:$0xff]  ;;  %vm9773_vm7 = vmmov %vm9770_vm3 }
 0x24b   : > { %v1227_v5 = vsel %vm9768_vm9, %v7047_v31, %v1226_v48  ;;  %v735_v25 = vrot.slane %v725_v63, 4  ;;  %v730_v42 = vrot.slane %v715_v33, 4  ;;  %vm9774_vm9 = vmmov %vm9770_vm3 }
 0x24c   : > { %v5297_v12 = vcombine.low %v1227_v5, %v1236_v27  ;;  %v5298_v38 = vcombine.high %v1227_v5, %v1236_v27  ;;  %1970 = vrot.lane.b32.xlu1 %v7468_v18, %s9591_s11  ;;  %v2440_v18 = vld [vmem:[%s9261_s2 + $0x18] sm:$0xff] }
 0x24d   : > { %1960 = vrot.lane.b32.xlu0 %v7471_v62, %s9591_s11  ;;  %v752_v31 = vsel %vm390_vm0, %v9769_v16, %v735_v25  ;;  %v754_v59 = vsel %vm9770_vm3, %v725_v63, %v735_v25  ;;  %v743_v49 = vsel %vm390_vm0, %v9771_v8, %v730_v42  ;;  %v745_v52 = vsel %vm9772_vm11, %v715_v33, %v730_v42  ;;  %v2438_v25 = vld [vmem:[%s9261_s2 + $0x8] sm:$0xff]  ;;  %s4930_s11 = sld [smem:[#allocation3]] }
 0x24e   : > { %3980 = vmatprep.subr.bf16.mxu0 %v5298_v38  ;;  %v753_v62 = vsel %vm9773_vm7, %v7477_v55, %v752_v31  ;;  %774 = vst [vmem:[#allocation2 + $0x1f4] sm:$0xf] %v754_v59  ;;  %v744_v19 = vsel %vm9774_vm9, %v7479_v1, %v743_v49  ;;  %769 = vst [vmem:[#allocation2 + $0x1d0] sm:$0xf] %v745_v52  ;;  %v7944_v54 = vpop.permute.xlu1 %1138  ;;  %v7946_v40 = vpop.permute.xlu0 %1128  ;;  %4056 = vmatmul.mubr.bf16.gmra.mxu1 %v7500_v46  ;;  %v9775_v55 = vrot.slane %v7093_v50, 4  ;;  %vm9777_vm3 = vcmask 588800  }
 0x24f   : > { %3981 = vmatpush2.bf16.msra.mxu0 %v5297_v12  ;;  %v1150_v48 = vrot.slane %v7944_v54, 4  ;;  %v1145_v27 = vrot.slane %v7946_v40, 4  ;;  %v5236_v5 = vcombine.low %v744_v19, %v753_v62  ;;  %v5237_v63 = vcombine.high %v744_v19, %v753_v62  ;;  %4098 = vmatprep.mubr.bf16.mxu1 %v7514_v37  ;;  %v2437_v37 = vld [vmem:[%s9261_s2] sm:$0xff]  ;;  %vm9778_vm11 = vmmov %vm9777_vm3 }
 0x250   : > { %2453 = vperm.xlu1 %5595, %v2439_v30   ;;  %v9776_v46 = vrot.slane %v7095_v17, 4  ;;  %v9779_v49 = vrot.slane %v7537_v6, 4  ;;  %vm9780_vm7 = vcmask 818176  }
 0x251   : > { %2458 = vperm.xlu0 %5594, %v2440_v18   ;;  %v1166_v1 = vsel %vm390_vm0, %v9775_v55, %v1150_v48  ;;  %4068 = vmatprep.subr.bf16.mxu1 %v5237_v63  ;;  %vm9782_vm9 = vmmov %vm9780_vm7 }
 0x252   : > { %v1157_v33 = vsel %vm390_vm0, %v9776_v46, %v1145_v27  ;;  %v1167_v42 = vsel %vm9777_vm3, %v7093_v50, %v1166_v1  ;;  %v656_v38 = vpop.permute.xlu1 %655  ;;  %v646_v30 = vpop.permute.xlu0 %645  ;;  %4069 = vmatpush1.bf16.msra.mxu1 %v5236_v5  ;;  %v9781_v50 = vrot.slane %v7539_v41, 4  ;;  %vm9783_vm3 = vmmov %vm9780_vm7 }
 0x253   : > { %v1158_v12 = vsel %vm9778_vm11, %v7095_v17, %v1157_v33  ;;  %v666_v16 = vrot.slane %v656_v38, 4  ;;  %v661_v31 = vrot.slane %v646_v30, 4  ;;  %vm9784_vm11 = vmmov %vm9783_vm3 }
 0x254   : > { %v5288_v59 = vcombine.low %v1158_v12, %v1167_v42  ;;  %v5289_v8 = vcombine.high %v1158_v12, %v1167_v42  ;;  %2448 = vperm.xlu1 %5595, %v2438_v25  }
 0x255   : > { %2443 = vperm.xlu0 %5594, %v2437_v37   ;;  %v683_v52 = vsel %vm390_vm0, %v9779_v49, %v666_v16  ;;  %v685_v18 = vsel %vm9780_vm7, %v656_v38, %v666_v16  ;;  %v674_v62 = vsel %vm390_vm0, %v9781_v50, %v661_v31  ;;  %v676_v17 = vsel %vm9782_vm9, %v646_v30, %v661_v31 }
 0x256   : > { %3982 = vmatprep.subr.bf16.mxu0 %v5289_v8  ;;  %v684_v19 = vsel %vm9783_vm3, %v7537_v6, %v683_v52  ;;  %705 = vst [vmem:[#allocation2 + $0x1ac] sm:$0xf] %v685_v18  ;;  %v675_v5 = vsel %vm9784_vm11, %v7539_v41, %v674_v62  ;;  %700 = vst [vmem:[#allocation2 + $0x188] sm:$0xf] %v676_v17  ;;  %v7984_v63 = vpop.permute.xlu1 %1069  ;;  %v7986_v55 = vpop.permute.xlu0 %1059  ;;  %v9785_v6 = vrot.slane %v7141_v0, 4  ;;  %v9786_v41 = vrot.slane %v7143_v44, 4 }
 0x257   : > { %3983 = vmatpush2.bf16.msra.mxu0 %v5288_v59  ;;  %v1081_v1 = vrot.slane %v7984_v63, 4  ;;  %v1076_v46 = vrot.slane %v7986_v55, 4  ;;  %v5227_v33 = vcombine.low %v675_v5, %v684_v19  ;;  %v5228_v25 = vcombine.high %v675_v5, %v684_v19 }
 0x258   : > { %v9787_v52 = vrot.slane %v7591_v24, 4  ;;  %vm9788_vm7 = vcmask 834560   ;;  %v9789_v62 = vrot.slane %v7593_v35, 4 }
 0x259   : > { %v1097_v37 = vsel %vm390_vm0, %v9785_v6, %v1081_v1  ;;  %v1088_v42 = vsel %vm390_vm0, %v9786_v41, %v1076_v46  ;;  %4070 = vmatprep.subr.bf16.mxu1 %v5228_v25  ;;  %vm9790_vm9 = vmmov %vm9788_vm7 }
 0x25a   : > { %v1098_v12 = vsel %vm1084_vm5, %v7141_v0, %v1097_v37  ;;  %v1089_v38 = vsel %vm1084_vm5, %v7143_v44, %v1088_v42  ;;  %v587_v30 = vpop.permute.xlu1 %586  ;;  %v577_v16 = vpop.permute.xlu0 %576  ;;  %4071 = vmatpush1.bf16.msra.mxu1 %v5227_v33  ;;  %vm9791_vm3 = vmmov %vm9788_vm7 }
 0x25b   : > { %v597_v31 = vrot.slane %v587_v30, 4  ;;  %v592_v59 = vrot.slane %v577_v16, 4  ;;  %v5279_v8 = vcombine.low %v1089_v38, %v1098_v12  ;;  %v5280_v49 = vcombine.high %v1089_v38, %v1098_v12  ;;  %vm9792_vm11 = vmmov %vm9791_vm3 }
 0x25d   : > { %v614_v18 = vsel %vm390_vm0, %v9787_v52, %v597_v31  ;;  %v616_v50 = vsel %vm9788_vm7, %v587_v30, %v597_v31  ;;  %v605_v0 = vsel %vm390_vm0, %v9789_v62, %v592_v59  ;;  %v607_v17 = vsel %vm9790_vm9, %v577_v16, %v592_v59  ;;  %3984 = vmatprep.subr.bf16.mxu0 %v5280_v49 }
 0x25e   : > { %v615_v44 = vsel %vm9791_vm3, %v7591_v24, %v614_v18  ;;  %636 = vst [vmem:[#allocation2 + $0x164] sm:$0xf] %v616_v50  ;;  %v606_v19 = vsel %vm9792_vm11, %v7593_v35, %v605_v0  ;;  %631 = vst [vmem:[#allocation2 + $0x140] sm:$0xf] %v607_v17  ;;  %v8016_v5 = vpop.permute.xlu1 %1000  ;;  %v8018_v33 = vpop.permute.xlu0 %990  ;;  %3985 = vmatpush2.bf16.msra.mxu0 %v5279_v8  ;;  %v9793_v24 = vrot.slane %v7189_v21, 4  ;;  %v9794_v35 = vrot.slane %v7191_v36, 4 }
 0x25f   : > { %v1012_v25 = vrot.slane %v8016_v5, 4  ;;  %v1007_v6 = vrot.slane %v8018_v33, 4  ;;  %v5218_v37 = vcombine.low %v606_v19, %v615_v44  ;;  %v5219_v41 = vcombine.high %v606_v19, %v615_v44 }
 0x260   : > { %v9795_v18 = vrot.slane %v7639_v32, 4  ;;  %vm9796_vm7 = vcmask 850944   ;;  %v9797_v0 = vrot.slane %v7641_v22, 4 }
 0x261   : > { %v1028_v42 = vsel %vm390_vm0, %v9793_v24, %v1012_v25  ;;  %v1019_v12 = vsel %vm390_vm0, %v9794_v35, %v1007_v6  ;;  %4072 = vmatprep.subr.bf16.mxu1 %v5219_v41  ;;  %vm9798_vm9 = vmmov %vm9796_vm7 }
 0x262   : > { %v1029_v38 = vsel %vm1015_vm8, %v7189_v21, %v1028_v42  ;;  %v1020_v30 = vsel %vm1015_vm8, %v7191_v36, %v1019_v12  ;;  %v518_v16 = vpop.permute.xlu1 %517  ;;  %v508_v31 = vpop.permute.xlu0 %507  ;;  %4073 = vmatpush1.bf16.msra.mxu1 %v5218_v37  ;;  %vm9799_vm3 = vmmov %vm9796_vm7 }
 0x263   : > { %v528_v59 = vrot.slane %v518_v16, 4  ;;  %v523_v8 = vrot.slane %v508_v31, 4  ;;  %v5270_v49 = vcombine.low %v1020_v30, %v1029_v38  ;;  %v5271_v52 = vcombine.high %v1020_v30, %v1029_v38  ;;  %vm9800_vm11 = vmmov %vm9799_vm3 }
 0x265   : > { %v545_v50 = vsel %vm390_vm0, %v9795_v18, %v528_v59  ;;  %v547_v62 = vsel %vm9796_vm7, %v518_v16, %v528_v59  ;;  %v536_v21 = vsel %vm390_vm0, %v9797_v0, %v523_v8  ;;  %v538_v17 = vsel %vm9798_vm9, %v508_v31, %v523_v8  ;;  %3986 = vmatprep.subr.bf16.mxu0 %v5271_v52 }
 0x266   : > { %v546_v36 = vsel %vm9799_vm3, %v7639_v32, %v545_v50  ;;  %567 = vst [vmem:[#allocation2 + $0x11c] sm:$0xf] %v547_v62  ;;  %v537_v44 = vsel %vm9800_vm11, %v7641_v22, %v536_v21  ;;  %562 = vst [vmem:[#allocation2 + $0xf8] sm:$0xf] %v538_v17  ;;  %v8048_v19 = vpop.permute.xlu1 %931  ;;  %v8050_v37 = vpop.permute.xlu0 %921  ;;  %3987 = vmatpush2.bf16.msra.mxu0 %v5270_v49  ;;  %v9801_v32 = vrot.slane %v7239_v4, 4  ;;  %v9802_v22 = vrot.slane %v7241_v47, 4 }
 0x267   : > { %v943_v41 = vrot.slane %v8048_v19, 4  ;;  %v938_v24 = vrot.slane %v8050_v37, 4  ;;  %v5209_v42 = vcombine.low %v537_v44, %v546_v36  ;;  %v5210_v35 = vcombine.high %v537_v44, %v546_v36 }
 0x268   : > { %v9803_v50 = vrot.slane %v7687_v7, 4  ;;  %v9804_v21 = vrot.slane %v7689_v13, 4  ;;  %vm9833_vm3 = vcmask 506880  }
 0x269   : > { %v959_v12 = vsel %vm390_vm0, %v9801_v32, %v943_v41  ;;  %v950_v38 = vsel %vm390_vm0, %v9802_v22, %v938_v24  ;;  %4074 = vmatprep.subr.bf16.mxu1 %v5210_v35  ;;  %vm9836_vm11 = vmmov %vm9833_vm3 }
 0x26a   : > { %v960_v30 = vsel %vm946_vm10, %v7239_v4, %v959_v12  ;;  %v951_v16 = vsel %vm946_vm10, %v7241_v47, %v950_v38  ;;  %v449_v31 = vpop.permute.xlu1 %448  ;;  %v439_v59 = vpop.permute.xlu0 %438  ;;  %4075 = vmatpush1.bf16.msra.mxu1 %v5209_v42 }
 0x26b   : > { %v459_v8 = vrot.slane %v449_v31, 4  ;;  %v454_v49 = vrot.slane %v439_v59, 4  ;;  %v5261_v52 = vcombine.low %v951_v16, %v960_v30  ;;  %v5262_v18 = vcombine.high %v951_v16, %v960_v30 }
 0x26d   : > { %v476_v62 = vsel %vm390_vm0, %v9803_v50, %v459_v8  ;;  %v478_v0 = vsel %vm461_vm14, %v449_v31, %v459_v8  ;;  %v467_v4 = vsel %vm390_vm0, %v9804_v21, %v454_v49  ;;  %v469_v17 = vsel %vm461_vm14, %v439_v59, %v454_v49  ;;  %3988 = vmatprep.subr.bf16.mxu0 %v5262_v18 }
 0x26e   : > { %v477_v47 = vsel %vm461_vm14, %v7687_v7, %v476_v62  ;;  %498 = vst [vmem:[#allocation2 + $0xd4] sm:$0xf] %v478_v0  ;;  %v468_v36 = vsel %vm461_vm14, %v7689_v13, %v467_v4  ;;  %493 = vst [vmem:[#allocation2 + $0xb0] sm:$0xf] %v469_v17  ;;  %v8080_v44 = vpop.permute.xlu1 %860  ;;  %v8082_v42 = vpop.permute.xlu0 %850  ;;  %3989 = vmatpush2.bf16.msra.mxu0 %v5261_v52  ;;  %v9805_v7 = vrot.slane %v7287_v29, 4  ;;  %v9806_v13 = vrot.slane %v7289_v14, 4 }
 0x26f   : > { %v872_v35 = vrot.slane %v8080_v44, 4  ;;  %v867_v32 = vrot.slane %v8082_v42, 4  ;;  %v5200_v12 = vcombine.low %v468_v36, %v477_v47  ;;  %v5201_v22 = vcombine.high %v468_v36, %v477_v47 }
 0x270   : > { %v9807_v62 = vrot.slane %v7735_v58, 4  ;;  %v9808_v4 = vrot.slane %v7737_v2, 4  ;;  %vm9827_vm14 = vcmask 572416  }
 0x271   : > { %v888_v38 = vsel %vm390_vm0, %v9805_v7, %v872_v35  ;;  %v879_v30 = vsel %vm390_vm0, %v9806_v13, %v867_v32  ;;  %4076 = vmatprep.subr.bf16.mxu1 %v5201_v22  ;;  %vm9829_vm7 = vmmov %vm9827_vm14 }
 0x272   : > { %v889_v16 = vsel %vm875_vm12, %v7287_v29, %v888_v38  ;;  %v880_v31 = vsel %vm875_vm12, %v7289_v14, %v879_v30  ;;  %v379_v59 = vpop.permute.xlu1 %378  ;;  %v369_v8 = vpop.permute.xlu0 %368  ;;  %4077 = vmatpush1.bf16.msra.mxu1 %v5200_v12  ;;  %v5619_v30 = vld [vmem:[#allocation2 + $0x1c] ss:$36 sps:$4 sm:$0xff]   ;;  %vm9830_vm9 = vmmov %vm9829_vm7 }
 0x273   : > { %v389_v49 = vrot.slane %v379_v59, 4  ;;  %v384_v52 = vrot.slane %v369_v8, 4  ;;  %v5252_v18 = vcombine.low %v880_v31, %v889_v16  ;;  %v5253_v50 = vcombine.high %v880_v31, %v889_v16 }
 0x274   : > { %v9809_v16 = vrot.slane %v7335_v51, 4 }
 0x275   : > { %v407_v0 = vsel %vm390_vm0, %v9807_v62, %v389_v49  ;;  %v409_v21 = vsel %vm392_vm13, %v379_v59, %v389_v49  ;;  %v398_v29 = vsel %vm390_vm0, %v9808_v4, %v384_v52  ;;  %v400_v17 = vsel %vm392_vm13, %v369_v8, %v384_v52  ;;  %3990 = vmatprep.subr.bf16.mxu0 %v5253_v50  ;;  %v8123_v49 = vld [vmem:[%s9260_s1] ss:$16 sps:$4 sm:$0xff]  }
 0x276   : > { %v408_v14 = vsel %vm392_vm13, %v7735_v58, %v407_v0  ;;  %429 = vst [vmem:[#allocation2 + $0x8c] sm:$0xf] %v409_v21  ;;  %v399_v47 = vsel %vm392_vm13, %v7737_v2, %v398_v29  ;;  %424 = vst [vmem:[#allocation2 + $0x68] sm:$0xf] %v400_v17  ;;  %v1902_v36 = vpop.permute.xlu1 %1901  ;;  %v1892_v12 = vpop.permute.xlu0 %1891  ;;  %3991 = vmatpush2.bf16.msra.mxu0 %v5252_v18  ;;  %v9810_v58 = vrot.slane %v7337_v53, 4 }
 0x277   : > { %v1912_v22 = vrot.slane %v1902_v36, 4  ;;  %v1907_v7 = vrot.slane %v1892_v12, 4  ;;  %v5191_v38 = vcombine.low %v399_v47, %v408_v14  ;;  %v5192_v13 = vcombine.high %v399_v47, %v408_v14  ;;  %v8133_v0 = vld [vmem:[%s9260_s1 + $0x24] ss:$16 sps:$4 sm:$0xff]   ;;  %v5617_v17 = vld [vmem:[#allocation2 + $0x18] ss:$36 sps:$4 sm:$0xff]  }
 0x279   : > { %v1929_v31 = vsel %vm390_vm0, %v9809_v16, %v1912_v22  ;;  %v1931_v59 = vsel %vm1914_vm1, %v1902_v36, %v1912_v22  ;;  %v1920_v8 = vsel %vm390_vm0, %v9810_v58, %v1907_v7  ;;  %v1922_v2 = vsel %vm1914_vm1, %v1892_v12, %v1907_v7  ;;  %3993 = vmatmul.mubr.bf16.vlgmr.msra.gmra.mxu0 %v8123_v49  ;;  %v9812_v36 = vld [vmem:[#allocation34_spill] sm:$0xff] }
 0x27a   : > { %v1930_v52 = vsel %vm1914_vm1, %v7335_v51, %v1929_v31  ;;  %1951 = vst [vmem:[#allocation2 + $0x6bc] sm:$0xf] %v1931_v59  ;;  %v1921_v18 = vsel %vm1914_vm1, %v7337_v53, %v1920_v8  ;;  %1946 = vst [vmem:[#allocation2 + $0x698] sm:$0xf] %v1922_v2  ;;  %v1833_v50 = vpop.permute.xlu1 %1832  ;;  %v1823_v62 = vpop.permute.xlu0 %1822  ;;  %4078 = vmatprep.subr.bf16.mxu1 %v5192_v13  ;;  %4002 = vmatprep.mubr.bf16.mxu0 %v8133_v0  ;;  %v9811_v53 = vrot.slane %v7385_v3, 4  ;;  %vm9821_vm1 = vcmask 490496  }
 0x27b   : > { %v1843_v21 = vrot.slane %v1833_v50, 4  ;;  %v1838_v4 = vrot.slane %v1823_v62, 4  ;;  %4079 = vmatpush1.bf16.msra.mxu1 %v5191_v38  ;;  %v5389_v29 = vcombine.low %v1921_v18, %v1930_v52  ;;  %v5390_v51 = vcombine.high %v1921_v18, %v1930_v52  ;;  %vm9826_vm13 = vmmov %vm9821_vm1 }
 0x27c   : > { %4080 = vmatprep.subr.bf16.mxu1 %v5619_v30  ;;  %v9813_v12 = vrot.slane %v9812_v36, 4  ;;  %v9814_v2 = vrot.slane %v7807_v39, 4 }
 0x27d   : > { %v1860_v14 = vsel %vm390_vm0, %v9811_v53, %v1843_v21  ;;  %v1862_v47 = vsel %vm1845_vm2, %v1833_v50, %v1843_v21  ;;  %v1853_v7 = vsel %vm1845_vm2, %v1823_v62, %v1838_v4  ;;  %4119 = vmatprep.subr.bf16.mxu0 %v5390_v51  ;;  %v8159_v62 = vld [vmem:[%s9260_s1 + $0x20] ss:$16 sps:$4 sm:$0xff]  }
 0x27e   : > { %v1851_v22 = vsel %vm390_vm0, %v9813_v12, %v1838_v4  ;;  %v1861_v38 = vsel %vm1845_vm2, %v7385_v3, %v1860_v14  ;;  %1882 = vst [vmem:[#allocation2 + $0x674] sm:$0xf] %v1862_v47  ;;  %1877 = vst [vmem:[#allocation2 + $0x650] sm:$0xf] %v1853_v7  ;;  %v1348_v30 = vpop.permute.xlu1 %1347  ;;  %v1338_v16 = vpop.permute.xlu0 %1337  ;;  %4120 = vmatpush1.bf16.msra.mxu0 %v5389_v29  ;;  %v9815_v47 = vld [vmem:[#allocation35_spill] sm:$0xff] }
 0x27f   : > { %v1852_v13 = vsel %vm1845_vm2, %v9812_v36, %v1851_v22  ;;  %v1358_v31 = vrot.slane %v1348_v30, 4  ;;  %v1353_v59 = vrot.slane %v1338_v16, 4  ;;  %4081 = vmatpush1.bf16.msra.mxu1 %v5617_v17  ;;  %v9816_v36 = vrot.slane %v9815_v47, 4  ;;  %v9817_v22 = vld [vmem:[#allocation36_spill] sm:$0xff]  ;;  %vm9824_vm2 = vmmov %vm9821_vm1 }
 0x280   : > { %v5380_v58 = vcombine.low %v1852_v13, %v1861_v38  ;;  %v5381_v8 = vcombine.high %v1852_v13, %v1861_v38  ;;  %v9818_v7 = vrot.slane %v9817_v22, 4 }
 0x281   : > { %v1375_v52 = vsel %vm390_vm0, %v9814_v2, %v1358_v31  ;;  %v1377_v18 = vsel %vm1360_vm6, %v1348_v30, %v1358_v31  ;;  %v1366_v3 = vsel %vm390_vm0, %v1352_v45, %v1353_v59  ;;  %v1368_v50 = vsel %vm1360_vm6, %v1338_v16, %v1353_v59  ;;  %4003 = vmatmul.mubr.bf16.gmra.mxu0 %v8159_v62  ;;  %v8169_v45 = vld [vmem:[%s9260_s1 + $0xc] ss:$16 sps:$4 sm:$0xff]  }
 0x282   : > { %v1376_v21 = vsel %vm1360_vm6, %v7807_v39, %v1375_v52  ;;  %1397 = vst [vmem:[#allocation2 + $0x47c] sm:$0xf] %v1377_v18  ;;  %v1367_v4 = vsel %vm1360_vm6, %v7809_v34, %v1366_v3  ;;  %1392 = vst [vmem:[#allocation2 + $0x458] sm:$0xf] %v1368_v50  ;;  %v1764_v29 = vpop.permute.xlu1 %1763  ;;  %v1754_v51 = vpop.permute.xlu0 %1753  ;;  %4121 = vmatprep.subr.bf16.mxu0 %v5381_v8  ;;  %5425 = vmatprep.mubr.msk.bf16.mxu0 %vm1360_vm6, %v8169_v45 }
 0x283   : > { %v1774_v17 = vrot.slane %v1764_v29, 4  ;;  %v1769_v53 = vrot.slane %v1754_v51, 4  ;;  %4122 = vmatpush1.bf16.msra.mxu0 %v5380_v58  ;;  %v5317_v39 = vcombine.low %v1367_v4, %v1376_v21  ;;  %v5318_v14 = vcombine.high %v1367_v4, %v1376_v21 }
 0x285   : > { %v1791_v34 = vsel %vm390_vm0, %v9816_v36, %v1774_v17  ;;  %v1793_v12 = vsel %vm1776_vm4, %v1764_v29, %v1774_v17  ;;  %v1782_v38 = vsel %vm390_vm0, %v9818_v7, %v1769_v53  ;;  %v1784_v13 = vsel %vm1776_vm4, %v1754_v51, %v1769_v53  ;;  %4082 = vmatprep.subr.bf16.mxu1 %v5318_v14 }
 0x286   : > { %v1792_v30 = vsel %vm1776_vm4, %v9815_v47, %v1791_v34  ;;  %1813 = vst [vmem:[#allocation2 + $0x62c] sm:$0xf] %v1793_v12  ;;  %v1783_v16 = vsel %vm1776_vm4, %v9817_v22, %v1782_v38  ;;  %1808 = vst [vmem:[#allocation2 + $0x608] sm:$0xf] %v1784_v13  ;;  %v1279_v31 = vpop.permute.xlu1 %1278  ;;  %v1269_v59 = vpop.permute.xlu0 %1268  ;;  %4083 = vmatpush2.bf16.msra.mxu1 %v5317_v39  ;;  %v9819_v47 = vld [vmem:[#allocation20_spill] sm:$0xff]  ;;  %v9822_v12 = vld [vmem:[#allocation21_spill] sm:$0xff] }
 0x287   : > { %v1289_v58 = vrot.slane %v1279_v31, 4  ;;  %v1284_v8 = vrot.slane %v1269_v59, 4  ;;  %v5371_v2 = vcombine.low %v1783_v16, %v1792_v30  ;;  %v5372_v52 = vcombine.high %v1783_v16, %v1792_v30  ;;  %vm9825_vm4 = vmmov %vm9821_vm1 }
 0x289   : > { %v1306_v18 = vsel %vm390_vm0, %v1288_v61, %v1289_v58  ;;  %v1308_v3 = vsel %vm1291_vm15, %v1279_v31, %v1289_v58  ;;  %v1297_v50 = vsel %vm390_vm0, %v1283_v60, %v1284_v8  ;;  %v1299_v21 = vsel %vm1291_vm15, %v1269_v59, %v1284_v8  ;;  %4123 = vmatprep.subr.bf16.mxu0 %v5372_v52 }
 0x28a   : > { %v1307_v4 = vsel %vm1291_vm15, %v7855_v57, %v1306_v18  ;;  %1328 = vst [vmem:[#allocation2 + $0x434] sm:$0xf] %v1308_v3  ;;  %v1298_v29 = vsel %vm1291_vm15, %v7857_v28, %v1297_v50  ;;  %1323 = vst [vmem:[#allocation2 + $0x410] sm:$0xf] %v1299_v21  ;;  %v1695_v51 = vpop.permute.xlu1 %1694  ;;  %v1685_v17 = vpop.permute.xlu0 %1684  ;;  %4124 = vmatpush1.bf16.msra.mxu0 %v5371_v2  ;;  %v9820_v60 = vrot.slane %v9819_v47, 4  ;;  %v9823_v57 = vrot.slane %v9822_v12, 4 }
 0x28b   : > { %v1705_v61 = vrot.slane %v1695_v51, 4  ;;  %v1700_v53 = vrot.slane %v1685_v17, 4  ;;  %v5308_v39 = vcombine.low %v1298_v29, %v1307_v4  ;;  %v5309_v14 = vcombine.high %v1298_v29, %v1307_v4  ;;  %vm9828_vm15 = vmmov %vm9827_vm14 }
 0x28d   : > { %v1722_v36 = vsel %vm390_vm0, %v9820_v60, %v1705_v61  ;;  %v1724_v34 = vsel %vm9821_vm1, %v1695_v51, %v1705_v61  ;;  %v1713_v22 = vsel %vm390_vm0, %v9823_v57, %v1700_v53  ;;  %v1715_v28 = vsel %vm9824_vm2, %v1685_v17, %v1700_v53  ;;  %4084 = vmatprep.subr.bf16.mxu1 %v5309_v14  ;;  %v9831_v61 = vld [vmem:[#allocation22_spill] sm:$0xff]  ;;  %v9834_v14 = vld [vmem:[#allocation23_spill] sm:$0xff]  ;;  %vm9837_vm1 = vmmov %vm9833_vm3 }
 0x28e   : > { %v1723_v7 = vsel %vm9825_vm4, %v9819_v47, %v1722_v36  ;;  %1744 = vst [vmem:[#allocation2 + $0x5e4] sm:$0xf] %v1724_v34  ;;  %v1714_v38 = vsel %vm9826_vm13, %v9822_v12, %v1713_v22  ;;  %1739 = vst [vmem:[#allocation2 + $0x5c0] sm:$0xf] %v1715_v28  ;;  %v1210_v13 = vpop.permute.xlu1 %1209  ;;  %v1200_v30 = vpop.permute.xlu0 %1199  ;;  %4085 = vmatpush2.bf16.msra.mxu1 %v5308_v39  ;;  %vm9839_vm4 = vcmask 588800  }
 0x28f   : > { %v1220_v16 = vrot.slane %v1210_v13, 4  ;;  %v1215_v31 = vrot.slane %v1200_v30, 4  ;;  %v5362_v59 = vcombine.low %v1714_v38, %v1723_v7  ;;  %v5363_v58 = vcombine.high %v1714_v38, %v1723_v7  ;;  %vm9838_vm2 = vmmov %vm9837_vm1 }
 0x290   : > { %vm9840_vm13 = vmmov %vm9839_vm4 }
 0x291   : > { %v1237_v8 = vsel %vm390_vm0, %v1219_v43, %v1220_v16  ;;  %v1239_v2 = vsel %vm9827_vm14, %v1210_v13, %v1220_v16  ;;  %v1228_v52 = vsel %vm390_vm0, %v1214_v11, %v1215_v31  ;;  %v1230_v18 = vsel %vm9828_vm15, %v1200_v30, %v1215_v31  ;;  %4125 = vmatprep.subr.bf16.mxu0 %v5363_v58  ;;  %vm9841_vm14 = vmmov %vm9839_vm4 }
 0x292   : > { %v1238_v3 = vsel %vm9829_vm7, %v7895_v9, %v1237_v8  ;;  %1259 = vst [vmem:[#allocation2 + $0x3ec] sm:$0xf] %v1239_v2  ;;  %v1229_v50 = vsel %vm9830_vm9, %v7897_v20, %v1228_v52  ;;  %1254 = vst [vmem:[#allocation2 + $0x3c8] sm:$0xf] %v1230_v18  ;;  %v1626_v21 = vpop.permute.xlu1 %1625  ;;  %v1616_v4 = vpop.permute.xlu0 %1615  ;;  %4126 = vmatpush1.bf16.msra.mxu0 %v5362_v59  ;;  %v9832_v11 = vrot.slane %v9831_v61, 4  ;;  %v9835_v9 = vrot.slane %v9834_v14, 4 }
 0x293   : > { %v1636_v43 = vrot.slane %v1626_v21, 4  ;;  %v1631_v29 = vrot.slane %v1616_v4, 4  ;;  %v5299_v51 = vcombine.low %v1229_v50, %v1238_v3  ;;  %v5300_v17 = vcombine.high %v1229_v50, %v1238_v3  ;;  %vm9842_vm15 = vmmov %vm9839_vm4  ;;  %v9843_v3 = vld [vmem:[#allocation24_spill] sm:$0xff] }
 0x294   : > { %vm9845_vm7 = vcmask 523264  }
 0x295   : > { %v1653_v53 = vsel %vm390_vm0, %v9832_v11, %v1636_v43  ;;  %v1655_v39 = vsel %vm9833_vm3, %v1626_v21, %v1636_v43  ;;  %v1644_v47 = vsel %vm390_vm0, %v9835_v9, %v1631_v29  ;;  %v1646_v20 = vsel %vm9836_vm11, %v1616_v4, %v1631_v29  ;;  %4086 = vmatprep.subr.bf16.mxu1 %v5300_v17  ;;  %v9846_v4 = vld [vmem:[#allocation25_spill] sm:$0xff]  ;;  %vm9848_vm9 = vmmov %vm9845_vm7 }
 0x296   : > { %v1654_v60 = vsel %vm9837_vm1, %v9831_v61, %v1653_v53  ;;  %1675 = vst [vmem:[#allocation2 + $0x59c] sm:$0xf] %v1655_v39  ;;  %v1645_v36 = vsel %vm9838_vm2, %v9834_v14, %v1644_v47  ;;  %1670 = vst [vmem:[#allocation2 + $0x578] sm:$0xf] %v1646_v20  ;;  %v1141_v34 = vpop.permute.xlu1 %1140  ;;  %v1131_v12 = vpop.permute.xlu0 %1130  ;;  %4087 = vmatpush2.bf16.msra.mxu1 %v5299_v51  ;;  %vm9853_vm1 = vcmask 359424  }
 0x297   : > { %v1151_v57 = vrot.slane %v1141_v34, 4  ;;  %v1146_v22 = vrot.slane %v1131_v12, 4  ;;  %v5353_v28 = vcombine.low %v1645_v36, %v1654_v60  ;;  %v5354_v7 = vcombine.high %v1645_v36, %v1654_v60  ;;  %vm9849_vm3 = vmmov %vm9845_vm7 }
 0x298   : > { %vm9850_vm11 = vmmov %vm9849_vm3 }
 0x299   : > { %v1168_v38 = vsel %vm390_vm0, %v1150_v48, %v1151_v57  ;;  %v1170_v13 = vsel %vm9839_vm4, %v1141_v34, %v1151_v57  ;;  %v1159_v30 = vsel %vm390_vm0, %v1145_v27, %v1146_v22  ;;  %v1161_v16 = vsel %vm9840_vm13, %v1131_v12, %v1146_v22  ;;  %4127 = vmatprep.subr.bf16.mxu0 %v5354_v7  ;;  %vm9856_vm2 = vmmov %vm9853_vm1 }
 0x29a   : > { %v1169_v31 = vsel %vm9841_vm14, %v7944_v54, %v1168_v38  ;;  %1190 = vst [vmem:[#allocation2 + $0x3a4] sm:$0xf] %v1170_v13  ;;  %v1160_v59 = vsel %vm9842_vm15, %v7946_v40, %v1159_v30  ;;  %1185 = vst [vmem:[#allocation2 + $0x380] sm:$0xf] %v1161_v16  ;;  %v1557_v58 = vpop.permute.xlu1 %1556  ;;  %v1547_v8 = vpop.permute.xlu0 %1546  ;;  %4128 = vmatpush1.bf16.msra.mxu0 %v5353_v28  ;;  %v9844_v27 = vrot.slane %v9843_v3, 4  ;;  %v9847_v54 = vrot.slane %v9846_v4, 4 }
 0x29b   : > { %v1567_v48 = vrot.slane %v1557_v58, 4  ;;  %v1562_v2 = vrot.slane %v1547_v8, 4  ;;  %v5290_v52 = vcombine.low %v1160_v59, %v1169_v31  ;;  %v5291_v18 = vcombine.high %v1160_v59, %v1169_v31  ;;  %v9851_v38 = vld [vmem:[#allocation26_spill] sm:$0xff]  ;;  %v9854_v16 = vld [vmem:[#allocation27_spill] sm:$0xff]  ;;  %vm9858_vm4 = vmmov %vm9853_vm1 }
 0x29c   : > { %vm9861_vm13 = vcmask 375808  }
 0x29d   : > { %v1584_v50 = vsel %vm390_vm0, %v9844_v27, %v1567_v48  ;;  %v1586_v21 = vsel %vm9845_vm7, %v1557_v58, %v1567_v48  ;;  %v1575_v43 = vsel %vm390_vm0, %v9847_v54, %v1562_v2  ;;  %v1577_v40 = vsel %vm9848_vm9, %v1547_v8, %v1562_v2  ;;  %4088 = vmatprep.subr.bf16.mxu1 %v5291_v18  ;;  %vm9864_vm14 = vmmov %vm9861_vm13 }
 0x29e   : > { %v1585_v29 = vsel %vm9849_vm3, %v9843_v3, %v1584_v50  ;;  %1606 = vst [vmem:[#allocation2 + $0x554] sm:$0xf] %v1586_v21  ;;  %v1576_v51 = vsel %vm9850_vm11, %v9846_v4, %v1575_v43  ;;  %1601 = vst [vmem:[#allocation2 + $0x530] sm:$0xf] %v1577_v40  ;;  %v1072_v17 = vpop.permute.xlu1 %1071  ;;  %v1062_v61 = vpop.permute.xlu0 %1061  ;;  %4089 = vmatpush2.bf16.msra.mxu1 %v5290_v52  ;;  %vm9868_vm7 = vcmask 97280   ;;  %vm9875_vm11 = vcmask 113664  }
 0x29f   : > { %v1082_v11 = vrot.slane %v1072_v17, 4  ;;  %v1077_v53 = vrot.slane %v1062_v61, 4  ;;  %v5344_v39 = vcombine.low %v1576_v51, %v1585_v29  ;;  %v5345_v14 = vcombine.high %v1576_v51, %v1585_v29  ;;  %vm9871_vm9 = vmmov %vm9868_vm7 }
 0x2a0   : > { %vm9873_vm3 = vmmov %vm9868_vm7 }
 0x2a1   : > { %v1099_v9 = vsel %vm390_vm0, %v1081_v1, %v1082_v11  ;;  %v1101_v47 = vsel %vm1084_vm5, %v1072_v17, %v1082_v11  ;;  %v1090_v20 = vsel %vm390_vm0, %v1076_v46, %v1077_v53  ;;  %v1092_v60 = vsel %vm1084_vm5, %v1062_v61, %v1077_v53  ;;  %4129 = vmatprep.subr.bf16.mxu0 %v5345_v14  ;;  %v9859_v11 = vld [vmem:[#allocation28_spill] sm:$0xff]  ;;  %v9862_v14 = vld [vmem:[#allocation29_spill] sm:$0xff] }
 0x2a2   : > { %v1100_v36 = vsel %vm1084_vm5, %v7984_v63, %v1099_v9  ;;  %1121 = vst [vmem:[#allocation2 + $0x35c] sm:$0xf] %v1101_v47  ;;  %v1091_v34 = vsel %vm1084_vm5, %v7986_v55, %v1090_v20  ;;  %1116 = vst [vmem:[#allocation2 + $0x338] sm:$0xf] %v1092_v60  ;;  %v1486_v12 = vpop.permute.xlu1 %1485  ;;  %v1476_v57 = vpop.permute.xlu0 %1475  ;;  %4130 = vmatpush1.bf16.msra.mxu0 %v5344_v39  ;;  %v9852_v46 = vrot.slane %v9851_v38, 4  ;;  %v9855_v63 = vrot.slane %v9854_v16, 4 }
 0x2a3   : > { %v1496_v1 = vrot.slane %v1486_v12, 4  ;;  %v1491_v22 = vrot.slane %v1476_v57, 4  ;;  %v5281_v28 = vcombine.low %v1091_v34, %v1100_v36  ;;  %v5282_v7 = vcombine.high %v1091_v34, %v1100_v36  ;;  %vm9857_vm5 = vmmov %vm9853_vm1 }
 0x2a5   : > { %v1513_v13 = vsel %vm390_vm0, %v9852_v46, %v1496_v1  ;;  %v1515_v30 = vsel %vm9853_vm1, %v1486_v12, %v1496_v1  ;;  %v1504_v31 = vsel %vm390_vm0, %v9855_v63, %v1491_v22  ;;  %v1506_v55 = vsel %vm9856_vm2, %v1476_v57, %v1491_v22  ;;  %4090 = vmatprep.subr.bf16.mxu1 %v5282_v7  ;;  %vm9877_vm1 = vmmov %vm9875_vm11 }
 0x2a6   : > { %v1514_v59 = vsel %vm9857_vm5, %v9851_v38, %v1513_v13  ;;  %1535 = vst [vmem:[#allocation2 + $0x50c] sm:$0xf] %v1515_v30  ;;  %v1505_v58 = vsel %vm9858_vm4, %v9854_v16, %v1504_v31  ;;  %1530 = vst [vmem:[#allocation2 + $0x4e8] sm:$0xf] %v1506_v55  ;;  %v1003_v8 = vpop.permute.xlu1 %1002  ;;  %4091 = vmatpush2.bf16.msra.mxu1 %v5281_v28  ;;  %vm9882_vm5 = vcmask 130048  }
 0x2a7   : > { %v993_v48 = vpop.permute.xlu0 %992  ;;  %v1013_v2 = vrot.slane %v1003_v8, 4  ;;  %v5335_v18 = vcombine.low %v1505_v58, %v1514_v59  ;;  %v5336_v3 = vcombine.high %v1505_v58, %v1514_v59  ;;  %vm9879_vm2 = vmmov %vm9877_vm1 }
 0x2a8   : > { %v1008_v52 = vrot.slane %v993_v48, 4  ;;  %vm9884_vm4 = vmmov %vm9882_vm5 }
 0x2a9   : > { %v1030_v27 = vsel %vm390_vm0, %v1012_v25, %v1013_v2  ;;  %v1032_v50 = vsel %vm1015_vm8, %v1003_v8, %v1013_v2  ;;  %4131 = vmatprep.subr.bf16.mxu0 %v5336_v3  ;;  %v9869_v8 = vld [vmem:[#allocation30_spill] sm:$0xff] }
 0x2aa   : > { %v1021_v21 = vsel %vm390_vm0, %v1007_v6, %v1008_v52  ;;  %v1023_v4 = vsel %vm1015_vm8, %v993_v48, %v1008_v52  ;;  %v1031_v54 = vsel %vm1015_vm8, %v8016_v5, %v1030_v27  ;;  %1052 = vst [vmem:[#allocation2 + $0x314] sm:$0xf] %v1032_v50  ;;  %v1417_v40 = vpop.permute.xlu1 %1416  ;;  %4132 = vmatpush1.bf16.msra.mxu0 %v5335_v18  ;;  %v9860_v6 = vrot.slane %v9859_v11, 4 }
 0x2ab   : > { %v1022_v43 = vsel %vm1015_vm8, %v8018_v33, %v1021_v21  ;;  %1047 = vst [vmem:[#allocation2 + $0x2f0] sm:$0xf] %v1023_v4  ;;  %v1407_v29 = vpop.permute.xlu0 %1406  ;;  %v1427_v25 = vrot.slane %v1417_v40, 4  ;;  %v9863_v5 = vrot.slane %v9862_v14, 4  ;;  %vm9865_vm8 = vmmov %vm9861_vm13 }
 0x2ac   : > { %v1422_v51 = vrot.slane %v1407_v29, 4  ;;  %v5272_v17 = vcombine.low %v1022_v43, %v1031_v54  ;;  %v5273_v61 = vcombine.high %v1022_v43, %v1031_v54  ;;  %vm9866_vm15 = vmmov %vm9865_vm8 }
 0x2ad   : > { %v1444_v53 = vsel %vm390_vm0, %v9860_v6, %v1427_v25  ;;  %v1446_v39 = vsel %vm9861_vm13, %v1417_v40, %v1427_v25  ;;  %vm9885_vm13 = vmmov %vm9884_vm4 }
 0x2ae   : > { %v1435_v9 = vsel %vm390_vm0, %v9863_v5, %v1422_v51  ;;  %v1437_v33 = vsel %vm9864_vm14, %v1407_v29, %v1422_v51  ;;  %4092 = vmatprep.subr.bf16.mxu1 %v5273_v61  ;;  %v1445_v47 = vsel %vm9865_vm8, %v9859_v11, %v1444_v53  ;;  %1466 = vst [vmem:[#allocation2 + $0x4c4] sm:$0xf] %v1446_v39  ;;  %v934_v60 = vpop.permute.xlu1 %933  ;;  %vm9886_vm14 = vmmov %vm9884_vm4 }
 0x2af   : > { %v1436_v20 = vsel %vm9866_vm15, %v9862_v14, %v1435_v9  ;;  %1461 = vst [vmem:[#allocation2 + $0x4a0] sm:$0xf] %v1437_v33  ;;  %v924_v36 = vpop.permute.xlu0 %923  ;;  %4093 = vmatpush2.bf16.msra.mxu1 %v5272_v17  ;;  %v944_v34 = vrot.slane %v934_v60, 4 }
 0x2b0   : > { %v939_v12 = vrot.slane %v924_v36, 4  ;;  %v5326_v57 = vcombine.low %v1436_v20, %v1445_v47  ;;  %v5327_v1 = vcombine.high %v1436_v20, %v1445_v47 }
 0x2b1   : > { %v961_v22 = vsel %vm390_vm0, %v943_v41, %v944_v34  ;;  %v963_v28 = vsel %vm946_vm10, %v934_v60, %v944_v34 }
 0x2b2   : > { %v952_v7 = vsel %vm390_vm0, %v938_v24, %v939_v12  ;;  %v954_v38 = vsel %vm946_vm10, %v924_v36, %v939_v12  ;;  %4133 = vmatprep.subr.bf16.mxu0 %v5327_v1  ;;  %v962_v46 = vsel %vm946_vm10, %v8048_v19, %v961_v22  ;;  %983 = vst [vmem:[#allocation2 + $0x2cc] sm:$0xf] %v963_v28  ;;  %v2109_v30 = vpop.permute.xlu1 %2108  ;;  %v9867_v24 = vrot.slane %v7759_v10, 4 }
 0x2b3   : > { %v953_v13 = vsel %vm946_vm10, %v8050_v37, %v952_v7  ;;  %978 = vst [vmem:[#allocation2 + $0x2a8] sm:$0xf] %v954_v38  ;;  %v2099_v16 = vpop.permute.xlu0 %2098  ;;  %4134 = vmatpush1.bf16.msra.mxu0 %v5326_v57  ;;  %v2119_v41 = vrot.slane %v2109_v30, 4  ;;  %v9870_v19 = vrot.slane %v9869_v8, 4  ;;  %vm9872_vm10 = vmmov %vm9868_vm7  ;;  %v9880_v12 = vmov 0  }
 0x2b4   : > { %v2114_v63 = vrot.slane %v2099_v16, 4  ;;  %v5263_v31 = vcombine.low %v953_v13, %v962_v46  ;;  %v5264_v55 = vcombine.high %v953_v13, %v962_v46  ;;  %v5620_v57 = vld [vmem:[#allocation2 + $0x698] ss:$36 sps:$4 sm:$0xff]   ;;  %v9881_v1 = vrot.slane %v7831_v23, 4 }
 0x2b5   : > { %v2136_v59 = vsel %vm390_vm0, %v9867_v24, %v2119_v41  ;;  %v2138_v58 = vsel %vm9868_vm7, %v2109_v30, %v2119_v41  ;;  %v9883_v28 = vrot.slane %v7833_v56, 4  ;;  %v5622_v41 = vld [vmem:[#allocation2 + $0x458] ss:$36 sps:$4 sm:$0xff]  }
 0x2b6   : > { %v2127_v48 = vsel %vm390_vm0, %v9870_v19, %v2114_v63  ;;  %v2129_v37 = vsel %vm9871_vm9, %v2099_v16, %v2114_v63  ;;  %4094 = vmatprep.subr.bf16.mxu1 %v5264_v55  ;;  %v2137_v2 = vsel %vm9872_vm10, %v7759_v10, %v2136_v59  ;;  %2158 = vst [vmem:[#allocation2 + $0x794] sm:$0xf] %v2138_v58  ;;  %v863_v18 = vpop.permute.xlu1 %862  ;;  %v5621_v16 = vld [vmem:[#allocation2 + $0x650] ss:$36 sps:$4 sm:$0xff]   ;;  %v8374_v63 = vld [vmem:[%s9260_s1 + $0x8] ss:$16 sps:$4 sm:$0xff]  }
 0x2b7   : > { %v2128_v52 = vsel %vm9873_vm3, %v9869_v8, %v2127_v48  ;;  %2153 = vst [vmem:[#allocation2 + $0x770] sm:$0xf] %v2129_v37  ;;  %v853_v3 = vpop.permute.xlu0 %852  ;;  %4095 = vmatpush2.bf16.msra.mxu1 %v5263_v31  ;;  %v873_v27 = vrot.slane %v863_v18, 4  ;;  %v5625_v31 = vld [vmem:[#allocation2 + $0x410] ss:$36 sps:$4 sm:$0xff]  }
 0x2b8   : > { %v868_v50 = vrot.slane %v853_v3, 4  ;;  %v5416_v21 = vcombine.low %v2128_v52, %v2137_v2  ;;  %v5417_v4 = vcombine.high %v2128_v52, %v2137_v2  ;;  %v5627_v55 = vld [vmem:[#allocation2 + $0x5c0] ss:$36 sps:$4 sm:$0xff]   ;;  %v5673_v24 = vld [vmem:[%s9260_s1 + $0x2c] ss:$16 sps:$4 sm:$0xff]  }
 0x2b9   : > { %v890_v54 = vsel %vm390_vm0, %v872_v35, %v873_v27  ;;  %v892_v43 = vsel %vm875_vm12, %v863_v18, %v873_v27  ;;  %v5626_v59 = vld [vmem:[#allocation2 + $0x1d0] ss:$36 sps:$4 sm:$0xff]   ;;  %v5628_v58 = vld [vmem:[#allocation2 + $0x3c8] ss:$36 sps:$4 sm:$0xff]   ;;  %v5629_v8 = vld [vmem:[#allocation2 + $0x578] ss:$36 sps:$4 sm:$0xff]  }
 0x2ba   : > { %v881_v10 = vsel %vm390_vm0, %v867_v32, %v868_v50  ;;  %v883_v40 = vsel %vm875_vm12, %v853_v3, %v868_v50  ;;  %4145 = vmatprep.subr.bf16.mxu0 %v5417_v4  ;;  %v891_v29 = vsel %vm875_vm12, %v8080_v44, %v890_v54  ;;  %912 = vst [vmem:[#allocation2 + $0x284] sm:$0xf] %v892_v43  ;;  %v2040_v51 = vpop.permute.xlu1 %2039  ;;  %v9874_v32 = vrot.slane %v7783_v26, 4  ;;  %v5630_v19 = vld [vmem:[#allocation2 + $0x188] ss:$36 sps:$4 sm:$0xff]  }
 0x2bb   : > { %v882_v25 = vsel %vm875_vm12, %v8082_v42, %v881_v10  ;;  %907 = vst [vmem:[#allocation2 + $0x260] sm:$0xf] %v883_v40  ;;  %v2030_v17 = vpop.permute.xlu0 %2029  ;;  %4146 = vmatpush2.bf16.msra.mxu0 %v5416_v21  ;;  %v2050_v35 = vrot.slane %v2040_v51, 4  ;;  %v9876_v44 = vrot.slane %v7785_v15, 4  ;;  %vm9878_vm12 = vmmov %vm9877_vm1  ;;  %v5674_v48 = vld [vmem:[%s9260_s1 + $0x28] ss:$16 sps:$4 sm:$0xff]  }
 0x2bc   : > { %v2045_v61 = vrot.slane %v2030_v17, 4  ;;  %v5254_v11 = vcombine.low %v882_v25, %v891_v29  ;;  %v5255_v6 = vcombine.high %v882_v25, %v891_v29  ;;  %v5631_v37 = vld [vmem:[#allocation2 + $0x380] ss:$36 sps:$4 sm:$0xff]   ;;  %v5634_v18 = vld [vmem:[#allocation2 + $0x338] ss:$36 sps:$4 sm:$0xff]  }
 0x2bd   : > { %v2067_v53 = vsel %vm390_vm0, %v9874_v32, %v2050_v35  ;;  %v2069_v39 = vsel %vm9875_vm11, %v2040_v51, %v2050_v35  ;;  %v5633_v2 = vld [vmem:[#allocation2 + $0x140] ss:$36 sps:$4 sm:$0xff]   ;;  %v5636_v3 = vld [vmem:[#allocation2 + $0x4e8] ss:$36 sps:$4 sm:$0xff]   ;;  %v5635_v27 = vld [vmem:[#allocation2 + $0xf8] ss:$36 sps:$4 sm:$0xff]  }
 0x2be   : > { %v2058_v14 = vsel %vm390_vm0, %v9876_v44, %v2045_v61  ;;  %v2060_v42 = vsel %vm9877_vm1, %v2030_v17, %v2045_v61  ;;  %4096 = vmatprep.subr.bf16.mxu1 %v5255_v6  ;;  %v2068_v5 = vsel %vm9878_vm12, %v7783_v26, %v2067_v53  ;;  %2089 = vst [vmem:[#allocation2 + $0x74c] sm:$0xf] %v2069_v39  ;;  %v1971_v33 = vpop.permute.xlu1 %1970  ;;  %v5675_v52 = vld [vmem:[%s9260_s1 + $0x4] ss:$16 sps:$4 sm:$0xff]   ;;  %v5640_v54 = vld [vmem:[#allocation2 + $0x2a8] ss:$36 sps:$4 sm:$0xff]   ;;  %v3782_v17 = vpop.f32.mrf.mxu0 }
 0x2bf   : > { %v2059_v9 = vsel %vm9879_vm2, %v7785_v15, %v2058_v14  ;;  %2084 = vst [vmem:[#allocation2 + $0x728] sm:$0xf] %v2060_v42  ;;  %v1961_v47 = vpop.permute.xlu0 %1960  ;;  %4097 = vmatpush2.bf16.msra.mxu1 %v5254_v11  ;;  %v1981_v20 = vrot.slane %v1971_v33, 4  ;;  %v5637_v50 = vld [vmem:[#allocation2 + $0x2f0] ss:$36 sps:$4 sm:$0xff]   ;;  %v8402_v61 = vpop.f32.mrf.mxu1 }
 0x2c0   : > { %v1976_v60 = vrot.slane %v1961_v47, 4  ;;  %v5407_v36 = vcombine.low %v2059_v9, %v2068_v5  ;;  %v5408_v34 = vcombine.high %v2059_v9, %v2068_v5  ;;  %4221 = vmatprep.subr.bf16.mxu1 %v9880_v12  ;;  %v5639_v21 = vld [vmem:[#allocation2 + $0x4a0] ss:$36 sps:$4 sm:$0xff]   ;;  %v5638_v4 = vld [vmem:[#allocation2 + $0xb0] ss:$36 sps:$4 sm:$0xff]   ;;  %v3784_v35 = vpop.f32.mrf.mxu0 }
 0x2c1   : > { %v1998_v22 = vsel %vm390_vm0, %v9881_v1, %v1981_v20  ;;  %v2000_v26 = vsel %vm9882_vm5, %v1971_v33, %v1981_v20  ;;  %v5642_v43 = vld [vmem:[#allocation2 + $0x770] ss:$36 sps:$4 sm:$0xff]   ;;  %v5641_v10 = vld [vmem:[#allocation2 + $0x68] ss:$36 sps:$4 sm:$0xff]   ;;  %v5644_v29 = vld [vmem:[#allocation2 + $0x20] ss:$36 sps:$4 sm:$0xff]   ;;  %v8404_v6 = vpop.f32.mrf.mxu1 }
 0x2c2   : > { %v1989_v15 = vsel %vm390_vm0, %v9883_v28, %v1976_v60  ;;  %v1991_v7 = vsel %vm9884_vm4, %v1961_v47, %v1976_v60  ;;  %4099 = vmatmul.mubr.bf16.vlgmr.msra.gmra.mxu1 %v8123_v49  ;;  %v1999_v38 = vsel %vm9885_vm13, %v7831_v23, %v1998_v22  ;;  %2020 = vst [vmem:[#allocation2 + $0x704] sm:$0xf] %v2000_v26  ;;  %v5624_v23 = vld [vmem:[#allocation2 + $0x608] ss:$36 sps:$4 sm:$0xff]   ;;  %v5643_v40 = vld [vmem:[#allocation2 + $0x260] ss:$36 sps:$4 sm:$0xff]   ;;  %v3786_v11 = vpop.f32.mrf.mxu0 }
 0x2c3   : > { %v1990_v46 = vsel %vm9886_vm14, %v7833_v56, %v1989_v15  ;;  %2015 = vst [vmem:[#allocation2 + $0x6e0] sm:$0xf] %v1991_v7  ;;  %4147 = vmatprep.subr.bf16.mxu0 %v5408_v34  ;;  %4222 = vmatpush1.bf16.msra.mxu1 %v5620_v57  ;;  %v5623_v56 = vld [vmem:[#allocation2 + $0x218] ss:$36 sps:$4 sm:$0xff]   ;;  %v8406_v53 = vpop.f32.mrf.mxu1  ;;  %vm4399_vm0 = vcmask 261120  }
 0x2c4   : > { %4148 = vmatpush2.bf16.msra.mxu0 %v5407_v36  ;;  %v5398_v13 = vcombine.low %v1990_v46, %v1999_v38  ;;  %v5399_v30 = vcombine.high %v1990_v46, %v1999_v38  ;;  %4223 = vmatprep.subr.bf16.mxu1 %v9880_v12  ;;  %v3788_v32 = vpop.f32.mrf.mxu0 }
 0x2c5   : > { %4108 = vmatprep.mubr.bf16.mxu1 %v8133_v0  ;;  %v8408_v39 = vpop.f32.mrf.mxu1 }
 0x2c6   : > { %4149 = vmatprep.subr.bf16.mxu0 %v5399_v30  ;;  %v5645_v25 = vld [vmem:[#allocation2 + $0x728] ss:$36 sps:$4 sm:$0xff]  }
 0x2c7   : > { %4224 = vmatpush1.bf16.msra.mxu1 %v5621_v16  ;;  %v8410_v44 = vpop.f32.mrf.mxu1 }
 0x2c8   : > { %4150 = vmatpush2.bf16.msra.mxu0 %v5398_v13  ;;  %4225 = vmatprep.subr.bf16.mxu1 %v9880_v12 }
 0x2c9   : > { %5441 = vmatprep.subr.bf16.mxu0 %v5622_v41  ;;  %v8412_v42 = vpop.f32.mrf.mxu1 }
 0x2ca   : > { %4109 = vmatmul.mubr.bf16.gmra.mxu1 %v8159_v62  ;;  %v5646_v51 = vld [vmem:[#allocation2 + $0x6e0] ss:$36 sps:$4 sm:$0xff]  }
 0x2cb   : > { %4152 = vmatmul.mubr.bf16.vlgmr.msra.gmra.mxu0 %v8374_v63  ;;  %4226 = vmatpush1.bf16.msra.mxu1 %v5624_v23  ;;  %v8414_v5 = vpop.f32.mrf.mxu1 }
 0x2cc   : > { %5442 = vmatpush3.bf16.msra.mxu0 %v5623_v56  ;;  %4227 = vmatprep.subr.bf16.mxu1 %v9880_v12 }
 0x2cd   : > { %5443 = vmatprep.subr.bf16.mxu0 %v5625_v31  ;;  %5426 = vmatprep.mubr.msk.bf16.mxu0 %vm1360_vm6, %v5673_v24  ;;  %v8418_v33 = vpop.f32.mrf.mxu1 }
 0x2ce   : > { %5427 = vmatprep.mubr.msk.bf16.mxu1 %vm1360_vm6, %v8169_v45  ;;  %v5632_v45 = vld [vmem:[#allocation2 + $0x530] ss:$36 sps:$4 sm:$0xff]  }
 0x2cf   : > { %4228 = vmatpush1.bf16.msra.mxu1 %v5627_v55  ;;  %v3888_v20 = vpop.f32.mrf.mxu1 }
 0x2d0   : > { %5444 = vmatpush3.bf16.msra.mxu0 %v5626_v59  ;;  %4229 = vmatprep.subr.bf16.mxu1 %v9880_v12 }
 0x2d1   : > { %5445 = vmatprep.subr.bf16.mxu0 %v5628_v58  ;;  %v8424_v36 = vpop.f32.mrf.mxu1 }
 0x2d3   : > { %4162 = vmatmul.mubr.bf16.gmra.mxu0 %v5674_v48  ;;  %4230 = vmatpush1.bf16.msra.mxu1 %v5629_v8 }
 0x2d4   : > { %5446 = vmatpush3.bf16.msra.mxu0 %v5630_v19  ;;  %4231 = vmatprep.subr.bf16.mxu1 %v9880_v12 }
 0x2d5   : > { %5447 = vmatprep.subr.bf16.mxu0 %v5631_v37  ;;  %4204 = vmatprep.mubr.bf16.mxu0 %v5675_v52  ;;  %v8476_v52 = vpop.permute.xlu1 %2453 }
 0x2d7   : > { %4232 = vmatpush1.bf16.msra.mxu1 %v5632_v45  ;;  %v8474_v45 = vpop.permute.xlu0 %2458 }
 0x2d8   : > { %5448 = vmatpush3.bf16.msra.mxu0 %v5633_v2  ;;  %4233 = vmatprep.subr.bf16.mxu1 %v9880_v12  ;;  %v4274_v2 = vlaneseq }
 0x2d9   : > { %5449 = vmatprep.subr.bf16.mxu0 %v5634_v18 }
 0x2db   : > { %4234 = vmatpush1.bf16.msra.mxu1 %v5636_v3 }
 0x2dc   : > { %5450 = vmatpush3.bf16.msra.mxu0 %v5635_v27  ;;  %4235 = vmatprep.subr.bf16.mxu1 %v9880_v12 }
 0x2dd   : > { %5451 = vmatprep.subr.bf16.mxu0 %v5637_v50  ;;  %v8484_v50 = vshrl.u32 %v4274_v2, 7 }
 0x2df   : > { %4236 = vmatpush1.bf16.msra.mxu1 %v5639_v21  ;;  %v8486_v21 = vpop.permute.xlu0 %2443  ;;  %v4284_v2 = vsub.s32 2, %v8484_v50 }
 0x2e0   : > { %5452 = vmatpush3.bf16.msra.mxu0 %v5638_v4  ;;  %4247 = vmatprep.subr.bf16.mxu1 %v9880_v12 }
 0x2e1   : > { %5453 = vmatprep.subr.bf16.mxu0 %v5640_v54  ;;  %v8490_v54 = vpop.permute.xlu1 %2448 }
 0x2e3   : > { %4248 = vmatpush2.bf16.msra.mxu1 %v5642_v43 }
 0x2e4   : > { %5454 = vmatpush3.bf16.msra.mxu0 %v5641_v10  ;;  %4249 = vmatprep.subr.bf16.mxu1 %v9880_v12  ;;  %v4276_v10 = vsub.s32 0, %v8484_v50 }
 0x2e5   : > { %5455 = vmatprep.subr.bf16.mxu0 %v5643_v40  ;;  %v8498_v40 = vld [vmem:[%s9263_s4] sm:$0xff] }
 0x2e7   : > { %4250 = vmatpush2.bf16.msra.mxu1 %v5645_v25  ;;  %v3783_v25 = vadd.f32 %v3782_v17, %v8486_v21 }
 0x2e8   : > { %5456 = vmatpush3.bf16.msra.mxu0 %v5644_v29  ;;  %4251 = vmatprep.subr.bf16.mxu1 %v9880_v12  ;;  %v3892_v12 = vpop.f32.mrf.mxu1  ;;  %v4280_v29 = vsub.s32 1, %v8484_v50 }
 0x2ea   : > { %v8430_v1 = vpop.f32.mrf.mxu1 }
 0x2eb   : > { %4205 = vmatmul.mubr.bf16.vlgmr.msra.gmra.mxu0 %v8123_v49  ;;  %4252 = vmatpush2.bf16.msra.mxu1 %v5646_v51  ;;  %v3792_v49 = vpop.f32.mrf.mxu0  ;;  %v3785_v51 = vadd.f32 %v3784_v35, %v8486_v21  ;;  %v8515_v35 = vrot.slane %v8498_v40, %v4276_v10 }
 0x2ec   : > { %4212 = vmatprep.mubr.bf16.mxu0 %v8133_v0  ;;  %v3898_v26 = vpop.f32.mrf.mxu1 }
 0x2ed   : > { %v3794_v0 = vpop.f32.mrf.mxu0 }
 0x2ee   : > { %4254 = vmatmul.mubr.bf16.vlgmr.msra.gmra.mxu1 %v8374_v63  ;;  %v8436_v15 = vpop.f32.mrf.mxu1 }
 0x2ef   : > { %5428 = vmatprep.mubr.msk.bf16.mxu1 %vm1360_vm6, %v5673_v24  ;;  %v3796_v14 = vpop.f32.mrf.mxu0 }
 0x2f0   : > { %v3902_v38 = vpop.f32.mrf.mxu1  ;;  %v3797_v17 = vadd.f32 %v3796_v14, %v8474_v45  ;;  %v3893_v14 = vadd.f32 %v3892_v12, %v8490_v54 }
 0x2f2   : > { %v8442_v13 = vpop.f32.mrf.mxu1 }
 0x2f3   : > { %4213 = vmatmul.mubr.bf16.gmra.mxu0 %v8159_v62  ;;  %v3798_v62 = vpop.f32.mrf.mxu0 }
 0x2f5   : > { %v8416_v9 = vpop.f32.mrf.mxu0 }
 0x2f6   : > { %4262 = vmatmul.mubr.bf16.gmra.mxu1 %v5674_v48 }
 0x2f7   : > { %v8420_v47 = vpop.f32.mrf.mxu0 }
 0x2f9   : > { %v8422_v60 = vpop.f32.mrf.mxu0 }
 0x2fb   : > { %v8426_v34 = vpop.f32.mrf.mxu0 }
 0x2fd   : > { %v8428_v57 = vpop.f32.mrf.mxu0 }
 0x2ff   : > { %v8432_v22 = vpop.f32.mrf.mxu0 }
 0x301   : > { %v8434_v28 = vpop.f32.mrf.mxu0 }
 0x303   : > { %v8438_v7 = vpop.f32.mrf.mxu0 }
 0x306   : > { %v8446_v16 = vpop.f32.mrf.mxu1 }
 0x308   : > { %v8450_v23 = vpop.f32.mrf.mxu1 }
 0x309   : > { %9887 = vst [vmem:[#allocation31_spill] sm:$0xff] %v8450_v23  ;;  %v3795_v23 = vadd.f32 %v3794_v0, %v8476_v52  ;;  %v8529_v0 = vrot.slane %v8498_v40, %v4284_v2 }
 0x30a   : > { %v8454_v63 = vpop.f32.mrf.mxu1 }
 0x30c   : > { %v8458_v55 = vpop.f32.mrf.mxu1 }
 0x30d   : > { %9888 = vst [vmem:[#allocation32_spill] sm:$0xff] %v8458_v55  ;;  %v3799_v55 = vadd.f32 %v3798_v62, %v8474_v45 }
 0x30e   : > { %v8462_v59 = vpop.f32.mrf.mxu1 }
 0x310   : > { %v8466_v8 = vpop.f32.mrf.mxu1 }
 0x312   : > { %v8470_v48 = vpop.f32.mrf.mxu1 }
 0x314   : > { %v8478_v18 = vpop.f32.mrf.mxu1 }
 0x315   : > { %9890 = vst [vmem:[#allocation34_spill] sm:$0xff] %v8478_v18 }
 0x339   : > { %v8440_v46 = vpop.f32.mrf.mxu0 }
 0x33b   : > { %v8444_v30 = vpop.f32.mrf.mxu0 }
 0x33d   : > { %v8448_v41 = vpop.f32.mrf.mxu0 }
 0x33f   : > { %v8452_v56 = vpop.f32.mrf.mxu0 }
 0x341   : > { %v8456_v31 = vpop.f32.mrf.mxu0 }
 0x343   : > { %v8460_v24 = vpop.f32.mrf.mxu0 }
 0x345   : > { %v8464_v58 = vpop.f32.mrf.mxu0 }
 0x347   : > { %v8468_v19 = vpop.f32.mrf.mxu0 }
 0x382   : > { %v8482_v27 = vpop.f32.mrf.mxu1 }
 0x383   : > { %9892 = vst [vmem:[#allocation36_spill] sm:$0xff] %v8482_v27  ;;  %v3793_v27 = vadd.f32 %v3792_v49, %v8476_v52  ;;  %v3889_v49 = vadd.f32 %v3888_v20, %v8486_v21 }
 0x384   : > { %v8492_v43 = vpop.f32.mrf.mxu1 }
 0x385   : > { %9894 = vst [vmem:[#allocation21_spill] sm:$0xff] %v8492_v43  ;;  %v8545_v20 = vadd.f32 %v8410_v44, %v3793_v27 }
 0x386   : > { %v8511_v18 = vpop.f32.mrf.mxu1 }
 0x388   : > { %v8550_v12 = vpop.f32.mrf.mxu1 }
 0x38b   : > { %v8472_v37 = vpop.f32.mrf.mxu0 }
 0x38c   : > { %9889 = vst [vmem:[#allocation33_spill] sm:$0xff] %v8472_v37  ;;  %v3789_v37 = vadd.f32 %v3788_v32, %v8490_v54  ;;  %v8522_v32 = vadd.f32 %v8402_v61, %v3783_v25  ;;  %v8548_v25 = vadd.f32 %v8412_v42, %v3795_v23  ;;  %v4110_v23 = vpop.f32.mrf.mxu1 }
 0x38d   : > { %v8480_v3 = vpop.f32.mrf.mxu0 }
 0x38e   : > { %9891 = vst [vmem:[#allocation35_spill] sm:$0xff] %v8480_v3  ;;  %v3787_v3 = vadd.f32 %v3786_v11, %v8490_v54  ;;  %v8519_v11 = vrot.slane %v8498_v40, %v4280_v29  ;;  %v8536_v62 = vadd.f32 %v8408_v39, %v3789_v37  ;;  %v8556_v39 = vadd.f32 %v8418_v33, %v3799_v55 }
 0x38f   : > { %v8488_v4 = vpop.f32.mrf.mxu0  ;;  %v3903_v37 = vadd.f32 %v3902_v38, %v8474_v45  ;;  %v4319_v44 = vmul.f32 %v8515_v35, %v8522_v32  ;;  %v3895_v33 = vadd.f32 %v8430_v1, %v8490_v54  ;;  %v8572_v38 = vadd.f32 %v8422_v60, %v3893_v14 }
 0x390   : > { %9893 = vst [vmem:[#allocation20_spill] sm:$0xff] %v8488_v4  ;;  %v4288_v4 = vsub.s32 3, %v8484_v50  ;;  %v8533_v10 = vadd.f32 %v8406_v53, %v3787_v3  ;;  %9898 = vst [vmem:[#allocation25_spill] sm:$0xff] %v8536_v62  ;;  %v8553_v53 = vadd.f32 %v8414_v5, %v3797_v17  ;;  %v4292_v3 = vsub.s32 4, %v8484_v50 }
 0x391   : > { %v8506_v43 = vpop.f32.mrf.mxu0  ;;  %v3891_v5 = vadd.f32 %v8424_v36, %v8486_v21  ;;  %9899 = vst [vmem:[#allocation26_spill] sm:$0xff] %v8572_v38  ;;  %v4329_v55 = vmul.f32 %v8519_v11, %v8536_v62  ;;  %v4337_v1 = vmul.f32 %v8515_v35, %v8545_v20  ;;  %v4338_v60 = vmul.f32 %v8519_v11, %v8548_v25  ;;  %v4112_v62 = vpop.f32.mrf.mxu1 }
 0x392   : > { %9895 = vst [vmem:[#allocation22_spill] sm:$0xff] %v8506_v43  ;;  %v8525_v43 = vadd.f32 %v8404_v6, %v3785_v51  ;;  %9897 = vst [vmem:[#allocation24_spill] sm:$0xff] %v8533_v10  ;;  %v8541_v61 = vrot.slane %v8498_v40, %v4288_v4  ;;  %v3899_v6 = vadd.f32 %v3898_v26, %v8476_v52 }
 0x393   : > { %v8538_v29 = vpop.f32.mrf.mxu0  ;;  %v8561_v26 = vadd.f32 %v8416_v9, %v3889_v49  ;;  %v4328_v9 = vmul.f32 %v8515_v35, %v8533_v10  ;;  %v3901_v4 = vadd.f32 %v8436_v15, %v8476_v52  ;;  %v4346_v51 = vmul.f32 %v8515_v35, %v8553_v53 }
 0x394   : > { %9896 = vst [vmem:[#allocation23_spill] sm:$0xff] %v8525_v43  ;;  %v4320_v42 = vmul.f32 %v8519_v11, %v8525_v43  ;;  %v8583_v36 = vadd.f32 %v8428_v57, %v3899_v6  ;;  %v4347_v2 = vmul.f32 %v8519_v11, %v8556_v39  ;;  %v3905_v17 = vadd.f32 %v8442_v13, %v8474_v45 }
 0x395   : > { %v8578_v27 = vpop.f32.mrf.mxu0  ;;  %v8596_v15 = vadd.f32 %v8434_v28, %v3903_v37  ;;  %v4321_v57 = vmul.f32 %v8529_v0, %v8561_v26  ;;  %v8601_v14 = vadd.f32 %v8420_v47, %v3891_v5  ;;  %v4005_v6 = vadd.f32 %v8456_v31, %v8476_v52 }
 0x396   : > { %v4355_v49 = vadd.f32 %v4320_v42, %v4319_v44  ;;  %v4330_v10 = vmul.f32 %v8529_v0, %v8572_v38  ;;  %v4365_v43 = vadd.f32 %v4329_v55, %v4328_v9  ;;  %v8608_v13 = vadd.f32 %v8426_v34, %v3895_v33 }
 0x397   : > { %v4296_v28 = vsub.s32 5, %v8484_v50  ;;  %v8611_v37 = vpop.f32.mrf.mxu0  ;;  %v4339_v44 = vmul.f32 %v8529_v0, %v8583_v36  ;;  %v4375_v47 = vadd.f32 %v4338_v60, %v4337_v1  ;;  %v8616_v42 = vadd.f32 %v8432_v22, %v3901_v4 }
 0x398   : > { %9900 = vst [vmem:[#allocation27_spill] sm:$0xff] %v8608_v13  ;;  %v3999_v31 = vadd.f32 %v8448_v41, %v8490_v54  ;;  %v4348_v5 = vmul.f32 %v8529_v0, %v8596_v15  ;;  %v4385_v9 = vadd.f32 %v4347_v2, %v4346_v51  ;;  %v8623_v34 = vadd.f32 %v8438_v7, %v3905_v17  ;;  %v4114_v41 = vpop.f32.mrf.mxu1 }
 0x399   : > { %v8626_v33 = vrot.slane %v8498_v40, %v4292_v3  ;;  %v4356_v55 = vadd.f32 %v4355_v49, %v4321_v57  ;;  %v4322_v1 = vmul.f32 %v8541_v61, %v8601_v14  ;;  %v4007_v22 = vadd.f32 %v8460_v24, %v8476_v52  ;;  %v8642_v2 = vpop.f32.mrf.mxu0 }
 0x39a   : > { %v8633_v4 = vadd.f32 %v8462_v59, %v4005_v6  ;;  %v4366_v60 = vadd.f32 %v4365_v43, %v4330_v10  ;;  %v4331_v51 = vmul.f32 %v8541_v61, %v8608_v13  ;;  %v8638_v7 = vrot.slane %v8498_v40, %v4296_v28 }
 0x39b   : > { %v4009_v3 = vadd.f32 %v8464_v58, %v8474_v45  ;;  %v4376_v17 = vadd.f32 %v4375_v47, %v4339_v44  ;;  %v4340_v24 = vmul.f32 %v8541_v61, %v8616_v42  ;;  %v3995_v59 = vadd.f32 %v8440_v46, %v8486_v21 }
 0x39c   : > { %v8649_v43 = vadd.f32 %v8454_v63, %v3999_v31  ;;  %v4386_v10 = vadd.f32 %v4385_v9, %v4348_v5  ;;  %v4349_v57 = vmul.f32 %v8541_v61, %v8623_v34  ;;  %v4300_v49 = vsub.s32 6, %v8484_v50  ;;  %v4116_v63 = vpop.f32.mrf.mxu1 }
 0x39d   : > { %v4111_v58 = vadd.f32 %v4110_v23, %v8476_v52  ;;  %v4357_v28 = vadd.f32 %v4356_v55, %v4322_v1  ;;  %v4001_v44 = vadd.f32 %v8452_v56, %v8490_v54  ;;  %v4341_v47 = vmul.f32 %v8626_v33, %v8633_v4 }
 0x39e   : > { %9901 = vst [vmem:[#allocation28_spill] sm:$0xff] %v8649_v43  ;;  %v8660_v46 = vadd.f32 %v8466_v8, %v4007_v22  ;;  %v4367_v31 = vadd.f32 %v4366_v60, %v4331_v51  ;;  %v4011_v5 = vadd.f32 %v8468_v19, %v8474_v45  ;;  %v8665_v9 = vadd.f32 %v8470_v48, %v4009_v3  ;;  %v9903_v3 = vld [vmem:[#allocation32_spill] sm:$0xff] }
 0x39f   : > { %v4304_v23 = vsub.s32 7, %v8484_v50  ;;  %v4377_v1 = vadd.f32 %v4376_v17, %v4340_v24  ;;  %v3997_v56 = vadd.f32 %v8444_v30, %v8486_v21  ;;  %v8671_v13 = vadd.f32 %v8446_v16, %v3995_v59 }
 0x3a0   : > { %v4332_v8 = vmul.f32 %v8626_v33, %v8649_v43  ;;  %v4387_v60 = vadd.f32 %v4386_v10, %v4349_v57  ;;  %v8678_v19 = vrot.slane %v8498_v40, %v4300_v49  ;;  %v4113_v48 = vadd.f32 %v4112_v62, %v8476_v52  ;;  %v9905_v57 = vld [vmem:[#allocation34_spill] sm:$0xff]  ;;  %v9907_v43 = vld [vmem:[#allocation36_spill] sm:$0xff] }
 0x3a1   : > { %9902 = vst [vmem:[#allocation29_spill] sm:$0xff] %v8671_v13  ;;  %v8682_v50 = vadd.f32 %v8538_v29, %v4111_v58  ;;  %v8685_v30 = vadd.f32 %v9903_v3, %v4001_v44  ;;  %v4378_v16 = vadd.f32 %v4377_v1, %v4341_v47  ;;  %v4342_v17 = vmul.f32 %v8638_v7, %v8660_v46  ;;  %v9906_v47 = vld [vmem:[#allocation31_spill] sm:$0xff] }
 0x3a2   : > { %v4115_v24 = vadd.f32 %v4114_v41, %v8474_v45  ;;  %v4350_v10 = vmul.f32 %v8626_v33, %v8665_v9  ;;  %v8693_v49 = vadd.f32 %v9905_v57, %v4011_v5  ;;  %v4105_v62 = vadd.f32 %v8511_v18, %v8490_v54  ;;  %v9908_v57 = vld [vmem:[#allocation20_spill] sm:$0xff] }
 0x3a3   : > { %9904 = vst [vmem:[#allocation30_spill] sm:$0xff] %v8685_v30  ;;  %v8698_v29 = vrot.slane %v8498_v40, %v4304_v23  ;;  %v4323_v44 = vmul.f32 %v8626_v33, %v8671_v13  ;;  %v8703_v1 = vadd.f32 %v9906_v47, %v3997_v56  ;;  %v4368_v41 = vadd.f32 %v4367_v31, %v4332_v8 }
 0x3a4   : > { %v4101_v5 = vadd.f32 %v9907_v43, %v8486_v21  ;;  %v8708_v38 = vadd.f32 %v9908_v57, %v4105_v62  ;;  %v4343_v18 = vmul.f32 %v8678_v19, %v8682_v50  ;;  %v8713_v40 = vadd.f32 %v8578_v27, %v4113_v48  ;;  %v9910_v27 = vld [vmem:[#allocation33_spill] sm:$0xff] }
 0x3a5   : > { %v4333_v56 = vmul.f32 %v8638_v7, %v8685_v30  ;;  %v4379_v47 = vadd.f32 %v4378_v16, %v4342_v17  ;;  %v4117_v31 = vadd.f32 %v4116_v63, %v8474_v45  ;;  %v8719_v8 = vadd.f32 %v8611_v37, %v4115_v24 }
 0x3a6   : > { %9909 = vst [vmem:[#allocation32_spill] sm:$0xff] %v8708_v38  ;;  %v4351_v62 = vmul.f32 %v8638_v7, %v8693_v49  ;;  %v8726_v48 = vadd.f32 %v9910_v27, %v4101_v5  ;;  %v4358_v13 = vadd.f32 %v4357_v28, %v4323_v44  ;;  %v4334_v37 = vmul.f32 %v8678_v19, %v8708_v38  ;;  %v9913_v38 = vld [vmem:[#allocation35_spill] sm:$0xff] }
 0x3a7   : > { %v4324_v5 = vmul.f32 %v8638_v7, %v8703_v1  ;;  %v4369_v44 = vadd.f32 %v4368_v41, %v4333_v56 }
 0x3a9   : > { %v4370_v41 = vadd.f32 %v4369_v44, %v4334_v37 }
 0x3ab   : > { %v5457_v6 = vpop.f32.mrf.mxu0 }
 0x3ad   : > { %v5458_v55 = vpop.f32.mrf.mxu0 }
 0x3ae   : > { %v8675_v22 = vpop.f32.mrf.mxu1  ;;  %v5459_v30 = vadd.f32 %v5458_v55, %v5457_v6  ;;  %v4352_v6 = vmul.f32 %v8678_v19, %v8719_v8 }
 0x3af   : > { %v5460_v51 = vpop.f32.mrf.mxu0 }
 0x3b0   : > { %v4257_v59 = vpop.f32.mrf.mxu1  ;;  %v4207_v27 = vadd.f32 %v5459_v30, %v8486_v21 }
 0x3b1   : > { %v5461_v58 = vpop.f32.mrf.mxu0 }
 0x3b2   : > { %v5462_v3 = vadd.f32 %v5461_v58, %v5460_v51  ;;  %v4258_v59 = vpop.f32.mrf.mxu1  ;;  %v4388_v51 = vadd.f32 %v4387_v60, %v4350_v10  ;;  %v4107_v58 = vadd.f32 %v8550_v12, %v8490_v54  ;;  %v9911_v60 = vld [vmem:[#allocation22_spill] sm:$0xff]  ;;  %v4380_v10 = vadd.f32 %v4379_v47, %v4343_v18  ;;  %v9912_v18 = vld [vmem:[#allocation21_spill] sm:$0xff] }
 0x3b3   : > { %v5463_v23 = vpop.f32.mrf.mxu0  ;;  %v4344_v12 = vmul.f32 %v8698_v29, %v8713_v40  ;;  %v4325_v47 = vmul.f32 %v8678_v19, %v8726_v48 }
 0x3b4   : > { %v4260_v43 = vpop.f32.mrf.mxu1  ;;  %v4210_v16 = vadd.f32 %v5462_v3, %v8490_v54  ;;  %v8732_v24 = vadd.f32 %v9911_v60, %v4107_v58  ;;  %v8741_v54 = vadd.f32 %v8642_v2, %v4117_v31  ;;  %v4389_v3 = vadd.f32 %v4388_v51, %v4351_v62  ;;  %v8761_v62 = vld [vmem:[%s9263_s4 + $0x8] ss:$0 sm:$0xff] }
 0x3b5   : > { %v5464_v57 = vpop.f32.mrf.mxu0  ;;  %v4381_v51 = vadd.f32 %v4380_v10, %v4344_v12 }
 0x3b6   : > { %v5465_v63 = vadd.f32 %v5464_v57, %v5463_v23  ;;  %v4263_v17 = vpop.f32.mrf.mxu1  ;;  %v4103_v23 = vadd.f32 %v9912_v18, %v8486_v21  ;;  %v8749_v57 = vadd.f32 %v4258_v59, %v4210_v16  ;;  %v4335_v56 = vmul.f32 %v8698_v29, %v8732_v24  ;;  %v4395_v18 = vld [vmem:[%s9262_s3] sm:$0xff] }
 0x3b7   : > { %v5466_v43 = vpop.f32.mrf.mxu0  ;;  %v4390_v21 = vadd.f32 %v4389_v3, %v4352_v6  ;;  %v4353_v30 = vmul.f32 %v8698_v29, %v8741_v54  ;;  %5493 = vmatprep.mubr.msk.f32.mxu0 %vm4399_vm0, %v4395_v18 }
 0x3b8   : > { %v4215_v28 = vadd.f32 %v5465_v63, %v8476_v52  ;;  %v4265_v55 = vpop.f32.mrf.mxu1  ;;  %v8754_v52 = vadd.f32 %v9913_v38, %v4103_v23  ;;  %v4359_v63 = vadd.f32 %v4358_v13, %v4324_v5  ;;  %v4336_v37 = vmul.f32 %v8761_v62, %v8749_v57 }
 0x3b9   : > { %v5467_v58 = vpop.f32.mrf.mxu0  ;;  %v4391_v55 = vadd.f32 %v4390_v21, %v4353_v30 }
 0x3ba   : > { %v8751_v60 = vadd.f32 %v4263_v17, %v4215_v28  ;;  %v5468_v2 = vadd.f32 %v5467_v58, %v5466_v43  ;;  %v4266_v31 = vpop.f32.mrf.mxu1  ;;  %v8769_v17 = vadd.f32 %v8675_v22, %v4207_v27  ;;  %v4360_v43 = vadd.f32 %v4359_v63, %v4325_v47 }
 0x3bb   : > { %v4326_v6 = vmul.f32 %v8698_v29, %v8754_v52  ;;  %v4371_v28 = vadd.f32 %v4370_v41, %v4335_v56  ;;  %v8799_v41 = vld [vmem:[%s9262_s3 + $0x18] sm:$0xff] }
 0x3bc   : > { %v4345_v59 = vmul.f32 %v8761_v62, %v8751_v60  ;;  %v4218_v38 = vadd.f32 %v5468_v2, %v8474_v45  ;;  %v4268_v16 = vpop.f32.mrf.mxu1  ;;  %v4327_v45 = vmul.f32 %v8761_v62, %v8769_v17  ;;  %v8785_v2 = vld [vmem:[%s9262_s3 + $0x8] sm:$0xff] }
 0x3bd   : > { %v4372_v22 = vadd.f32 %v4371_v28, %v4336_v37  ;;  %v4361_v5 = vadd.f32 %v4360_v43, %v4326_v6 }
 0x3be   : > { %v4267_v10 = vadd.f32 %v4266_v31, %v4218_v38  ;;  %v4382_v12 = vadd.f32 %v4381_v51, %v4345_v59  ;;  %v8790_v31 = vld [vmem:[%s9262_s3 + $0x10] sm:$0xff] }
 0x3bf   : > { %v4362_v3 = vadd.f32 %v4361_v5, %v4327_v45 }
 0x3c0   : > { %v4354_v44 = vmul.f32 %v8761_v62, %v4267_v10  ;;  %4383 = vadd.xlane.f32.xlu0 %v4382_v12 }
 0x3c2   : > { %v4392_v13 = vadd.f32 %v4391_v55, %v4354_v44 }
 0x3c4   : > { %4393 = vadd.xlane.f32.xlu1 %v4392_v13  ;;  %4373 = vadd.xlane.f32.xlu0 %v4372_v22 }
 0x3c8   : > { %4363 = vadd.xlane.f32.xlu1 %v4362_v3 }
 0x449   : > { %v4384_v23 = vpop.xlane.xlu0 %4383 }
 0x44d   : > { %v4394_v47 = vpop.xlane.xlu1 %4393  ;;  %v4374_v58 = vpop.xlane.xlu0 %4373 }
 0x44e   : > { %5485 = vmatprep.subr.mxu0 %v4394_v47 }
 0x44f   : > { %5486 = vmatpush3.msra.mxu0 %v4394_v47 }
 0x450   : > { %5487 = vmatprep.subr.mxu0 %v4384_v23 }
 0x451   : > { %5488 = vmatpush3.msra.mxu0 %v4384_v23  ;;  %v4364_v27 = vpop.xlane.xlu1 %4363 }
 0x452   : > { %5489 = vmatprep.subr.mxu0 %v4374_v58 }
 0x453   : > { %5490 = vmatpush3.msra.mxu0 %v4374_v58 }
 0x454   : > { %5491 = vmatprep.subr.mxu0 %v4364_v27 }
 0x455   : > { %5492 = vmatpush3.msra.mxu0 %v4364_v27 }
 0x456   : > { %5494 = vmatmul.mubr.msk.f32.vlgmr.msra.gmra.mxu0 %vm4399_vm0, %v8785_v2 }
 0x457   : > { %5496 = vmatprep.mubr.msk.f32.mxu0 %vm4399_vm0, %v8790_v31 }
 0x45a   : > { %5497 = vmatmul.mubr.msk.f32.gmra.mxu0 %vm4399_vm0, %v8799_v41 }
 0x45b   : > { %5507 = vmatprep.mubr.msk.f32.mxu0 %vm4399_vm0, %v4395_v18 }
 0x516   : > { %v5495_v56 = vpop.f32.mrf.mxu0 }
 0x518   : > { %v4478_v51 = vpop.f32.mrf.mxu0 }
 0x51a   : > { %v5498_v21 = vpop.f32.mrf.mxu0 }
 0x51b   : > { %4514 = vperm.xlu0 %5594, %v5498_v21  }
 0x51c   : > { %v4488_v30 = vpop.f32.mrf.mxu0 }
 0x51d   : > { %4509 = vperm.xlu1 %5595, %v4488_v30  }
 0x51f   : > { %4499 = vperm.xlu0 %5594, %v4478_v51  }
 0x521   : > { %4504 = vperm.xlu1 %5595, %v5495_v56  }
 0x596   : > { %v4515_v59 = vpop.permute.xlu0 %4514 }
 0x597   : > { %v8805_v38 = vsub.f32 %v8553_v53, %v4515_v59  ;;  %v8808_v16 = vsub.f32 %v8556_v39, %v4515_v59  ;;  %v8811_v63 = vsub.f32 %v8596_v15, %v4515_v59  ;;  %v8814_v37 = vsub.f32 %v8623_v34, %v4515_v59 }
 0x598   : > { %v8817_v12 = vsub.f32 %v8665_v9, %v4515_v59  ;;  %v8820_v43 = vsub.f32 %v8693_v49, %v4515_v59  ;;  %v8829_v15 = vsub.f32 %v8719_v8, %v4515_v59  ;;  %v4510_v34 = vpop.permute.xlu1 %4509  ;;  %v8834_v49 = vsub.f32 %v8741_v54, %v4515_v59 }
 0x599   : > { %v4580_v6 = vmul.f32 %v8805_v38, %v8515_v35  ;;  %v4581_v53 = vmul.f32 %v8808_v16, %v8519_v11  ;;  %v4582_v39 = vmul.f32 %v8811_v63, %v8529_v0  ;;  %v4583_v9 = vmul.f32 %v8814_v37, %v8541_v61 }
 0x59a   : > { %v8836_v44 = vsub.f32 %v4267_v10, %v4515_v59  ;;  %v4584_v45 = vmul.f32 %v8817_v12, %v8626_v33  ;;  %v4585_v13 = vmul.f32 %v8820_v43, %v8638_v7  ;;  %v4586_v5 = vmul.f32 %v8829_v15, %v8678_v19 }
 0x59b   : > { %v4616_v28 = vmul.f32 %v4580_v6, %v4580_v6  ;;  %v4617_v55 = vmul.f32 %v4581_v53, %v4581_v53  ;;  %v4618_v22 = vmul.f32 %v4582_v39, %v4582_v39  ;;  %v8845_v3 = vsub.f32 %v8545_v20, %v4510_v34  ;;  %v4500_v6 = vpop.permute.xlu0 %4499 }
 0x59c   : > { %v8848_v18 = vsub.f32 %v8548_v25, %v4510_v34  ;;  %v8851_v54 = vsub.f32 %v8583_v36, %v4510_v34  ;;  %v4619_v10 = vmul.f32 %v4583_v9, %v4583_v9  ;;  %v8854_v47 = vsub.f32 %v8616_v42, %v4510_v34 }
 0x59d   : > { %v4655_v8 = vadd.f32 %v4617_v55, %v4616_v28  ;;  %v4587_v58 = vmul.f32 %v8834_v49, %v8698_v29  ;;  %v4588_v27 = vmul.f32 %v8761_v62, %v8836_v44  ;;  %v4571_v20 = vmul.f32 %v8845_v3, %v8515_v35 }
 0x59e   : > { %v4572_v25 = vmul.f32 %v8848_v18, %v8519_v11  ;;  %v4620_v56 = vmul.f32 %v4584_v45, %v4584_v45  ;;  %v8865_v51 = vsub.f32 %v8633_v4, %v4510_v34  ;;  %v4573_v42 = vmul.f32 %v8851_v54, %v8529_v0 }
 0x59f   : > { %v4656_v23 = vadd.f32 %v4655_v8, %v4618_v22  ;;  %v4621_v21 = vmul.f32 %v4585_v13, %v4585_v13  ;;  %v4622_v30 = vmul.f32 %v4586_v5, %v4586_v5  ;;  %v8870_v59 = vsub.f32 %v8660_v46, %v4510_v34 }
 0x5a0   : > { %v4574_v39 = vmul.f32 %v8854_v47, %v8541_v61  ;;  %v4607_v9 = vmul.f32 %v4571_v20, %v4571_v20  ;;  %v4608_v28 = vmul.f32 %v4572_v25, %v4572_v25  ;;  %v4623_v55 = vmul.f32 %v4587_v58, %v4587_v58  ;;  %v9917_v58 = vld [vmem:[#allocation23_spill] sm:$0xff] }
 0x5a1   : > { %v4657_v36 = vadd.f32 %v4656_v23, %v4619_v10  ;;  %v4624_v45 = vmul.f32 %v4588_v27, %v4588_v27  ;;  %v8875_v4 = vsub.f32 %v8682_v50, %v4510_v34  ;;  %v8878_v22 = vsub.f32 %v8713_v40, %v4510_v34 }
 0x5a2   : > { %v4575_v46 = vmul.f32 %v8865_v51, %v8626_v33  ;;  %v4609_v8 = vmul.f32 %v4573_v42, %v4573_v42  ;;  %v4645_v5 = vadd.f32 %v4608_v28, %v4607_v9  ;;  %v8883_v10 = vsub.f32 %v8751_v60, %v4510_v34  ;;  %v4505_v28 = vpop.permute.xlu1 %4504 }
 0x5a3   : > { %v4658_v53 = vadd.f32 %v4657_v36, %v4620_v56  ;;  %9914 = vst [vmem:[#allocation34_spill] sm:$0xff] %v8875_v4  ;;  %9915 = vst [vmem:[#allocation31_spill] sm:$0xff] %v8878_v22  ;;  %v8886_v23 = vsub.f32 %v8522_v32, %v4500_v6  ;;  %v8889_v27 = vsub.f32 %v9917_v58, %v4500_v6 }
 0x5a4   : > { %9916 = vst [vmem:[#allocation36_spill] sm:$0xff] %v8883_v10  ;;  %v8892_v50 = vsub.f32 %v8561_v26, %v4500_v6  ;;  %v4576_v20 = vmul.f32 %v8870_v59, %v8638_v7  ;;  %v4610_v25 = vmul.f32 %v4574_v39, %v4574_v39  ;;  %v4646_v56 = vadd.f32 %v4645_v5, %v4609_v8 }
 0x5a5   : > { %v4659_v13 = vadd.f32 %v4658_v53, %v4621_v21  ;;  %v4577_v36 = vmul.f32 %v8875_v4, %v8678_v19  ;;  %v4578_v60 = vmul.f32 %v8878_v22, %v8698_v29  ;;  %v8901_v32 = vsub.f32 %v8601_v14, %v4500_v6  ;;  %v9918_v53 = vld [vmem:[#allocation29_spill] sm:$0xff] }
 0x5a6   : > { %v4553_v34 = vmul.f32 %v8886_v23, %v8515_v35  ;;  %v4611_v42 = vmul.f32 %v4575_v46, %v4575_v46  ;;  %v4647_v21 = vadd.f32 %v4646_v56, %v4610_v25  ;;  %v8908_v39 = vsub.f32 %v9918_v53, %v4500_v6  ;;  %v9920_v4 = vld [vmem:[#allocation25_spill] sm:$0xff] }
 0x5a7   : > { %v4660_v40 = vadd.f32 %v4659_v13, %v4622_v30  ;;  %v4554_v30 = vmul.f32 %v8889_v27, %v8519_v11  ;;  %v4555_v9 = vmul.f32 %v8892_v50, %v8529_v0  ;;  %v4579_v14 = vmul.f32 %v8761_v62, %v8883_v10 }
 0x5a8   : > { %v4612_v8 = vmul.f32 %v4576_v20, %v4576_v20  ;;  %v4648_v5 = vadd.f32 %v4647_v21, %v4611_v42  ;;  %v4556_v46 = vmul.f32 %v8901_v32, %v8541_v61  ;;  %v4589_v58 = vmul.f32 %v4553_v34, %v4553_v34  ;;  %v9919_v42 = vld [vmem:[#allocation24_spill] sm:$0xff] }
 0x5a9   : > { %v4661_v26 = vadd.f32 %v4660_v40, %v4623_v55  ;;  %v8915_v55 = vsub.f32 %v8703_v1, %v4500_v6  ;;  %v4590_v40 = vmul.f32 %v4554_v30, %v4554_v30  ;;  %v4613_v25 = vmul.f32 %v4577_v36, %v4577_v36  ;;  %v9921_v30 = vld [vmem:[#allocation26_spill] sm:$0xff] }
 0x5aa   : > { %v4614_v56 = vmul.f32 %v4578_v60, %v4578_v60  ;;  %v4649_v53 = vadd.f32 %v4648_v5, %v4612_v8  ;;  %v8920_v22 = vsub.f32 %v8726_v48, %v4500_v6  ;;  %v4591_v20 = vmul.f32 %v4555_v9, %v4555_v9 }
 0x5ab   : > { %v4662_v13 = vadd.f32 %v4661_v26, %v4624_v45  ;;  %v4557_v45 = vmul.f32 %v8908_v39, %v8626_v33  ;;  %v4625_v26 = vadd.f32 %v4590_v40, %v4589_v58  ;;  %v8925_v1 = vsub.f32 %v9919_v42, %v4505_v28  ;;  %v9924_v42 = vld [vmem:[#allocation30_spill] sm:$0xff] }
 0x5ac   : > { %v4615_v21 = vmul.f32 %v4579_v14, %v4579_v14  ;;  %v4650_v10 = vadd.f32 %v4649_v53, %v4613_v25  ;;  %v8928_v34 = vsub.f32 %v9920_v4, %v4505_v28  ;;  %v8931_v36 = vsub.f32 %v9921_v30, %v4505_v28  ;;  %v9922_v14 = vld [vmem:[#allocation27_spill] sm:$0xff] }
 0x5ad   : > { %4663 = vadd.xlane.f32.xlu1 %v4662_v13  ;;  %v8934_v60 = vsub.f32 %v8754_v52, %v4500_v6  ;;  %v4558_v48 = vmul.f32 %v8915_v55, %v8638_v7  ;;  %v4592_v13 = vmul.f32 %v4556_v46, %v4556_v46  ;;  %v4626_v9 = vadd.f32 %v4625_v26, %v4591_v20  ;;  %v9923_v20 = vld [vmem:[#allocation28_spill] sm:$0xff] }
 0x5ae   : > { %v4651_v8 = vadd.f32 %v4650_v10, %v4614_v56  ;;  %v8939_v5 = vsub.f32 %v8769_v17, %v4500_v6  ;;  %v8942_v58 = vsub.f32 %v9922_v14, %v4505_v28  ;;  %v4562_v4 = vmul.f32 %v8925_v1, %v8515_v35 }
 0x5af   : > { %v4559_v40 = vmul.f32 %v8920_v22, %v8678_v19  ;;  %v4593_v52 = vmul.f32 %v4557_v45, %v4557_v45  ;;  %v4627_v25 = vadd.f32 %v4626_v9, %v4592_v13  ;;  %v4563_v53 = vmul.f32 %v8928_v34, %v8519_v11 }
 0x5b0   : > { %v4652_v46 = vadd.f32 %v4651_v8, %v4615_v21  ;;  %v8951_v10 = vsub.f32 %v9923_v20, %v4505_v28  ;;  %v4564_v17 = vmul.f32 %v8931_v36, %v8529_v0  ;;  %v4560_v6 = vmul.f32 %v8934_v60, %v8698_v29  ;;  %v9925_v0 = vld [vmem:[#allocation32_spill] sm:$0xff] }
 0x5b1   : > { %v4594_v56 = vmul.f32 %v4558_v48, %v4558_v48  ;;  %v4628_v35 = vadd.f32 %v4627_v25, %v4593_v52  ;;  %v4598_v26 = vmul.f32 %v4562_v4, %v4562_v4  ;;  %v8958_v45 = vsub.f32 %v9924_v42, %v4505_v28 }
 0x5b2   : > { %4653 = vadd.xlane.f32.xlu0 %v4652_v46  ;;  %v4565_v11 = vmul.f32 %v8942_v58, %v8541_v61  ;;  %v4599_v21 = vmul.f32 %v4563_v53, %v4563_v53  ;;  %v4561_v30 = vmul.f32 %v8761_v62, %v8939_v5  ;;  %v4595_v13 = vmul.f32 %v4559_v40, %v4559_v40 }
 0x5b3   : > { %v4629_v9 = vadd.f32 %v4628_v35, %v4594_v56  ;;  %v8965_v8 = vsub.f32 %v9925_v0, %v4505_v28  ;;  %v4566_v48 = vmul.f32 %v8951_v10, %v8626_v33  ;;  %v4600_v14 = vmul.f32 %v4564_v17, %v4564_v17 }
 0x5b4   : > { %v4635_v4 = vadd.f32 %v4599_v21, %v4598_v26  ;;  %v4596_v52 = vmul.f32 %v4560_v6, %v4560_v6  ;;  %v8970_v46 = vsub.f32 %v8732_v24, %v4505_v28  ;;  %v4567_v61 = vmul.f32 %v8958_v45, %v8638_v7 }
 0x5b5   : > { %v4630_v25 = vadd.f32 %v4629_v9, %v4595_v13  ;;  %v4601_v53 = vmul.f32 %v4565_v11, %v4565_v11  ;;  %v4597_v40 = vmul.f32 %v4561_v30, %v4561_v30  ;;  %v8975_v35 = vsub.f32 %v8749_v57, %v4505_v28 }
 0x5b6   : > { %v4636_v20 = vadd.f32 %v4635_v4, %v4600_v14  ;;  %v4568_v33 = vmul.f32 %v8965_v8, %v8678_v19  ;;  %v4602_v17 = vmul.f32 %v4566_v48, %v4566_v48  ;;  %v4569_v24 = vmul.f32 %v8970_v46, %v8698_v29  ;;  %v4810_v19 = vld [vmem:[%s9264_s5] sm:$0xff]  ;;  %v4812_v29 = vld [vmem:[%s9264_s5 + $0x10] sm:$0xff]  ;;  %v4811_v48 = vld [vmem:[%s9264_s5 + $0x8] sm:$0xff] }
 0x5b7   : > { %v4631_v56 = vadd.f32 %v4630_v25, %v4596_v52  ;;  %v4603_v42 = vmul.f32 %v4567_v61, %v4567_v61  ;;  %v4570_v7 = vmul.f32 %v8761_v62, %v8975_v35  ;;  %v4870_v62 = vld [vmem:[%s9265_s6] sm:$0xff]  ;;  %v4813_v14 = vld [vmem:[%s9264_s5 + $0x18] sm:$0xff]  ;;  %v4871_v4 = vld [vmem:[%s9265_s6 + $0x8] sm:$0xff] }
 0x5b8   : > { %v4637_v26 = vadd.f32 %v4636_v20, %v4601_v53  ;;  %v4604_v11 = vmul.f32 %v4568_v33, %v4568_v33  ;;  %v4605_v13 = vmul.f32 %v4569_v24, %v4569_v24 }
 0x5b9   : > { %v4632_v6 = vadd.f32 %v4631_v56, %v4597_v40  ;;  %v4606_v28 = vmul.f32 %v4570_v7, %v4570_v7  ;;  %v4873_v7 = vld [vmem:[%s9265_s6 + $0x18] sm:$0xff] }
 0x5ba   : > { %v4638_v21 = vadd.f32 %v4637_v26, %v4602_v17 }
 0x5bb   : > { %4633 = vadd.xlane.f32.xlu1 %v4632_v6 }
 0x5bc   : > { %v4639_v30 = vadd.f32 %v4638_v21, %v4603_v42 }
 0x5be   : > { %v4640_v57 = vadd.f32 %v4639_v30, %v4604_v11 }
 0x5c0   : > { %v4641_v9 = vadd.f32 %v4640_v57, %v4605_v13 }
 0x5c2   : > { %v4642_v0 = vadd.f32 %v4641_v9, %v4606_v28  ;;  %v9021_v9 = vstv %s4930_s11 }
 0x5c4   : > { %4643 = vadd.xlane.f32.xlu0 %v4642_v0 }
 0x5cc   : > { %4816 = vperm.xlu1 %5595, %v4810_v19  }
 0x5d0   : > { %4826 = vperm.xlu1 %5595, %v4812_v29  }
 0x5d4   : > { %4876 = vperm.xlu1 %5595, %v4870_v62  }
 0x5da   : > { %4821 = vperm.xlu0 %5594, %v4811_v48  }
 0x5de   : > { %4831 = vperm.xlu0 %5594, %v4813_v14  }
 0x5e2   : > { %4881 = vperm.xlu0 %5594, %v4871_v4  }
 0x636   : > { %v4664_v52 = vpop.xlane.xlu1 %4663 }
 0x637   : > { %5499 = vmatprep.subr.mxu0 %v4664_v52 }
 0x638   : > { %5500 = vmatpush3.msra.mxu0 %v4664_v52 }
 0x63b   : > { %v4654_v25 = vpop.xlane.xlu0 %4653 }
 0x63c   : > { %5501 = vmatprep.subr.mxu0 %v4654_v25 }
 0x63d   : > { %5502 = vmatpush3.msra.mxu0 %v4654_v25 }
 0x644   : > { %v4634_v53 = vpop.xlane.xlu1 %4633 }
 0x648   : > { %v9013_v11 = vpop.permute.xlu1 %4816 }
 0x64c   : > { %v9015_v30 = vpop.permute.xlu1 %4826 }
 0x64d   : > { %v4644_v61 = vpop.xlane.xlu0 %4643 }
 0x64e   : > { %5503 = vmatprep.subr.mxu0 %v4644_v61 }
 0x64f   : > { %5504 = vmatpush3.msra.mxu0 %v4644_v61 }
 0x650   : > { %5505 = vmatprep.subr.mxu0 %v4634_v53  ;;  %v9017_v57 = vpop.permute.xlu1 %4876 }
 0x651   : > { %5506 = vmatpush3.msra.mxu0 %v4634_v53 }
 0x652   : > { %5508 = vmatmul.mubr.msk.f32.vlgmr.msra.gmra.mxu0 %vm4399_vm0, %v8785_v2 }
 0x653   : > { %5510 = vmatprep.mubr.msk.f32.mxu0 %vm4399_vm0, %v8790_v31 }
 0x655   : > { %v4822_v13 = vpop.permute.xlu0 %4821 }
 0x656   : > { %5511 = vmatmul.mubr.msk.f32.gmra.mxu0 %vm4399_vm0, %v8799_v41  ;;  %v4872_v41 = vld [vmem:[%s9265_s6 + $0x10] sm:$0xff] }
 0x659   : > { %v9019_v28 = vpop.permute.xlu0 %4831 }
 0x712   : > { %v5509_v20 = vpop.f32.mrf.mxu0 }
 0x713   : > { %v4737_v40 = vadd.f32 1e-05, %v5509_v20 }
 0x714   : > { %v4731_v56 = vpop.f32.mrf.mxu0 }
 0x715   : > { %5647 = vrsqrt.f32 %v4737_v40  ;;  %v4732_v33 = vadd.f32 1e-05, %v4731_v56  ;;  %v4882_v40 = vpop.permute.xlu0 %4881 }
 0x716   : > { %v5512_v17 = vpop.f32.mrf.mxu0 }
 0x717   : > { %5649 = vrsqrt.f32 %v4732_v33  ;;  %v4747_v26 = vadd.f32 1e-05, %v5512_v17 }
 0x718   : > { %v4741_v6 = vpop.f32.mrf.mxu0 }
 0x719   : > { %v4742_v24 = vadd.f32 1e-05, %v4741_v6  ;;  %5651 = vrsqrt.f32 %v4747_v26 }
 0x71b   : > { %5653 = vrsqrt.f32 %v4742_v24 }
 0x722   : > { %v5648_v42 = vpop.eup %5647 }
 0x723   : > { %4761 = vperm.xlu1 %5595, %v5648_v42  }
 0x724   : > { %v5650_v2 = vpop.eup %5649 }
 0x725   : > { %4756 = vperm.xlu0 %5594, %v5650_v2  }
 0x726   : > { %v5652_v31 = vpop.eup %5651 }
 0x728   : > { %v5654_v21 = vpop.eup %5653 }
 0x729   : > { %4766 = vperm.xlu1 %5595, %v5654_v21   ;;  %4771 = vperm.xlu0 %5594, %v5652_v31  }
 0x72d   : > { %4886 = vperm.xlu1 %5595, %v4872_v41   ;;  %4891 = vperm.xlu0 %5594, %v4873_v7  }
 0x79e   : > { %v4762_v0 = vpop.permute.xlu1 %4761 }
 0x79f   : > { %v4783_v19 = vmul.f32 %v4762_v0, %v8925_v1  ;;  %v4784_v29 = vmul.f32 %v4762_v0, %v8928_v34  ;;  %v4785_v62 = vmul.f32 %v4762_v0, %v8931_v36  ;;  %v4786_v48 = vmul.f32 %v4762_v0, %v8942_v58 }
 0x7a0   : > { %v4787_v14 = vmul.f32 %v4762_v0, %v8951_v10  ;;  %v4788_v4 = vmul.f32 %v4762_v0, %v8958_v45  ;;  %v4789_v52 = vmul.f32 %v4762_v0, %v8965_v8  ;;  %v4790_v25 = vmul.f32 %v4762_v0, %v8970_v46 }
 0x7a1   : > { %v4791_v61 = vmul.f32 %v4762_v0, %v8975_v35  ;;  %v4843_v53 = vmul.f32 %v4822_v13, %v4783_v19  ;;  %v4844_v20 = vmul.f32 %v4822_v13, %v4784_v29  ;;  %v4845_v1 = vmul.f32 %v4822_v13, %v4785_v62  ;;  %v4757_v29 = vpop.permute.xlu0 %4756 }
 0x7a2   : > { %v4846_v34 = vmul.f32 %v4822_v13, %v4786_v48  ;;  %v4847_v56 = vmul.f32 %v4822_v13, %v4787_v14  ;;  %v4848_v36 = vmul.f32 %v4822_v13, %v4788_v4  ;;  %v4849_v33 = vmul.f32 %v4822_v13, %v4789_v52 }
 0x7a3   : > { %v4850_v58 = vmul.f32 %v4822_v13, %v4790_v25  ;;  %v4851_v17 = vmul.f32 %v4822_v13, %v4791_v61  ;;  %v4903_v10 = vadd.f32 %v4882_v40, %v4843_v53  ;;  %v4904_v26 = vadd.f32 %v4882_v40, %v4844_v20 }
 0x7a4   : > { %v4905_v45 = vadd.f32 %v4882_v40, %v4845_v1  ;;  %v4906_v6 = vadd.f32 %v4882_v40, %v4846_v34  ;;  %v4907_v8 = vadd.f32 %v4882_v40, %v4847_v56  ;;  %v4908_v24 = vadd.f32 %v4882_v40, %v4848_v36 }
 0x7a5   : > { %v4909_v46 = vadd.f32 %v4882_v40, %v4849_v33  ;;  %v4910_v42 = vadd.f32 %v4882_v40, %v4850_v58  ;;  %v4911_v35 = vadd.f32 %v4882_v40, %v4851_v17  ;;  %vm4940_vm6 = vcmp.ge.f32.partialorder %v4903_v10, 0.0 }
 0x7a6   : > { %vm4941_vm8 = vcmp.ge.f32.partialorder %v4904_v26, 0.0  ;;  %vm4942_vm15 = vcmp.ge.f32.partialorder %v4905_v45, 0.0  ;;  %vm4943_vm7 = vcmp.ge.f32.partialorder %v4906_v6, 0.0  ;;  %vm4944_vm9 = vcmp.ge.f32.partialorder %v4907_v8, 0.0 }
 0x7a7   : > { %vm4945_vm10 = vcmp.ge.f32.partialorder %v4908_v24, 0.0  ;;  %vm4946_vm3 = vcmp.ge.f32.partialorder %v4909_v46, 0.0  ;;  %vm4947_vm11 = vcmp.ge.f32.partialorder %v4910_v42, 0.0  ;;  %vm4948_vm1 = vcmp.ge.f32.partialorder %v4911_v35, 0.0 }
 0x7a8   : > { %v4977_v2 = vmul.f32 %v9021_v9, %v4903_v10  ;;  %v4978_v31 = vmul.f32 %v9021_v9, %v4904_v26  ;;  %v4979_v21 = vmul.f32 %v9021_v9, %v4905_v45  ;;  %v4980_v41 = vmul.f32 %v9021_v9, %v4906_v6 }
 0x7a9   : > { %v4981_v7 = vmul.f32 %v9021_v9, %v4907_v8  ;;  %v4982_v13 = vmul.f32 %v9021_v9, %v4908_v24  ;;  %v4983_v0 = vmul.f32 %v9021_v9, %v4909_v46  ;;  %v4984_v19 = vmul.f32 %v9021_v9, %v4910_v42 }
 0x7aa   : > { %v4985_v62 = vmul.f32 %v9021_v9, %v4911_v35  ;;  %v5013_v48 = vsel %vm4940_vm6, %v4903_v10, %v4977_v2  ;;  %v5014_v14 = vsel %vm4941_vm8, %v4904_v26, %v4978_v31  ;;  %v5015_v4 = vsel %vm4942_vm15, %v4905_v45, %v4979_v21 }
 0x7ab   : > { %v5016_v52 = vsel %vm4943_vm7, %v4906_v6, %v4980_v41  ;;  %v5017_v25 = vsel %vm4944_vm9, %v4907_v8, %v4981_v7  ;;  %v5018_v61 = vsel %vm4945_vm10, %v4908_v24, %v4982_v13  ;;  %v5019_v53 = vsel %vm4946_vm3, %v4909_v46, %v4983_v0  ;;  %5049 = vst [vmem:[%s9051_s14 + $0x48] sm:$0xff] %v5013_v48  ;;  %v4772_v41 = vpop.permute.xlu0 %4771 }
 0x7ac   : > { %5050 = vst [vmem:[%s9051_s14 + $0x50] sm:$0xff] %v5014_v14  ;;  %5051 = vst [vmem:[%s9051_s14 + $0x58] sm:$0xff] %v5015_v4  ;;  %v5020_v20 = vsel %vm4947_vm11, %v4910_v42, %v4984_v19  ;;  %v5021_v1 = vsel %vm4948_vm1, %v4911_v35, %v4985_v62  ;;  %v4774_v40 = vmul.f32 %v4757_v29, %v8886_v23 }
 0x7ad   : > { %5052 = vst [vmem:[%s9051_s14 + $0x60] sm:$0xff] %v5016_v52  ;;  %5053 = vst [vmem:[%s9051_s14 + $0x68] sm:$0xff] %v5017_v25  ;;  %v4775_v34 = vmul.f32 %v4757_v29, %v8889_v27  ;;  %v4776_v56 = vmul.f32 %v4757_v29, %v8892_v50  ;;  %v4777_v36 = vmul.f32 %v4757_v29, %v8901_v32 }
 0x7ae   : > { %5054 = vst [vmem:[%s9051_s14 + $0x70] sm:$0xff] %v5018_v61  ;;  %5055 = vst [vmem:[%s9051_s14 + $0x78] sm:$0xff] %v5019_v53  ;;  %v4778_v33 = vmul.f32 %v4757_v29, %v8908_v39  ;;  %v4779_v58 = vmul.f32 %v4757_v29, %v8915_v55  ;;  %v4780_v17 = vmul.f32 %v4757_v29, %v8920_v22 }
 0x7af   : > { %5056 = vst [vmem:[%s9051_s14 + $0x80] sm:$0xff] %v5020_v20  ;;  %5057 = vst [vmem:[%s9051_s14 + $0x88] sm:$0xff] %v5021_v1  ;;  %v4781_v10 = vmul.f32 %v4757_v29, %v8934_v60  ;;  %v4782_v26 = vmul.f32 %v4757_v29, %v8939_v5  ;;  %v4834_v23 = vmul.f32 %v9013_v11, %v4774_v40 }
 0x7b0   : > { %v4835_v27 = vmul.f32 %v9013_v11, %v4775_v34  ;;  %v4836_v45 = vmul.f32 %v9013_v11, %v4776_v56  ;;  %v4837_v50 = vmul.f32 %v9013_v11, %v4777_v36  ;;  %v4838_v32 = vmul.f32 %v9013_v11, %v4778_v33 }
 0x7b1   : > { %v4839_v39 = vmul.f32 %v9013_v11, %v4779_v58  ;;  %v4840_v55 = vmul.f32 %v9013_v11, %v4780_v17  ;;  %v4841_v22 = vmul.f32 %v9013_v11, %v4781_v10  ;;  %v4842_v60 = vmul.f32 %v9013_v11, %v4782_v26  ;;  %v4892_v26 = vpop.permute.xlu0 %4891 }
 0x7b2   : > { %v4894_v5 = vadd.f32 %v9017_v57, %v4834_v23  ;;  %v4895_v6 = vadd.f32 %v9017_v57, %v4835_v27  ;;  %v4896_v8 = vadd.f32 %v9017_v57, %v4836_v45  ;;  %v4897_v24 = vadd.f32 %v9017_v57, %v4837_v50 }
 0x7b3   : > { %v4898_v46 = vadd.f32 %v9017_v57, %v4838_v32  ;;  %v4899_v42 = vadd.f32 %v9017_v57, %v4839_v39  ;;  %v4900_v35 = vadd.f32 %v9017_v57, %v4840_v55  ;;  %v4901_v2 = vadd.f32 %v9017_v57, %v4841_v22 }
 0x7b4   : > { %v4902_v31 = vadd.f32 %v9017_v57, %v4842_v60  ;;  %vm4931_vm12 = vcmp.ge.f32.partialorder %v4894_v5, 0.0  ;;  %vm4932_vm2 = vcmp.ge.f32.partialorder %v4895_v6, 0.0  ;;  %vm4933_vm5 = vcmp.ge.f32.partialorder %v4896_v8, 0.0 }
 0x7b5   : > { %vm4934_vm4 = vcmp.ge.f32.partialorder %v4897_v24, 0.0  ;;  %vm4935_vm13 = vcmp.ge.f32.partialorder %v4898_v46, 0.0  ;;  %vm4936_vm14 = vcmp.ge.f32.partialorder %v4899_v42, 0.0  ;;  %vm4937_vm0 = vcmp.ge.f32.partialorder %v4900_v35, 0.0 }
 0x7b6   : > { %vm4938_vm6 = vcmp.ge.f32.partialorder %v4901_v2, 0.0  ;;  %vm4939_vm8 = vcmp.ge.f32.partialorder %v4902_v31, 0.0  ;;  %v4968_v11 = vmul.f32 %v9021_v9, %v4894_v5  ;;  %v4969_v21 = vmul.f32 %v9021_v9, %v4895_v6 }
 0x7b7   : > { %v4970_v7 = vmul.f32 %v9021_v9, %v4896_v8  ;;  %v4971_v13 = vmul.f32 %v9021_v9, %v4897_v24  ;;  %v4972_v57 = vmul.f32 %v9021_v9, %v4898_v46  ;;  %v4973_v0 = vmul.f32 %v9021_v9, %v4899_v42 }
 0x7b8   : > { %v4974_v19 = vmul.f32 %v9021_v9, %v4900_v35  ;;  %v4975_v29 = vmul.f32 %v9021_v9, %v4901_v2  ;;  %v4976_v62 = vmul.f32 %v9021_v9, %v4902_v31  ;;  %v5004_v48 = vsel %vm4931_vm12, %v4894_v5, %v4968_v11 }
 0x7b9   : > { %v5005_v14 = vsel %vm4932_vm2, %v4895_v6, %v4969_v21  ;;  %v5006_v4 = vsel %vm4933_vm5, %v4896_v8, %v4970_v7  ;;  %v5007_v52 = vsel %vm4934_vm4, %v4897_v24, %v4971_v13  ;;  %v5008_v25 = vsel %vm4935_vm13, %v4898_v46, %v4972_v57  ;;  %5040 = vst [vmem:[%s9051_s14] sm:$0xff] %v5004_v48  ;;  %v4767_v6 = vpop.permute.xlu1 %4766 }
 0x7ba   : > { %v5009_v61 = vsel %vm4936_vm14, %v4899_v42, %v4973_v0  ;;  %v5010_v53 = vsel %vm4937_vm0, %v4900_v35, %v4974_v19  ;;  %v5011_v20 = vsel %vm4938_vm6, %v4901_v2, %v4975_v29  ;;  %v5012_v1 = vsel %vm4939_vm8, %v4902_v31, %v4976_v62  ;;  %5041 = vst [vmem:[%s9051_s14 + $0x8] sm:$0xff] %v5005_v14 }
 0x7bb   : > { %5042 = vst [vmem:[%s9051_s14 + $0x10] sm:$0xff] %v5006_v4  ;;  %5043 = vst [vmem:[%s9051_s14 + $0x18] sm:$0xff] %v5007_v52  ;;  %v4801_v40 = vmul.f32 %v4772_v41, %v8805_v38  ;;  %v4802_v34 = vmul.f32 %v4772_v41, %v8808_v16  ;;  %v4803_v56 = vmul.f32 %v4772_v41, %v8811_v63 }
 0x7bc   : > { %5044 = vst [vmem:[%s9051_s14 + $0x20] sm:$0xff] %v5008_v25  ;;  %5045 = vst [vmem:[%s9051_s14 + $0x28] sm:$0xff] %v5009_v61  ;;  %v4804_v36 = vmul.f32 %v4772_v41, %v8814_v37  ;;  %v4805_v33 = vmul.f32 %v4772_v41, %v8817_v12  ;;  %v4806_v58 = vmul.f32 %v4772_v41, %v8820_v43 }
 0x7bd   : > { %5046 = vst [vmem:[%s9051_s14 + $0x30] sm:$0xff] %v5010_v53  ;;  %5047 = vst [vmem:[%s9051_s14 + $0x38] sm:$0xff] %v5011_v20  ;;  %v4807_v17 = vmul.f32 %v4772_v41, %v8829_v15  ;;  %v4808_v10 = vmul.f32 %v4772_v41, %v8834_v49  ;;  %v4809_v23 = vmul.f32 %v4772_v41, %v8836_v44  ;;  %v9927_v53 = vld [vmem:[#allocation34_spill] sm:$0xff] }
 0x7be   : > { %5048 = vst [vmem:[%s9051_s14 + $0x40] sm:$0xff] %v5012_v1  ;;  %v4861_v27 = vmul.f32 %v9019_v28, %v4801_v40  ;;  %v4862_v38 = vmul.f32 %v9019_v28, %v4802_v34  ;;  %v4863_v16 = vmul.f32 %v9019_v28, %v4803_v56  ;;  %v4864_v63 = vmul.f32 %v9019_v28, %v4804_v36  ;;  %v9928_v1 = vld [vmem:[#allocation31_spill] sm:$0xff]  ;;  %v9929_v34 = vld [vmem:[#allocation36_spill] sm:$0xff]  ;;  %v4887_v36 = vpop.permute.xlu1 %4886 }
 0x7bf   : > { %v4865_v37 = vmul.f32 %v9019_v28, %v4805_v33  ;;  %v4866_v12 = vmul.f32 %v9019_v28, %v4806_v58  ;;  %v4867_v43 = vmul.f32 %v9019_v28, %v4807_v17  ;;  %v4868_v15 = vmul.f32 %v9019_v28, %v4808_v10 }
 0x7c0   : > { %v4869_v49 = vmul.f32 %v9019_v28, %v4809_v23  ;;  %v4921_v45 = vadd.f32 %v4892_v26, %v4861_v27  ;;  %v4922_v44 = vadd.f32 %v4892_v26, %v4862_v38  ;;  %v4923_v50 = vadd.f32 %v4892_v26, %v4863_v16 }
 0x7c1   : > { %v4924_v32 = vadd.f32 %v4892_v26, %v4864_v63  ;;  %v4925_v39 = vadd.f32 %v4892_v26, %v4865_v37  ;;  %v4926_v55 = vadd.f32 %v4892_v26, %v4866_v12  ;;  %v4927_v22 = vadd.f32 %v4892_v26, %v4867_v43 }
 0x7c2   : > { %v4928_v60 = vadd.f32 %v4892_v26, %v4868_v15  ;;  %v4929_v5 = vadd.f32 %v4892_v26, %v4869_v49  ;;  %vm4958_vm15 = vcmp.ge.f32.partialorder %v4921_v45, 0.0  ;;  %vm4959_vm7 = vcmp.ge.f32.partialorder %v4922_v44, 0.0 }
 0x7c3   : > { %vm4960_vm9 = vcmp.ge.f32.partialorder %v4923_v50, 0.0  ;;  %vm4961_vm10 = vcmp.ge.f32.partialorder %v4924_v32, 0.0  ;;  %vm4962_vm3 = vcmp.ge.f32.partialorder %v4925_v39, 0.0  ;;  %vm4963_vm11 = vcmp.ge.f32.partialorder %v4926_v55, 0.0 }
 0x7c4   : > { %vm4964_vm1 = vcmp.ge.f32.partialorder %v4927_v22, 0.0  ;;  %vm4965_vm12 = vcmp.ge.f32.partialorder %v4928_v60, 0.0  ;;  %vm4966_vm2 = vcmp.ge.f32.partialorder %v4929_v5, 0.0  ;;  %v4995_v28 = vmul.f32 %v9021_v9, %v4921_v45 }
 0x7c5   : > { %v4996_v8 = vmul.f32 %v9021_v9, %v4922_v44  ;;  %v4997_v24 = vmul.f32 %v9021_v9, %v4923_v50  ;;  %v4998_v46 = vmul.f32 %v9021_v9, %v4924_v32  ;;  %v4999_v42 = vmul.f32 %v9021_v9, %v4925_v39 }
 0x7c6   : > { %v5000_v35 = vmul.f32 %v9021_v9, %v4926_v55  ;;  %v5001_v2 = vmul.f32 %v9021_v9, %v4927_v22  ;;  %v5002_v31 = vmul.f32 %v9021_v9, %v4928_v60  ;;  %v5003_v11 = vmul.f32 %v9021_v9, %v4929_v5 }
 0x7c7   : > { %v5031_v21 = vsel %vm4958_vm15, %v4921_v45, %v4995_v28  ;;  %v5032_v41 = vsel %vm4959_vm7, %v4922_v44, %v4996_v8  ;;  %v5033_v7 = vsel %vm4960_vm9, %v4923_v50, %v4997_v24  ;;  %v5034_v13 = vsel %vm4961_vm10, %v4924_v32, %v4998_v46 }
 0x7c8   : > { %v5035_v57 = vsel %vm4962_vm3, %v4925_v39, %v4999_v42  ;;  %v5036_v0 = vsel %vm4963_vm11, %v4926_v55, %v5000_v35  ;;  %v5037_v19 = vsel %vm4964_vm1, %v4927_v22, %v5001_v2  ;;  %5067 = vst [vmem:[%s9051_s14 + $0xd8] sm:$0xff] %v5031_v21  ;;  %5068 = vst [vmem:[%s9051_s14 + $0xe0] sm:$0xff] %v5032_v41 }
 0x7c9   : > { %5069 = vst [vmem:[%s9051_s14 + $0xe8] sm:$0xff] %v5033_v7  ;;  %v5038_v29 = vsel %vm4965_vm12, %v4928_v60, %v5002_v31  ;;  %v5039_v62 = vsel %vm4966_vm2, %v4929_v5, %v5003_v11  ;;  %5070 = vst [vmem:[%s9051_s14 + $0xf0] sm:$0xff] %v5034_v13  ;;  %v4792_v48 = vmul.f32 %v4767_v6, %v8845_v3 }
 0x7ca   : > { %5071 = vst [vmem:[%s9051_s14 + $0xf8] sm:$0xff] %v5035_v57  ;;  %5072 = vst [vmem:[%s9051_s14 + $0x100] sm:$0xff] %v5036_v0  ;;  %v4793_v14 = vmul.f32 %v4767_v6, %v8848_v18  ;;  %v4794_v4 = vmul.f32 %v4767_v6, %v8851_v54  ;;  %v4795_v52 = vmul.f32 %v4767_v6, %v8854_v47 }
 0x7cb   : > { %5073 = vst [vmem:[%s9051_s14 + $0x108] sm:$0xff] %v5037_v19  ;;  %5074 = vst [vmem:[%s9051_s14 + $0x110] sm:$0xff] %v5038_v29  ;;  %v4796_v25 = vmul.f32 %v4767_v6, %v8865_v51  ;;  %v4797_v61 = vmul.f32 %v4767_v6, %v8870_v59  ;;  %v4798_v20 = vmul.f32 %v4767_v6, %v9927_v53 }
 0x7cc   : > { %5075 = vst [vmem:[%s9051_s14 + $0x118] sm:$0xff] %v5039_v62  ;;  %v4799_v40 = vmul.f32 %v4767_v6, %v9928_v1  ;;  %v4800_v56 = vmul.f32 %v4767_v6, %v9929_v34  ;;  %v4852_v3 = vmul.f32 %v9015_v30, %v4792_v48  ;;  %v4853_v18 = vmul.f32 %v9015_v30, %v4793_v14 }
 0x7cd   : > { %v4854_v33 = vmul.f32 %v9015_v30, %v4794_v4  ;;  %v4855_v54 = vmul.f32 %v9015_v30, %v4795_v52  ;;  %v4856_v47 = vmul.f32 %v9015_v30, %v4796_v25  ;;  %v4857_v51 = vmul.f32 %v9015_v30, %v4797_v61 }
 0x7ce   : > { %v4858_v59 = vmul.f32 %v9015_v30, %v4798_v20  ;;  %v4859_v58 = vmul.f32 %v9015_v30, %v4799_v40  ;;  %v4860_v17 = vmul.f32 %v9015_v30, %v4800_v56  ;;  %v4912_v10 = vadd.f32 %v4887_v36, %v4852_v3 }
 0x7cf   : > { %v4913_v26 = vadd.f32 %v4887_v36, %v4853_v18  ;;  %v4914_v23 = vadd.f32 %v4887_v36, %v4854_v33  ;;  %v4915_v27 = vadd.f32 %v4887_v36, %v4855_v54  ;;  %v4916_v38 = vadd.f32 %v4887_v36, %v4856_v47 }
 0x7d0   : > { %v4917_v16 = vadd.f32 %v4887_v36, %v4857_v51  ;;  %v4918_v63 = vadd.f32 %v4887_v36, %v4858_v59  ;;  %v4919_v37 = vadd.f32 %v4887_v36, %v4859_v58  ;;  %v4920_v12 = vadd.f32 %v4887_v36, %v4860_v17 }
 0x7d1   : > { %vm4949_vm5 = vcmp.ge.f32.partialorder %v4912_v10, 0.0  ;;  %vm4950_vm4 = vcmp.ge.f32.partialorder %v4913_v26, 0.0  ;;  %vm4951_vm13 = vcmp.ge.f32.partialorder %v4914_v23, 0.0  ;;  %vm4952_vm14 = vcmp.ge.f32.partialorder %v4915_v27, 0.0 }
 0x7d2   : > { %vm4953_vm0 = vcmp.ge.f32.partialorder %v4916_v38, 0.0  ;;  %vm4954_vm6 = vcmp.ge.f32.partialorder %v4917_v16, 0.0  ;;  %vm4955_vm8 = vcmp.ge.f32.partialorder %v4918_v63, 0.0  ;;  %vm4956_vm15 = vcmp.ge.f32.partialorder %v4919_v37, 0.0 }
 0x7d3   : > { %vm4957_vm7 = vcmp.ge.f32.partialorder %v4920_v12, 0.0  ;;  %v4986_v30 = vmul.f32 %v9021_v9, %v4912_v10  ;;  %v4987_v43 = vmul.f32 %v9021_v9, %v4913_v26  ;;  %v4988_v15 = vmul.f32 %v9021_v9, %v4914_v23 }
 0x7d4   : > { %v4989_v49 = vmul.f32 %v9021_v9, %v4915_v27  ;;  %v4990_v45 = vmul.f32 %v9021_v9, %v4916_v38  ;;  %v4991_v44 = vmul.f32 %v9021_v9, %v4917_v16  ;;  %v4992_v50 = vmul.f32 %v9021_v9, %v4918_v63 }
 0x7d5   : > { %v4993_v32 = vmul.f32 %v9021_v9, %v4919_v37  ;;  %v4994_v39 = vmul.f32 %v9021_v9, %v4920_v12  ;;  %v5022_v55 = vsel %vm4949_vm5, %v4912_v10, %v4986_v30  ;;  %v5023_v22 = vsel %vm4950_vm4, %v4913_v26, %v4987_v43 }
 0x7d6   : > { %v5024_v60 = vsel %vm4951_vm13, %v4914_v23, %v4988_v15  ;;  %v5025_v5 = vsel %vm4952_vm14, %v4915_v27, %v4989_v49  ;;  %v5026_v9 = vsel %vm4953_vm0, %v4916_v38, %v4990_v45  ;;  %5058 = vst [vmem:[%s9051_s14 + $0x90] sm:$0xff] %v5022_v55  ;;  %v5027_v6 = vsel %vm4954_vm6, %v4917_v16, %v4991_v44 }
 0x7d7   : > { %v5028_v28 = vsel %vm4955_vm8, %v4918_v63, %v4992_v50  ;;  %v5029_v8 = vsel %vm4956_vm15, %v4919_v37, %v4993_v32  ;;  %v5030_v24 = vsel %vm4957_vm7, %v4920_v12, %v4994_v39  ;;  %5059 = vst [vmem:[%s9051_s14 + $0x98] sm:$0xff] %v5023_v22  ;;  %5060 = vst [vmem:[%s9051_s14 + $0xa0] sm:$0xff] %v5024_v60 }
 0x7d8   : > { %5061 = vst [vmem:[%s9051_s14 + $0xa8] sm:$0xff] %v5025_v5  ;;  %5062 = vst [vmem:[%s9051_s14 + $0xb0] sm:$0xff] %v5026_v9 }
 0x7d9   : > { %5063 = vst [vmem:[%s9051_s14 + $0xb8] sm:$0xff] %v5027_v6  ;;  %5064 = vst [vmem:[%s9051_s14 + $0xc0] sm:$0xff] %v5028_v28 }
 0x7da   : > { %5065 = vst [vmem:[%s9051_s14 + $0xc8] sm:$0xff] %v5029_v8  ;;  %5066 = vst [vmem:[%s9051_s14 + $0xd0] sm:$0xff] %v5030_v24 }
 0x7db   : > { %5717 = shalt.err (!%p5714_p10)
}
 0x7dc   : > { %s5718_s20 = scalar_lea.hbm %s9196_s15, 4608  ;;  %s5722_s16 = scalar_lea.hbm %s9932_s17, 9216 }
 0x7dd   : > { %p5719_p0 = scmp.ne.s32.totalorder %s9196_s15, %s5718_s20  ;;  %p5723_p1 = scmp.lt.s32.totalorder %s9196_s15, %s9932_s17 }
 0x7de   : > { %p5724_p3 = scmp.lt.s32.totalorder %s5722_s16, %s5718_s20 }
 0x7df   : > { %p5720_p2 = pnand %p5719_p0, %p9934_p12 }
 0x7e0   : > { %p5725_p6 = por %p5724_p3, %p5723_p1 }
 0x7e1   : > { %p5721_p9 = pneg %p5720_p2 }
 0x7e3   : > { %p5726_p11 = pnand %p5725_p6, %p5721_p9 }
 0x7e5   : > { %5729 = shalt.err (!%p5726_p11)
}
 0x7e6   : > { %s5801_s11 = smov 1152  }
 0x7e7   : > { %5520 = dma.vmem_to_hbm [thread:$0]  (%p9934_p12), %s9203_s28, 4608, %s9196_s15, %s5077_s12, %s5801_s11, %s5801_s11, %s9647_s9  }
 0x7e8 PF: > { %s9935_s25 = sld [smem:[#allocation10_spill]] }
 0x7e9   : > { %s9936_s14 = sld [smem:[#allocation18_spill]] }
 0x7ea   : > { %s9937_s24 = sld [smem:[#allocation13_spill]] }
 0x7ee   : > { %s5105_s27 = sand.u32 1, %s9935_s25  }
 0x7ef   : > { %p9938_p13 = scmp.ne.s32.totalorder %s9936_s14, 0  ;;  %s5106_s0 = scalar_lea.sflag [#allocation6], %s5105_s27 }
 0x7f0   : > { %p9939_p4 = scmp.ge.s32.totalorder %s9937_s24, 2 }
 0x7f2   : > { %p5527_p5 = pnand %p9939_p4, %p9938_p13 }
 0x7f4   : > { %p5528_p7 = pneg %p5527_p5 }
 0x7f6   : > { %5751 = dma.done.wait (%p5528_p7), %s5106_s0, 4608  }
 0x7f7   : > { %5753 = vsyncadd (%p5528_p7), %s5106_s0, 4294962688  ;;  %s9940_s10 = sld [smem:[#allocation15_spill]] }
 0x7f8   : > { %s9941_s29 = sld [smem:[#allocation11_spill]] }
 0x7f9   : > { %s9942_s30 = sld [smem:[#allocation12_spill]] }
 0x7fa   : > { %s9943_s9 = sld [smem:[#allocation16_spill]] }
 0x7fd   : > { %p22_p8 = scmp.ge.s32.totalorder %s9940_s10, 4  }
 0x7ff   :  { %24 = sbr.rel (!%p22_p8) target bundleno = 9 (0x9), region = 97 }
 0x804   :  { %5111 = vsyncpa [#allocation5], 1 }
 0x805   :  { %5113 = vsyncpa [#allocation5 + $0x1], 1 }
 0x806   :  { %5114 = vsyncpa [#allocation6], 1 }
 0x807   :  { %5116 = vsyncpa [#allocation6 + $0x1], 1 }

</bundles_post_ra>
